<compile_context>
chip_gen: v6e
topology: v6e:2x2x1
jax: 0.10.0
libtpu: 0.0.40
codegen_flags: <defaults>
</compile_context>

<pallas_src>
import functools

import jax
import jax.numpy as jnp
from jax.experimental import pallas as pl
from jax.experimental.pallas import tpu as pltpu

P = 128                 # lane width every real feature block is padded to
NEG_SLOPE = 0.2
MASK_BIAS = -1e30       # additive attention mask value for non-edges


# ----------------------------------------------------------------------------------
# Fused kernel.  refs = [x_pad, A(bf16), mask_bias,
#                        (w_cat, bias)               per RGCN layer,
#                        (w, att_dst_bd, att_src_t, bias) per GAT layer,
#                        out]
# grid step 0 computes the RGCN branch, grid step 1 the GAT branch (megacore-parallel).
# ----------------------------------------------------------------------------------
def _pprgat_kernel(*refs, num_rels, n_rgcn, gat_heads, mean_div):
    it = iter(refs)
    x_ref, a_ref, maskb_ref = next(it), next(it), next(it)
    rgcn_refs = [(next(it), next(it)) for _ in range(n_rgcn)]
    gat_refs = [(next(it), next(it), next(it), next(it)) for _ in range(len(gat_heads))]
    o_ref = next(it)

    branch = pl.program_id(0)

    # ------------------------- grid step 0: RGCN branch -------------------------
    @pl.when(branch == 0)
    def _rgcn_branch():
        x1 = x_ref[...]                                            # (N, P) f32
        for li, (wcat_ref, b_ref) in enumerate(rgcn_refs):
            # W_cat = [root | W_1 | ... | W_R], every block lane-padded to 128 ->
            # one wide bf16 MXU matmul, then aligned 128-lane slices per relation.
            xr = jnp.dot(x1.astype(jnp.bfloat16), wcat_ref[...],
                         preferred_element_type=jnp.float32)       # (N, (R+1)*P) f32
            acc = xr[:, :P] + b_ref[...]
            xr_b = xr.astype(jnp.bfloat16)
            for r in range(num_rels):                              # static, small
                lo = (r + 1) * P
                acc = acc + jnp.dot(a_ref[r], xr_b[:, lo:lo + P],
                                    preferred_element_type=jnp.float32)
            if li < n_rgcn - 1:
                acc = jnp.maximum(acc, 0.0)                        # ReLU between layers
            x1 = acc
        o_ref[0] = x1                                              # lane-dense 128-wide store

    # ------------------------- grid step 1: GAT branch --------------------------
    @pl.when(branch == 1)
    def _gat_branch():
        maskb = maskb_ref[...]                                     # (N, N) f32, 0 / -1e30
        blocks = [x_ref[...]]                                      # 128-lane blocks of x2 (f32)
        n_gat = len(gat_heads)
        for li, (heads, (w_ref, adst_ref, asrct_ref, b_ref)) in enumerate(
                zip(gat_heads, gat_refs)):
            # Feature transform accumulated over aligned 128-row blocks of W (bf16 MXU).
            xp = None
            for kb, blk in enumerate(blocks):
                part = jnp.dot(blk.astype(jnp.bfloat16),
                               w_ref[kb * P:(kb + 1) * P, :],
                               preferred_element_type=jnp.float32)  # (N, H*P)
                xp = part if xp is None else xp + part
            xpb = xp.astype(jnp.bfloat16)

            # Attention logits for ALL heads via two matmuls against block-diagonal
            # attention matrices (no per-head degenerate dots, no in-kernel transposes).
            d_all = jnp.dot(xpb, adst_ref[...],
                            preferred_element_type=jnp.float32)     # (N, H)
            s_all = jax.lax.dot_general(asrct_ref[...], xpb,
                                        (((1,), (1,)), ((), ())),
                                        preferred_element_type=jnp.float32)  # (H, N)

            new_blocks = []
            for h in range(heads):                                  # static, small
                s = d_all[:, h:h + 1] + s_all[h:h + 1, :]            # (N, N) f32
                s = jnp.maximum(s, NEG_SLOPE * s)                    # leaky relu (1 VPU op)
                s = s + maskb                                        # additive -inf mask
                s = s - jnp.max(s, axis=1, keepdims=True)
                e = jnp.exp(s)                                       # masked -> exactly 0 (f32)
                alpha = e * pl.reciprocal(jnp.sum(e, axis=1, keepdims=True), approx=True)
                # per-head PV matmul on an aligned 128-lane slice of x' (no head masking).
                ho = jnp.dot(alpha.astype(jnp.bfloat16),
                             xpb[:, h * P:(h + 1) * P],
                             preferred_element_type=jnp.float32)     # (N, P)
                ho = ho + b_ref[:, h * P:(h + 1) * P]
                if li < n_gat - 1:
                    ho = jnp.maximum(ho, 0.0)                        # ReLU between layers
                new_blocks.append(ho)
            blocks = new_blocks

        # mean over the true (unpadded) output features; padding lanes are exactly zero.
        tot = None
        for blk in blocks:
            ssum = jnp.sum(blk, axis=1, keepdims=True)
            tot = ssum if tot is None else tot + ssum
        mean2 = tot * jnp.float32(1.0 / mean_div)                    # (N, 1)
        o_ref[0] = jnp.broadcast_to(mean2, o_ref.shape[1:])          # lane-dense store


# ----------------------------------------------------------------------------------
# Wrapper: parameter prep (basis decomposition, lane padding, block-diag attention
# matrices) is glue; one fused pallas_call (grid of 2 parallel branch steps) runs the
# whole forward.  The tiny tanh(x1 + mean) combine + class slice is wrapper glue.
# ----------------------------------------------------------------------------------
def pprgat_forward(x, A, mask, params):
    n, f = x.shape
    num_rels = A.shape[0]

    x_pad = jnp.zeros((n, P), jnp.float32).at[:, :f].set(x)
    mask_bias = jnp.where(mask > 0, 0.0, MASK_BIAS).astype(jnp.float32)
    a_bf16 = A.astype(jnp.bfloat16)

    inputs = [x_pad, a_bf16, mask_bias]

    # ---- RGCN params: fold basis decomposition, concat [root | W_r...], pad each block
    n_rgcn = len(params["rgcn"])
    ncls = params["rgcn"][-1]["root"].shape[1]
    for p in params["rgcn"]:
        w_rel = jnp.einsum("rb,bio->rio", p["comp"], p["basis"])    # (R, fin, fout)
        fin, fout = p["root"].shape
        w_cat = jnp.zeros((P, (num_rels + 1) * P), jnp.float32)
        w_cat = w_cat.at[:fin, :fout].set(p["root"])
        for r in range(num_rels):
            w_cat = w_cat.at[:fin, (r + 1) * P:(r + 1) * P + fout].set(w_rel[r])
        bias = jnp.zeros((1, P), jnp.float32).at[0, :fout].set(p["bias"])
        inputs += [w_cat.astype(jnp.bfloat16), bias]

    # ---- GAT params: per-head 128-lane blocks + block-diagonal attention matrices
    gat_heads = []
    in_chunks = [f]                       # true widths of the padded 128-lane input blocks
    for p in params["gat"]:
        h, c = p["heads"], p["out_ch"]
        w = p["w"]                        # (sum(in_chunks), h*c)
        w_pad = jnp.zeros((len(in_chunks) * P, h * P), jnp.float32)
        ro = 0
        for bi, ic in enumerate(in_chunks):
            for bo in range(h):
                w_pad = w_pad.at[bi * P:bi * P + ic, bo * P:bo * P + c].set(
                    w[ro:ro + ic, bo * c:(bo + 1) * c])
            ro += ic
        adst = jnp.zeros((h * P, h), jnp.float32)
        asrct = jnp.zeros((h, h * P), jnp.float32)
        bias = jnp.zeros((1, h * P), jnp.float32)
        for hh in range(h):
            adst = adst.at[hh * P:hh * P + c, hh].set(p["att_dst"][hh])
            asrct = asrct.at[hh, hh * P:hh * P + c].set(p["att_src"][hh])
            bias = bias.at[0, hh * P:hh * P + c].set(p["bias"][hh * c:(hh + 1) * c])
        inputs += [w_pad.astype(jnp.bfloat16), adst.astype(jnp.bfloat16),
                   asrct.astype(jnp.bfloat16), bias]
        gat_heads.append(h)
        in_chunks = [c] * h

    mean_div = gat_heads[-1] * params["gat"][-1]["out_ch"]

    kern = functools.partial(_pprgat_kernel, num_rels=num_rels, n_rgcn=n_rgcn,
                             gat_heads=tuple(gat_heads), mean_div=mean_div)

    def full_spec(a):
        return pl.BlockSpec(a.shape, lambda i, nd=a.ndim: (0,) * nd)

    # rough cost estimate (advisory) --------------------------------------------------
    flops = 0
    for _ in range(n_rgcn):
        flops += 2 * n * P * (num_rels + 1) * P + num_rels * 2 * n * n * P
    nb_in = 1
    for h in gat_heads:
        flops += (nb_in * 2 * n * P * h * P          # feature transform
                  + 2 * 2 * n * (h * P) * h          # block-diag attention matmuls
                  + h * (2 * n * n * P + 8 * n * n))  # per-head PV + softmax elementwise
        nb_in = h
    transcend = sum(h * n * n for h in gat_heads) + sum(gat_heads) * n
    bytes_acc = sum(int(a.size) * a.dtype.itemsize for a in inputs) + 2 * n * P * 4

    out = pl.pallas_call(
        kern,
        out_shape=jax.ShapeDtypeStruct((2, n, P), jnp.float32),
        grid=(2,),                                      # step 0 = RGCN, step 1 = GAT
        in_specs=[full_spec(a) for a in inputs],
        out_specs=pl.BlockSpec((1, n, P), lambda i: (i, 0, 0)),
        compiler_params=pltpu.CompilerParams(
            dimension_semantics=("parallel",),          # two branches -> two v7x TCs
            vmem_limit_bytes=32 * 1024 * 1024),
        cost_estimate=pl.CostEstimate(flops=int(flops),
                                      transcendentals=int(transcend),
                                      bytes_accessed=int(bytes_acc)),
    )(*inputs)

    # combine (tiny wrapper glue): padding lanes of the RGCN slab are exactly zero,
    # the GAT slab holds the per-node mean broadcast over all 128 lanes.
    return jnp.tanh(out[0] + out[1])[:, :ncls]


def _normal(k, shape, scale=0.1):
    return scale * jax.random.normal(k, shape, dtype=jnp.float32)


if __name__ == "__main__":
    # Small config consistent with the module:
    # num_features=8, n_classes=4, num_heads=[2,2,2], num_rels=3, num_bases=2,
    # num_hidden=[8,8], num_hidden_layers_rgcn=3, num_hidden_layers_gat=3,
    # dropout=0.0, activation=ReLU, neg_slope=0.2
    N, F, NCLS = 16, 8, 4
    HID = [8, 8]
    R, B = 3, 2
    HEADS = [2, 2, 2]
    E = 40

    key = jax.random.PRNGKey(0)
    k_x, k_e, k_t, k_p = jax.random.split(key, 4)

    # --- deterministic graph: unique directed (src -> dst) edges, no self-loops ---
    perm = jax.random.permutation(k_e, N * N)
    pairs = []
    for v in perm.tolist():
        d, s = v // N, v % N
        if d != s:
            pairs.append((d, s))
        if len(pairs) == E:
            break
    dst = jnp.array([p[0] for p in pairs], jnp.int32)
    src = jnp.array([p[1] for p in pairs], jnp.int32)
    edge_type = jax.random.randint(k_t, (E,), 0, R)

    # dense per-relation mean-aggregation matrices (RGCN) and neighbour mask (GAT)
    counts = jnp.zeros((R, N, N), jnp.float32).at[edge_type, dst, src].add(1.0)
    deg = counts.sum(axis=2, keepdims=True)
    A = counts / jnp.maximum(deg, 1.0)                         # (R, N, N)
    adj = jnp.zeros((N, N), jnp.float32).at[dst, src].set(1.0)
    mask = jnp.maximum(adj, jnp.eye(N, dtype=jnp.float32))     # self-loops (GATConv add_self_loops)

    # --- node features ---
    x = jax.random.normal(k_x, (N, F), jnp.float32)

    # --- deterministic parameters ---
    keys = iter(jax.random.split(k_p, 24))
    rgcn_params = []
    for fin, fout in [(F, HID[0]), (HID[0], HID[1]), (HID[1], NCLS)]:
        rgcn_params.append(dict(
            basis=_normal(next(keys), (B, fin, fout)),
            comp=_normal(next(keys), (R, B)),
            root=_normal(next(keys), (fin, fout)),
            bias=_normal(next(keys), (fout,), 0.01),
        ))
    # layer input widths chained from the previous layer's concat output (heads * out_ch)
    gat_dims = [(F, HID[0], HEADS[0]),
                (HID[0] * HEADS[0], HID[1], HEADS[1]),
                (HID[1] * HEADS[1], NCLS, HEADS[-1])]
    gat_params = []
    for fin, fout, h in gat_dims:
        gat_params.append(dict(
            w=_normal(next(keys), (fin, h * fout)),
            att_src=_normal(next(keys), (h, fout)),
            att_dst=_normal(next(keys), (h, fout)),
            bias=_normal(next(keys), (h * fout,), 0.01),
            heads=h, out_ch=fout,
        ))

    params = dict(rgcn=rgcn_params, gat=gat_params)

    logits = pprgat_forward(x, A, mask, params)   # (N, n_classes)
    jax.block_until_ready(logits)
    print("KERNEL_OK")
</pallas_src>

<mosaic_0001>
module attributes {stable_mosaic.version = 11 : i64} {
  func.func @_pprgat_kernel(%arg0: i32, %arg1: memref<16x128xf32, #tpu.memory_space<vmem>>, %arg2: memref<3x16x16xbf16, #tpu.memory_space<vmem>>, %arg3: memref<16x16xf32, #tpu.memory_space<vmem>>, %arg4: memref<128x512xbf16, #tpu.memory_space<vmem>>, %arg5: memref<1x128xf32, #tpu.memory_space<vmem>>, %arg6: memref<128x512xbf16, #tpu.memory_space<vmem>>, %arg7: memref<1x128xf32, #tpu.memory_space<vmem>>, %arg8: memref<128x512xbf16, #tpu.memory_space<vmem>>, %arg9: memref<1x128xf32, #tpu.memory_space<vmem>>, %arg10: memref<128x256xbf16, #tpu.memory_space<vmem>>, %arg11: memref<256x2xbf16, #tpu.memory_space<vmem>>, %arg12: memref<2x256xbf16, #tpu.memory_space<vmem>>, %arg13: memref<1x256xf32, #tpu.memory_space<vmem>>, %arg14: memref<256x256xbf16, #tpu.memory_space<vmem>>, %arg15: memref<256x2xbf16, #tpu.memory_space<vmem>>, %arg16: memref<2x256xbf16, #tpu.memory_space<vmem>>, %arg17: memref<1x256xf32, #tpu.memory_space<vmem>>, %arg18: memref<256x256xbf16, #tpu.memory_space<vmem>>, %arg19: memref<256x2xbf16, #tpu.memory_space<vmem>>, %arg20: memref<2x256xbf16, #tpu.memory_space<vmem>>, %arg21: memref<1x256xf32, #tpu.memory_space<vmem>>, %arg22: memref<1x16x128xf32, #tpu.memory_space<vmem>>) attributes {dimension_semantics = [#tpu.dimension_semantics<parallel>], iteration_bounds = array<i64: 2>, scalar_prefetch = 0 : i64, scratch_operands = 0 : i64, tpu.core_type = #tpu.core_type<tc>, window_params = [{pipeline_mode = #tpu.pipeline_mode<synchronous>, transform_indices = @transform_0, window_bounds = array<i64: 16, 128>}, {pipeline_mode = #tpu.pipeline_mode<synchronous>, transform_indices = @transform_1, window_bounds = array<i64: 3, 16, 16>}, {pipeline_mode = #tpu.pipeline_mode<synchronous>, transform_indices = @transform_2, window_bounds = array<i64: 16, 16>}, {pipeline_mode = #tpu.pipeline_mode<synchronous>, transform_indices = @transform_3, window_bounds = array<i64: 128, 512>}, {pipeline_mode = #tpu.pipeline_mode<synchronous>, transform_indices = @transform_4, window_bounds = array<i64: 1, 128>}, {pipeline_mode = #tpu.pipeline_mode<synchronous>, transform_indices = @transform_5, window_bounds = array<i64: 128, 512>}, {pipeline_mode = #tpu.pipeline_mode<synchronous>, transform_indices = @transform_6, window_bounds = array<i64: 1, 128>}, {pipeline_mode = #tpu.pipeline_mode<synchronous>, transform_indices = @transform_7, window_bounds = array<i64: 128, 512>}, {pipeline_mode = #tpu.pipeline_mode<synchronous>, transform_indices = @transform_8, window_bounds = array<i64: 1, 128>}, {pipeline_mode = #tpu.pipeline_mode<synchronous>, transform_indices = @transform_9, window_bounds = array<i64: 128, 256>}, {pipeline_mode = #tpu.pipeline_mode<synchronous>, transform_indices = @transform_10, window_bounds = array<i64: 256, 2>}, {pipeline_mode = #tpu.pipeline_mode<synchronous>, transform_indices = @transform_11, window_bounds = array<i64: 2, 256>}, {pipeline_mode = #tpu.pipeline_mode<synchronous>, transform_indices = @transform_12, window_bounds = array<i64: 1, 256>}, {pipeline_mode = #tpu.pipeline_mode<synchronous>, transform_indices = @transform_13, window_bounds = array<i64: 256, 256>}, {pipeline_mode = #tpu.pipeline_mode<synchronous>, transform_indices = @transform_14, window_bounds = array<i64: 256, 2>}, {pipeline_mode = #tpu.pipeline_mode<synchronous>, transform_indices = @transform_15, window_bounds = array<i64: 2, 256>}, {pipeline_mode = #tpu.pipeline_mode<synchronous>, transform_indices = @transform_16, window_bounds = array<i64: 1, 256>}, {pipeline_mode = #tpu.pipeline_mode<synchronous>, transform_indices = @transform_17, window_bounds = array<i64: 256, 256>}, {pipeline_mode = #tpu.pipeline_mode<synchronous>, transform_indices = @transform_18, window_bounds = array<i64: 256, 2>}, {pipeline_mode = #tpu.pipeline_mode<synchronous>, transform_indices = @transform_19, window_bounds = array<i64: 2, 256>}, {pipeline_mode = #tpu.pipeline_mode<synchronous>, transform_indices = @transform_20, window_bounds = array<i64: 1, 256>}, {transform_indices = @transform_21, window_bounds = array<i64: 1, 16, 128>}]} {
    %c0_i32 = arith.constant 0 : i32
    %0 = arith.cmpi eq, %arg0, %c0_i32 : i32
    %1 = arith.extui %0 : i1 to i32
    %c0_i32_0 = arith.constant 0 : i32
    %2 = arith.cmpi ne, %1, %c0_i32_0 : i32
    scf.if %2 {
      %c0 = arith.constant 0 : index
      %c0_2 = arith.constant 0 : index
      %6 = vector.load %arg1[%c0, %c0_2] : memref<16x128xf32, #tpu.memory_space<vmem>>, vector<16x128xf32>
      %7 = arith.truncf %6 : vector<16x128xf32> to vector<16x128xbf16>
      %c0_3 = arith.constant 0 : index
      %c0_4 = arith.constant 0 : index
      %8 = vector.load %arg4[%c0_3, %c0_4] : memref<128x512xbf16, #tpu.memory_space<vmem>>, vector<128x512xbf16>
      %cst = arith.constant dense<0.000000e+00> : vector<16x512xf32>
      %9 = tpu.matmul %7, %8, %cst {dimension_numbers = #tpu.dot_dimension_numbers<[1], [0], [0], [1], [0, 0, 1, 1], [], []>} : vector<16x128xbf16>, vector<128x512xbf16>, vector<16x512xf32> -> vector<16x512xf32>
      %10 = vector.extract_strided_slice %9 {offsets = [0, 0], sizes = [16, 128], strides = [1, 1]} : vector<16x512xf32> to vector<16x128xf32>
      %c0_5 = arith.constant 0 : index
      %c0_6 = arith.constant 0 : index
      %11 = vector.load %arg5[%c0_5, %c0_6] : memref<1x128xf32, #tpu.memory_space<vmem>>, vector<1x128xf32>
      %12 = vector.broadcast %11 : vector<1x128xf32> to vector<16x128xf32>
      %13 = arith.addf %10, %12 : vector<16x128xf32>
      %14 = arith.truncf %9 : vector<16x512xf32> to vector<16x512xbf16>
      %c0_7 = arith.constant 0 : index
      %c0_8 = arith.constant 0 : index
      %c0_9 = arith.constant 0 : index
      %15 = vector.load %arg2[%c0_7, %c0_8, %c0_9] : memref<3x16x16xbf16, #tpu.memory_space<vmem>>, vector<1x16x16xbf16>
      %16 = vector.shape_cast %15 : vector<1x16x16xbf16> to vector<16x16xbf16>
      %17 = vector.extract_strided_slice %14 {offsets = [0, 128], sizes = [16, 128], strides = [1, 1]} : vector<16x512xbf16> to vector<16x128xbf16>
      %cst_10 = arith.constant dense<0.000000e+00> : vector<16x128xf32>
      %18 = tpu.matmul %16, %17, %cst_10 {dimension_numbers = #tpu.dot_dimension_numbers<[1], [0], [0], [1], [0, 0, 1, 1], [], []>} : vector<16x16xbf16>, vector<16x128xbf16>, vector<16x128xf32> -> vector<16x128xf32>
      %19 = arith.addf %13, %18 : vector<16x128xf32>
      %c1 = arith.constant 1 : index
      %c0_11 = arith.constant 0 : index
      %c0_12 = arith.constant 0 : index
      %20 = vector.load %arg2[%c1, %c0_11, %c0_12] : memref<3x16x16xbf16, #tpu.memory_space<vmem>>, vector<1x16x16xbf16>
      %21 = vector.shape_cast %20 : vector<1x16x16xbf16> to vector<16x16xbf16>
      %22 = vector.extract_strided_slice %14 {offsets = [0, 256], sizes = [16, 128], strides = [1, 1]} : vector<16x512xbf16> to vector<16x128xbf16>
      %cst_13 = arith.constant dense<0.000000e+00> : vector<16x128xf32>
      %23 = tpu.matmul %21, %22, %cst_13 {dimension_numbers = #tpu.dot_dimension_numbers<[1], [0], [0], [1], [0, 0, 1, 1], [], []>} : vector<16x16xbf16>, vector<16x128xbf16>, vector<16x128xf32> -> vector<16x128xf32>
      %24 = arith.addf %19, %23 : vector<16x128xf32>
      %c2 = arith.constant 2 : index
      %c0_14 = arith.constant 0 : index
      %c0_15 = arith.constant 0 : index
      %25 = vector.load %arg2[%c2, %c0_14, %c0_15] : memref<3x16x16xbf16, #tpu.memory_space<vmem>>, vector<1x16x16xbf16>
      %26 = vector.shape_cast %25 : vector<1x16x16xbf16> to vector<16x16xbf16>
      %27 = vector.extract_strided_slice %14 {offsets = [0, 384], sizes = [16, 128], strides = [1, 1]} : vector<16x512xbf16> to vector<16x128xbf16>
      %cst_16 = arith.constant dense<0.000000e+00> : vector<16x128xf32>
      %28 = tpu.matmul %26, %27, %cst_16 {dimension_numbers = #tpu.dot_dimension_numbers<[1], [0], [0], [1], [0, 0, 1, 1], [], []>} : vector<16x16xbf16>, vector<16x128xbf16>, vector<16x128xf32> -> vector<16x128xf32>
      %29 = arith.addf %24, %28 : vector<16x128xf32>
      %cst_17 = arith.constant 0.000000e+00 : f32
      %30 = vector.broadcast %cst_17 : f32 to vector<16x128xf32>
      %31 = arith.maximumf %29, %30 : vector<16x128xf32>
      %32 = arith.truncf %31 : vector<16x128xf32> to vector<16x128xbf16>
      %c0_18 = arith.constant 0 : index
      %c0_19 = arith.constant 0 : index
      %33 = vector.load %arg6[%c0_18, %c0_19] : memref<128x512xbf16, #tpu.memory_space<vmem>>, vector<128x512xbf16>
      %cst_20 = arith.constant dense<0.000000e+00> : vector<16x512xf32>
      %34 = tpu.matmul %32, %33, %cst_20 {dimension_numbers = #tpu.dot_dimension_numbers<[1], [0], [0], [1], [0, 0, 1, 1], [], []>} : vector<16x128xbf16>, vector<128x512xbf16>, vector<16x512xf32> -> vector<16x512xf32>
      %35 = vector.extract_strided_slice %34 {offsets = [0, 0], sizes = [16, 128], strides = [1, 1]} : vector<16x512xf32> to vector<16x128xf32>
      %c0_21 = arith.constant 0 : index
      %c0_22 = arith.constant 0 : index
      %36 = vector.load %arg7[%c0_21, %c0_22] : memref<1x128xf32, #tpu.memory_space<vmem>>, vector<1x128xf32>
      %37 = vector.broadcast %36 : vector<1x128xf32> to vector<16x128xf32>
      %38 = arith.addf %35, %37 : vector<16x128xf32>
      %39 = arith.truncf %34 : vector<16x512xf32> to vector<16x512xbf16>
      %c0_23 = arith.constant 0 : index
      %c0_24 = arith.constant 0 : index
      %c0_25 = arith.constant 0 : index
      %40 = vector.load %arg2[%c0_23, %c0_24, %c0_25] : memref<3x16x16xbf16, #tpu.memory_space<vmem>>, vector<1x16x16xbf16>
      %41 = vector.shape_cast %40 : vector<1x16x16xbf16> to vector<16x16xbf16>
      %42 = vector.extract_strided_slice %39 {offsets = [0, 128], sizes = [16, 128], strides = [1, 1]} : vector<16x512xbf16> to vector<16x128xbf16>
      %cst_26 = arith.constant dense<0.000000e+00> : vector<16x128xf32>
      %43 = tpu.matmul %41, %42, %cst_26 {dimension_numbers = #tpu.dot_dimension_numbers<[1], [0], [0], [1], [0, 0, 1, 1], [], []>} : vector<16x16xbf16>, vector<16x128xbf16>, vector<16x128xf32> -> vector<16x128xf32>
      %44 = arith.addf %38, %43 : vector<16x128xf32>
      %c1_27 = arith.constant 1 : index
      %c0_28 = arith.constant 0 : index
      %c0_29 = arith.constant 0 : index
      %45 = vector.load %arg2[%c1_27, %c0_28, %c0_29] : memref<3x16x16xbf16, #tpu.memory_space<vmem>>, vector<1x16x16xbf16>
      %46 = vector.shape_cast %45 : vector<1x16x16xbf16> to vector<16x16xbf16>
      %47 = vector.extract_strided_slice %39 {offsets = [0, 256], sizes = [16, 128], strides = [1, 1]} : vector<16x512xbf16> to vector<16x128xbf16>
      %cst_30 = arith.constant dense<0.000000e+00> : vector<16x128xf32>
      %48 = tpu.matmul %46, %47, %cst_30 {dimension_numbers = #tpu.dot_dimension_numbers<[1], [0], [0], [1], [0, 0, 1, 1], [], []>} : vector<16x16xbf16>, vector<16x128xbf16>, vector<16x128xf32> -> vector<16x128xf32>
      %49 = arith.addf %44, %48 : vector<16x128xf32>
      %c2_31 = arith.constant 2 : index
      %c0_32 = arith.constant 0 : index
      %c0_33 = arith.constant 0 : index
      %50 = vector.load %arg2[%c2_31, %c0_32, %c0_33] : memref<3x16x16xbf16, #tpu.memory_space<vmem>>, vector<1x16x16xbf16>
      %51 = vector.shape_cast %50 : vector<1x16x16xbf16> to vector<16x16xbf16>
      %52 = vector.extract_strided_slice %39 {offsets = [0, 384], sizes = [16, 128], strides = [1, 1]} : vector<16x512xbf16> to vector<16x128xbf16>
      %cst_34 = arith.constant dense<0.000000e+00> : vector<16x128xf32>
      %53 = tpu.matmul %51, %52, %cst_34 {dimension_numbers = #tpu.dot_dimension_numbers<[1], [0], [0], [1], [0, 0, 1, 1], [], []>} : vector<16x16xbf16>, vector<16x128xbf16>, vector<16x128xf32> -> vector<16x128xf32>
      %54 = arith.addf %49, %53 : vector<16x128xf32>
      %cst_35 = arith.constant 0.000000e+00 : f32
      %55 = vector.broadcast %cst_35 : f32 to vector<16x128xf32>
      %56 = arith.maximumf %54, %55 : vector<16x128xf32>
      %57 = arith.truncf %56 : vector<16x128xf32> to vector<16x128xbf16>
      %c0_36 = arith.constant 0 : index
      %c0_37 = arith.constant 0 : index
      %58 = vector.load %arg8[%c0_36, %c0_37] : memref<128x512xbf16, #tpu.memory_space<vmem>>, vector<128x512xbf16>
      %cst_38 = arith.constant dense<0.000000e+00> : vector<16x512xf32>
      %59 = tpu.matmul %57, %58, %cst_38 {dimension_numbers = #tpu.dot_dimension_numbers<[1], [0], [0], [1], [0, 0, 1, 1], [], []>} : vector<16x128xbf16>, vector<128x512xbf16>, vector<16x512xf32> -> vector<16x512xf32>
      %60 = vector.extract_strided_slice %59 {offsets = [0, 0], sizes = [16, 128], strides = [1, 1]} : vector<16x512xf32> to vector<16x128xf32>
      %c0_39 = arith.constant 0 : index
      %c0_40 = arith.constant 0 : index
      %61 = vector.load %arg9[%c0_39, %c0_40] : memref<1x128xf32, #tpu.memory_space<vmem>>, vector<1x128xf32>
      %62 = vector.broadcast %61 : vector<1x128xf32> to vector<16x128xf32>
      %63 = arith.addf %60, %62 : vector<16x128xf32>
      %64 = arith.truncf %59 : vector<16x512xf32> to vector<16x512xbf16>
      %c0_41 = arith.constant 0 : index
      %c0_42 = arith.constant 0 : index
      %c0_43 = arith.constant 0 : index
      %65 = vector.load %arg2[%c0_41, %c0_42, %c0_43] : memref<3x16x16xbf16, #tpu.memory_space<vmem>>, vector<1x16x16xbf16>
      %66 = vector.shape_cast %65 : vector<1x16x16xbf16> to vector<16x16xbf16>
      %67 = vector.extract_strided_slice %64 {offsets = [0, 128], sizes = [16, 128], strides = [1, 1]} : vector<16x512xbf16> to vector<16x128xbf16>
      %cst_44 = arith.constant dense<0.000000e+00> : vector<16x128xf32>
      %68 = tpu.matmul %66, %67, %cst_44 {dimension_numbers = #tpu.dot_dimension_numbers<[1], [0], [0], [1], [0, 0, 1, 1], [], []>} : vector<16x16xbf16>, vector<16x128xbf16>, vector<16x128xf32> -> vector<16x128xf32>
      %69 = arith.addf %63, %68 : vector<16x128xf32>
      %c1_45 = arith.constant 1 : index
      %c0_46 = arith.constant 0 : index
      %c0_47 = arith.constant 0 : index
      %70 = vector.load %arg2[%c1_45, %c0_46, %c0_47] : memref<3x16x16xbf16, #tpu.memory_space<vmem>>, vector<1x16x16xbf16>
      %71 = vector.shape_cast %70 : vector<1x16x16xbf16> to vector<16x16xbf16>
      %72 = vector.extract_strided_slice %64 {offsets = [0, 256], sizes = [16, 128], strides = [1, 1]} : vector<16x512xbf16> to vector<16x128xbf16>
      %cst_48 = arith.constant dense<0.000000e+00> : vector<16x128xf32>
      %73 = tpu.matmul %71, %72, %cst_48 {dimension_numbers = #tpu.dot_dimension_numbers<[1], [0], [0], [1], [0, 0, 1, 1], [], []>} : vector<16x16xbf16>, vector<16x128xbf16>, vector<16x128xf32> -> vector<16x128xf32>
      %74 = arith.addf %69, %73 : vector<16x128xf32>
      %c2_49 = arith.constant 2 : index
      %c0_50 = arith.constant 0 : index
      %c0_51 = arith.constant 0 : index
      %75 = vector.load %arg2[%c2_49, %c0_50, %c0_51] : memref<3x16x16xbf16, #tpu.memory_space<vmem>>, vector<1x16x16xbf16>
      %76 = vector.shape_cast %75 : vector<1x16x16xbf16> to vector<16x16xbf16>
      %77 = vector.extract_strided_slice %64 {offsets = [0, 384], sizes = [16, 128], strides = [1, 1]} : vector<16x512xbf16> to vector<16x128xbf16>
      %cst_52 = arith.constant dense<0.000000e+00> : vector<16x128xf32>
      %78 = tpu.matmul %76, %77, %cst_52 {dimension_numbers = #tpu.dot_dimension_numbers<[1], [0], [0], [1], [0, 0, 1, 1], [], []>} : vector<16x16xbf16>, vector<16x128xbf16>, vector<16x128xf32> -> vector<16x128xf32>
      %79 = arith.addf %74, %78 : vector<16x128xf32>
      %c0_53 = arith.constant 0 : index
      %c0_54 = arith.constant 0 : index
      %c0_55 = arith.constant 0 : index
      %80 = vector.load %arg22[%c0_53, %c0_54, %c0_55] : memref<1x16x128xf32, #tpu.memory_space<vmem>>, vector<1x16x128xf32>
      %81 = vector.shape_cast %80 : vector<1x16x128xf32> to vector<16x128xf32>
      %82 = vector.shape_cast %79 : vector<16x128xf32> to vector<1x16x128xf32>
      tpu.vector_store %arg22[%c0_53, %c0_54, %c0_55], %82 {strides = array<i32>} : memref<1x16x128xf32, #tpu.memory_space<vmem>>, vector<1x16x128xf32>,
    } else {
    }
    %c1_i32 = arith.constant 1 : i32
    %3 = arith.cmpi eq, %arg0, %c1_i32 : i32
    %4 = arith.extui %3 : i1 to i32
    %c0_i32_1 = arith.constant 0 : i32
    %5 = arith.cmpi ne, %4, %c0_i32_1 : i32
    scf.if %5 {
      %c0 = arith.constant 0 : index
      %c0_2 = arith.constant 0 : index
      %6 = vector.load %arg3[%c0, %c0_2] : memref<16x16xf32, #tpu.memory_space<vmem>>, vector<16x16xf32>
      %c0_3 = arith.constant 0 : index
      %c0_4 = arith.constant 0 : index
      %7 = vector.load %arg1[%c0_3, %c0_4] : memref<16x128xf32, #tpu.memory_space<vmem>>, vector<16x128xf32>
      %8 = arith.truncf %7 : vector<16x128xf32> to vector<16x128xbf16>
      %c0_5 = arith.constant 0 : index
      %c0_6 = arith.constant 0 : index
      %9 = vector.load %arg10[%c0_5, %c0_6] : memref<128x256xbf16, #tpu.memory_space<vmem>>, vector<128x256xbf16>
      %cst = arith.constant dense<0.000000e+00> : vector<16x256xf32>
      %10 = tpu.matmul %8, %9, %cst {dimension_numbers = #tpu.dot_dimension_numbers<[1], [0], [0], [1], [0, 0, 1, 1], [], []>} : vector<16x128xbf16>, vector<128x256xbf16>, vector<16x256xf32> -> vector<16x256xf32>
      %11 = arith.truncf %10 : vector<16x256xf32> to vector<16x256xbf16>
      %c0_7 = arith.constant 0 : index
      %c0_8 = arith.constant 0 : index
      %12 = vector.load %arg11[%c0_7, %c0_8] : memref<256x2xbf16, #tpu.memory_space<vmem>>, vector<256x2xbf16>
      %cst_9 = arith.constant dense<0.000000e+00> : vector<16x2xf32>
      %13 = tpu.matmul %11, %12, %cst_9 {dimension_numbers = #tpu.dot_dimension_numbers<[1], [0], [0], [1], [0, 0, 1, 1], [], []>} : vector<16x256xbf16>, vector<256x2xbf16>, vector<16x2xf32> -> vector<16x2xf32>
      %c0_10 = arith.constant 0 : index
      %c0_11 = arith.constant 0 : index
      %14 = vector.load %arg12[%c0_10, %c0_11] : memref<2x256xbf16, #tpu.memory_space<vmem>>, vector<2x256xbf16>
      %cst_12 = arith.constant dense<0.000000e+00> : vector<2x16xf32>
      %15 = tpu.matmul %14, %11, %cst_12 {dimension_numbers = #tpu.dot_dimension_numbers<[1], [1], [0], [0], [0, 0, 1, 0], [], []>} : vector<2x256xbf16>, vector<16x256xbf16>, vector<2x16xf32> -> vector<2x16xf32>
      %16 = vector.extract_strided_slice %13 {offsets = [0, 0], sizes = [16, 1], strides = [1, 1]} : vector<16x2xf32> to vector<16x1xf32>
      %17 = vector.extract_strided_slice %15 {offsets = [0, 0], sizes = [1, 16], strides = [1, 1]} : vector<2x16xf32> to vector<1x16xf32>
      %18 = vector.broadcast %16 : vector<16x1xf32> to vector<16x16xf32>
      %19 = vector.broadcast %17 : vector<1x16xf32> to vector<16x16xf32>
      %20 = arith.addf %18, %19 : vector<16x16xf32>
      %cst_13 = arith.constant 2.000000e-01 : f32
      %21 = vector.broadcast %cst_13 : f32 to vector<16x16xf32>
      %22 = arith.mulf %21, %20 : vector<16x16xf32>
      %23 = arith.maximumf %20, %22 : vector<16x16xf32>
      %24 = arith.addf %23, %6 : vector<16x16xf32>
      %cst_14 = arith.constant dense<0xFF800000> : vector<16xf32>
      %25 = vector.multi_reduction <maximumf>, %24, %cst_14 [1] : vector<16x16xf32> to vector<16xf32>
      %26 = vector.shape_cast %25 : vector<16xf32> to vector<16x1xf32>
      %27 = vector.broadcast %26 : vector<16x1xf32> to vector<16x16xf32>
      %28 = arith.subf %24, %27 : vector<16x16xf32>
      %29 = math.exp %28 : vector<16x16xf32>
      %cst_15 = arith.constant dense<0.000000e+00> : vector<16xf32>
      %30 = vector.multi_reduction <add>, %29, %cst_15 [1] : vector<16x16xf32> to vector<16xf32>
      %31 = vector.shape_cast %30 : vector<16xf32> to vector<16x1xf32>
      %32 = tpu.reciprocal %31 {approx = true} : vector<16x1xf32> -> vector<16x1xf32>
      %33 = vector.broadcast %32 : vector<16x1xf32> to vector<16x16xf32>
      %34 = arith.mulf %29, %33 : vector<16x16xf32>
      %35 = arith.truncf %34 : vector<16x16xf32> to vector<16x16xbf16>
      %36 = vector.extract_strided_slice %11 {offsets = [0, 0], sizes = [16, 128], strides = [1, 1]} : vector<16x256xbf16> to vector<16x128xbf16>
      %cst_16 = arith.constant dense<0.000000e+00> : vector<16x128xf32>
      %37 = tpu.matmul %35, %36, %cst_16 {dimension_numbers = #tpu.dot_dimension_numbers<[1], [0], [0], [1], [0, 0, 1, 1], [], []>} : vector<16x16xbf16>, vector<16x128xbf16>, vector<16x128xf32> -> vector<16x128xf32>
      %c0_17 = arith.constant 0 : index
      %c0_18 = arith.constant 0 : index
      %38 = vector.load %arg13[%c0_17, %c0_18] : memref<1x256xf32, #tpu.memory_space<vmem>>, vector<1x128xf32>
      %39 = vector.broadcast %38 : vector<1x128xf32> to vector<16x128xf32>
      %40 = arith.addf %37, %39 : vector<16x128xf32>
      %cst_19 = arith.constant 0.000000e+00 : f32
      %41 = vector.broadcast %cst_19 : f32 to vector<16x128xf32>
      %42 = arith.maximumf %40, %41 : vector<16x128xf32>
      %43 = vector.extract_strided_slice %13 {offsets = [0, 1], sizes = [16, 1], strides = [1, 1]} : vector<16x2xf32> to vector<16x1xf32>
      %44 = vector.extract_strided_slice %15 {offsets = [1, 0], sizes = [1, 16], strides = [1, 1]} : vector<2x16xf32> to vector<1x16xf32>
      %45 = vector.broadcast %43 : vector<16x1xf32> to vector<16x16xf32>
      %46 = vector.broadcast %44 : vector<1x16xf32> to vector<16x16xf32>
      %47 = arith.addf %45, %46 : vector<16x16xf32>
      %cst_20 = arith.constant 2.000000e-01 : f32
      %48 = vector.broadcast %cst_20 : f32 to vector<16x16xf32>
      %49 = arith.mulf %48, %47 : vector<16x16xf32>
      %50 = arith.maximumf %47, %49 : vector<16x16xf32>
      %51 = arith.addf %50, %6 : vector<16x16xf32>
      %cst_21 = arith.constant dense<0xFF800000> : vector<16xf32>
      %52 = vector.multi_reduction <maximumf>, %51, %cst_21 [1] : vector<16x16xf32> to vector<16xf32>
      %53 = vector.shape_cast %52 : vector<16xf32> to vector<16x1xf32>
      %54 = vector.broadcast %53 : vector<16x1xf32> to vector<16x16xf32>
      %55 = arith.subf %51, %54 : vector<16x16xf32>
      %56 = math.exp %55 : vector<16x16xf32>
      %cst_22 = arith.constant dense<0.000000e+00> : vector<16xf32>
      %57 = vector.multi_reduction <add>, %56, %cst_22 [1] : vector<16x16xf32> to vector<16xf32>
      %58 = vector.shape_cast %57 : vector<16xf32> to vector<16x1xf32>
      %59 = tpu.reciprocal %58 {approx = true} : vector<16x1xf32> -> vector<16x1xf32>
      %60 = vector.broadcast %59 : vector<16x1xf32> to vector<16x16xf32>
      %61 = arith.mulf %56, %60 : vector<16x16xf32>
      %62 = arith.truncf %61 : vector<16x16xf32> to vector<16x16xbf16>
      %63 = vector.extract_strided_slice %11 {offsets = [0, 128], sizes = [16, 128], strides = [1, 1]} : vector<16x256xbf16> to vector<16x128xbf16>
      %cst_23 = arith.constant dense<0.000000e+00> : vector<16x128xf32>
      %64 = tpu.matmul %62, %63, %cst_23 {dimension_numbers = #tpu.dot_dimension_numbers<[1], [0], [0], [1], [0, 0, 1, 1], [], []>} : vector<16x16xbf16>, vector<16x128xbf16>, vector<16x128xf32> -> vector<16x128xf32>
      %c0_24 = arith.constant 0 : index
      %c128 = arith.constant 128 : index
      %65 = vector.load %arg13[%c0_24, %c128] : memref<1x256xf32, #tpu.memory_space<vmem>>, vector<1x128xf32>
      %66 = vector.broadcast %65 : vector<1x128xf32> to vector<16x128xf32>
      %67 = arith.addf %64, %66 : vector<16x128xf32>
      %cst_25 = arith.constant 0.000000e+00 : f32
      %68 = vector.broadcast %cst_25 : f32 to vector<16x128xf32>
      %69 = arith.maximumf %67, %68 : vector<16x128xf32>
      %70 = arith.truncf %42 : vector<16x128xf32> to vector<16x128xbf16>
      %c0_26 = arith.constant 0 : index
      %c0_27 = arith.constant 0 : index
      %71 = vector.load %arg14[%c0_26, %c0_27] : memref<256x256xbf16, #tpu.memory_space<vmem>>, vector<128x256xbf16>
      %cst_28 = arith.constant dense<0.000000e+00> : vector<16x256xf32>
      %72 = tpu.matmul %70, %71, %cst_28 {dimension_numbers = #tpu.dot_dimension_numbers<[1], [0], [0], [1], [0, 0, 1, 1], [], []>} : vector<16x128xbf16>, vector<128x256xbf16>, vector<16x256xf32> -> vector<16x256xf32>
      %73 = arith.truncf %69 : vector<16x128xf32> to vector<16x128xbf16>
      %c128_29 = arith.constant 128 : index
      %c0_30 = arith.constant 0 : index
      %74 = vector.load %arg14[%c128_29, %c0_30] : memref<256x256xbf16, #tpu.memory_space<vmem>>, vector<128x256xbf16>
      %cst_31 = arith.constant dense<0.000000e+00> : vector<16x256xf32>
      %75 = tpu.matmul %73, %74, %cst_31 {dimension_numbers = #tpu.dot_dimension_numbers<[1], [0], [0], [1], [0, 0, 1, 1], [], []>} : vector<16x128xbf16>, vector<128x256xbf16>, vector<16x256xf32> -> vector<16x256xf32>
      %76 = arith.addf %72, %75 : vector<16x256xf32>
      %77 = arith.truncf %76 : vector<16x256xf32> to vector<16x256xbf16>
      %c0_32 = arith.constant 0 : index
      %c0_33 = arith.constant 0 : index
      %78 = vector.load %arg15[%c0_32, %c0_33] : memref<256x2xbf16, #tpu.memory_space<vmem>>, vector<256x2xbf16>
      %cst_34 = arith.constant dense<0.000000e+00> : vector<16x2xf32>
      %79 = tpu.matmul %77, %78, %cst_34 {dimension_numbers = #tpu.dot_dimension_numbers<[1], [0], [0], [1], [0, 0, 1, 1], [], []>} : vector<16x256xbf16>, vector<256x2xbf16>, vector<16x2xf32> -> vector<16x2xf32>
      %c0_35 = arith.constant 0 : index
      %c0_36 = arith.constant 0 : index
      %80 = vector.load %arg16[%c0_35, %c0_36] : memref<2x256xbf16, #tpu.memory_space<vmem>>, vector<2x256xbf16>
      %cst_37 = arith.constant dense<0.000000e+00> : vector<2x16xf32>
      %81 = tpu.matmul %80, %77, %cst_37 {dimension_numbers = #tpu.dot_dimension_numbers<[1], [1], [0], [0], [0, 0, 1, 0], [], []>} : vector<2x256xbf16>, vector<16x256xbf16>, vector<2x16xf32> -> vector<2x16xf32>
      %82 = vector.extract_strided_slice %79 {offsets = [0, 0], sizes = [16, 1], strides = [1, 1]} : vector<16x2xf32> to vector<16x1xf32>
      %83 = vector.extract_strided_slice %81 {offsets = [0, 0], sizes = [1, 16], strides = [1, 1]} : vector<2x16xf32> to vector<1x16xf32>
      %84 = vector.broadcast %82 : vector<16x1xf32> to vector<16x16xf32>
      %85 = vector.broadcast %83 : vector<1x16xf32> to vector<16x16xf32>
      %86 = arith.addf %84, %85 : vector<16x16xf32>
      %cst_38 = arith.constant 2.000000e-01 : f32
      %87 = vector.broadcast %cst_38 : f32 to vector<16x16xf32>
      %88 = arith.mulf %87, %86 : vector<16x16xf32>
      %89 = arith.maximumf %86, %88 : vector<16x16xf32>
      %90 = arith.addf %89, %6 : vector<16x16xf32>
      %cst_39 = arith.constant dense<0xFF800000> : vector<16xf32>
      %91 = vector.multi_reduction <maximumf>, %90, %cst_39 [1] : vector<16x16xf32> to vector<16xf32>
      %92 = vector.shape_cast %91 : vector<16xf32> to vector<16x1xf32>
      %93 = vector.broadcast %92 : vector<16x1xf32> to vector<16x16xf32>
      %94 = arith.subf %90, %93 : vector<16x16xf32>
      %95 = math.exp %94 : vector<16x16xf32>
      %cst_40 = arith.constant dense<0.000000e+00> : vector<16xf32>
      %96 = vector.multi_reduction <add>, %95, %cst_40 [1] : vector<16x16xf32> to vector<16xf32>
      %97 = vector.shape_cast %96 : vector<16xf32> to vector<16x1xf32>
      %98 = tpu.reciprocal %97 {approx = true} : vector<16x1xf32> -> vector<16x1xf32>
      %99 = vector.broadcast %98 : vector<16x1xf32> to vector<16x16xf32>
      %100 = arith.mulf %95, %99 : vector<16x16xf32>
      %101 = arith.truncf %100 : vector<16x16xf32> to vector<16x16xbf16>
      %102 = vector.extract_strided_slice %77 {offsets = [0, 0], sizes = [16, 128], strides = [1, 1]} : vector<16x256xbf16> to vector<16x128xbf16>
      %cst_41 = arith.constant dense<0.000000e+00> : vector<16x128xf32>
      %103 = tpu.matmul %101, %102, %cst_41 {dimension_numbers = #tpu.dot_dimension_numbers<[1], [0], [0], [1], [0, 0, 1, 1], [], []>} : vector<16x16xbf16>, vector<16x128xbf16>, vector<16x128xf32> -> vector<16x128xf32>
      %c0_42 = arith.constant 0 : index
      %c0_43 = arith.constant 0 : index
      %104 = vector.load %arg17[%c0_42, %c0_43] : memref<1x256xf32, #tpu.memory_space<vmem>>, vector<1x128xf32>
      %105 = vector.broadcast %104 : vector<1x128xf32> to vector<16x128xf32>
      %106 = arith.addf %103, %105 : vector<16x128xf32>
      %cst_44 = arith.constant 0.000000e+00 : f32
      %107 = vector.broadcast %cst_44 : f32 to vector<16x128xf32>
      %108 = arith.maximumf %106, %107 : vector<16x128xf32>
      %109 = vector.extract_strided_slice %79 {offsets = [0, 1], sizes = [16, 1], strides = [1, 1]} : vector<16x2xf32> to vector<16x1xf32>
      %110 = vector.extract_strided_slice %81 {offsets = [1, 0], sizes = [1, 16], strides = [1, 1]} : vector<2x16xf32> to vector<1x16xf32>
      %111 = vector.broadcast %109 : vector<16x1xf32> to vector<16x16xf32>
      %112 = vector.broadcast %110 : vector<1x16xf32> to vector<16x16xf32>
      %113 = arith.addf %111, %112 : vector<16x16xf32>
      %cst_45 = arith.constant 2.000000e-01 : f32
      %114 = vector.broadcast %cst_45 : f32 to vector<16x16xf32>
      %115 = arith.mulf %114, %113 : vector<16x16xf32>
      %116 = arith.maximumf %113, %115 : vector<16x16xf32>
      %117 = arith.addf %116, %6 : vector<16x16xf32>
      %cst_46 = arith.constant dense<0xFF800000> : vector<16xf32>
      %118 = vector.multi_reduction <maximumf>, %117, %cst_46 [1] : vector<16x16xf32> to vector<16xf32>
      %119 = vector.shape_cast %118 : vector<16xf32> to vector<16x1xf32>
      %120 = vector.broadcast %119 : vector<16x1xf32> to vector<16x16xf32>
      %121 = arith.subf %117, %120 : vector<16x16xf32>
      %122 = math.exp %121 : vector<16x16xf32>
      %cst_47 = arith.constant dense<0.000000e+00> : vector<16xf32>
      %123 = vector.multi_reduction <add>, %122, %cst_47 [1] : vector<16x16xf32> to vector<16xf32>
      %124 = vector.shape_cast %123 : vector<16xf32> to vector<16x1xf32>
      %125 = tpu.reciprocal %124 {approx = true} : vector<16x1xf32> -> vector<16x1xf32>
      %126 = vector.broadcast %125 : vector<16x1xf32> to vector<16x16xf32>
      %127 = arith.mulf %122, %126 : vector<16x16xf32>
      %128 = arith.truncf %127 : vector<16x16xf32> to vector<16x16xbf16>
      %129 = vector.extract_strided_slice %77 {offsets = [0, 128], sizes = [16, 128], strides = [1, 1]} : vector<16x256xbf16> to vector<16x128xbf16>
      %cst_48 = arith.constant dense<0.000000e+00> : vector<16x128xf32>
      %130 = tpu.matmul %128, %129, %cst_48 {dimension_numbers = #tpu.dot_dimension_numbers<[1], [0], [0], [1], [0, 0, 1, 1], [], []>} : vector<16x16xbf16>, vector<16x128xbf16>, vector<16x128xf32> -> vector<16x128xf32>
      %c0_49 = arith.constant 0 : index
      %c128_50 = arith.constant 128 : index
      %131 = vector.load %arg17[%c0_49, %c128_50] : memref<1x256xf32, #tpu.memory_space<vmem>>, vector<1x128xf32>
      %132 = vector.broadcast %131 : vector<1x128xf32> to vector<16x128xf32>
      %133 = arith.addf %130, %132 : vector<16x128xf32>
      %cst_51 = arith.constant 0.000000e+00 : f32
      %134 = vector.broadcast %cst_51 : f32 to vector<16x128xf32>
      %135 = arith.maximumf %133, %134 : vector<16x128xf32>
      %136 = arith.truncf %108 : vector<16x128xf32> to vector<16x128xbf16>
      %c0_52 = arith.constant 0 : index
      %c0_53 = arith.constant 0 : index
      %137 = vector.load %arg18[%c0_52, %c0_53] : memref<256x256xbf16, #tpu.memory_space<vmem>>, vector<128x256xbf16>
      %cst_54 = arith.constant dense<0.000000e+00> : vector<16x256xf32>
      %138 = tpu.matmul %136, %137, %cst_54 {dimension_numbers = #tpu.dot_dimension_numbers<[1], [0], [0], [1], [0, 0, 1, 1], [], []>} : vector<16x128xbf16>, vector<128x256xbf16>, vector<16x256xf32> -> vector<16x256xf32>
      %139 = arith.truncf %135 : vector<16x128xf32> to vector<16x128xbf16>
      %c128_55 = arith.constant 128 : index
      %c0_56 = arith.constant 0 : index
      %140 = vector.load %arg18[%c128_55, %c0_56] : memref<256x256xbf16, #tpu.memory_space<vmem>>, vector<128x256xbf16>
      %cst_57 = arith.constant dense<0.000000e+00> : vector<16x256xf32>
      %141 = tpu.matmul %139, %140, %cst_57 {dimension_numbers = #tpu.dot_dimension_numbers<[1], [0], [0], [1], [0, 0, 1, 1], [], []>} : vector<16x128xbf16>, vector<128x256xbf16>, vector<16x256xf32> -> vector<16x256xf32>
      %142 = arith.addf %138, %141 : vector<16x256xf32>
      %143 = arith.truncf %142 : vector<16x256xf32> to vector<16x256xbf16>
      %c0_58 = arith.constant 0 : index
      %c0_59 = arith.constant 0 : index
      %144 = vector.load %arg19[%c0_58, %c0_59] : memref<256x2xbf16, #tpu.memory_space<vmem>>, vector<256x2xbf16>
      %cst_60 = arith.constant dense<0.000000e+00> : vector<16x2xf32>
      %145 = tpu.matmul %143, %144, %cst_60 {dimension_numbers = #tpu.dot_dimension_numbers<[1], [0], [0], [1], [0, 0, 1, 1], [], []>} : vector<16x256xbf16>, vector<256x2xbf16>, vector<16x2xf32> -> vector<16x2xf32>
      %c0_61 = arith.constant 0 : index
      %c0_62 = arith.constant 0 : index
      %146 = vector.load %arg20[%c0_61, %c0_62] : memref<2x256xbf16, #tpu.memory_space<vmem>>, vector<2x256xbf16>
      %cst_63 = arith.constant dense<0.000000e+00> : vector<2x16xf32>
      %147 = tpu.matmul %146, %143, %cst_63 {dimension_numbers = #tpu.dot_dimension_numbers<[1], [1], [0], [0], [0, 0, 1, 0], [], []>} : vector<2x256xbf16>, vector<16x256xbf16>, vector<2x16xf32> -> vector<2x16xf32>
      %148 = vector.extract_strided_slice %145 {offsets = [0, 0], sizes = [16, 1], strides = [1, 1]} : vector<16x2xf32> to vector<16x1xf32>
      %149 = vector.extract_strided_slice %147 {offsets = [0, 0], sizes = [1, 16], strides = [1, 1]} : vector<2x16xf32> to vector<1x16xf32>
      %150 = vector.broadcast %148 : vector<16x1xf32> to vector<16x16xf32>
      %151 = vector.broadcast %149 : vector<1x16xf32> to vector<16x16xf32>
      %152 = arith.addf %150, %151 : vector<16x16xf32>
      %cst_64 = arith.constant 2.000000e-01 : f32
      %153 = vector.broadcast %cst_64 : f32 to vector<16x16xf32>
      %154 = arith.mulf %153, %152 : vector<16x16xf32>
      %155 = arith.maximumf %152, %154 : vector<16x16xf32>
      %156 = arith.addf %155, %6 : vector<16x16xf32>
      %cst_65 = arith.constant dense<0xFF800000> : vector<16xf32>
      %157 = vector.multi_reduction <maximumf>, %156, %cst_65 [1] : vector<16x16xf32> to vector<16xf32>
      %158 = vector.shape_cast %157 : vector<16xf32> to vector<16x1xf32>
      %159 = vector.broadcast %158 : vector<16x1xf32> to vector<16x16xf32>
      %160 = arith.subf %156, %159 : vector<16x16xf32>
      %161 = math.exp %160 : vector<16x16xf32>
      %cst_66 = arith.constant dense<0.000000e+00> : vector<16xf32>
      %162 = vector.multi_reduction <add>, %161, %cst_66 [1] : vector<16x16xf32> to vector<16xf32>
      %163 = vector.shape_cast %162 : vector<16xf32> to vector<16x1xf32>
      %164 = tpu.reciprocal %163 {approx = true} : vector<16x1xf32> -> vector<16x1xf32>
      %165 = vector.broadcast %164 : vector<16x1xf32> to vector<16x16xf32>
      %166 = arith.mulf %161, %165 : vector<16x16xf32>
      %167 = arith.truncf %166 : vector<16x16xf32> to vector<16x16xbf16>
      %168 = vector.extract_strided_slice %143 {offsets = [0, 0], sizes = [16, 128], strides = [1, 1]} : vector<16x256xbf16> to vector<16x128xbf16>
      %cst_67 = arith.constant dense<0.000000e+00> : vector<16x128xf32>
      %169 = tpu.matmul %167, %168, %cst_67 {dimension_numbers = #tpu.dot_dimension_numbers<[1], [0], [0], [1], [0, 0, 1, 1], [], []>} : vector<16x16xbf16>, vector<16x128xbf16>, vector<16x128xf32> -> vector<16x128xf32>
      %c0_68 = arith.constant 0 : index
      %c0_69 = arith.constant 0 : index
      %170 = vector.load %arg21[%c0_68, %c0_69] : memref<1x256xf32, #tpu.memory_space<vmem>>, vector<1x128xf32>
      %171 = vector.broadcast %170 : vector<1x128xf32> to vector<16x128xf32>
      %172 = arith.addf %169, %171 : vector<16x128xf32>
      %173 = vector.extract_strided_slice %145 {offsets = [0, 1], sizes = [16, 1], strides = [1, 1]} : vector<16x2xf32> to vector<16x1xf32>
      %174 = vector.extract_strided_slice %147 {offsets = [1, 0], sizes = [1, 16], strides = [1, 1]} : vector<2x16xf32> to vector<1x16xf32>
      %175 = vector.broadcast %173 : vector<16x1xf32> to vector<16x16xf32>
      %176 = vector.broadcast %174 : vector<1x16xf32> to vector<16x16xf32>
      %177 = arith.addf %175, %176 : vector<16x16xf32>
      %cst_70 = arith.constant 2.000000e-01 : f32
      %178 = vector.broadcast %cst_70 : f32 to vector<16x16xf32>
      %179 = arith.mulf %178, %177 : vector<16x16xf32>
      %180 = arith.maximumf %177, %179 : vector<16x16xf32>
      %181 = arith.addf %180, %6 : vector<16x16xf32>
      %cst_71 = arith.constant dense<0xFF800000> : vector<16xf32>
      %182 = vector.multi_reduction <maximumf>, %181, %cst_71 [1] : vector<16x16xf32> to vector<16xf32>
      %183 = vector.shape_cast %182 : vector<16xf32> to vector<16x1xf32>
      %184 = vector.broadcast %183 : vector<16x1xf32> to vector<16x16xf32>
      %185 = arith.subf %181, %184 : vector<16x16xf32>
      %186 = math.exp %185 : vector<16x16xf32>
      %cst_72 = arith.constant dense<0.000000e+00> : vector<16xf32>
      %187 = vector.multi_reduction <add>, %186, %cst_72 [1] : vector<16x16xf32> to vector<16xf32>
      %188 = vector.shape_cast %187 : vector<16xf32> to vector<16x1xf32>
      %189 = tpu.reciprocal %188 {approx = true} : vector<16x1xf32> -> vector<16x1xf32>
      %190 = vector.broadcast %189 : vector<16x1xf32> to vector<16x16xf32>
      %191 = arith.mulf %186, %190 : vector<16x16xf32>
      %192 = arith.truncf %191 : vector<16x16xf32> to vector<16x16xbf16>
      %193 = vector.extract_strided_slice %143 {offsets = [0, 128], sizes = [16, 128], strides = [1, 1]} : vector<16x256xbf16> to vector<16x128xbf16>
      %cst_73 = arith.constant dense<0.000000e+00> : vector<16x128xf32>
      %194 = tpu.matmul %192, %193, %cst_73 {dimension_numbers = #tpu.dot_dimension_numbers<[1], [0], [0], [1], [0, 0, 1, 1], [], []>} : vector<16x16xbf16>, vector<16x128xbf16>, vector<16x128xf32> -> vector<16x128xf32>
      %c0_74 = arith.constant 0 : index
      %c128_75 = arith.constant 128 : index
      %195 = vector.load %arg21[%c0_74, %c128_75] : memref<1x256xf32, #tpu.memory_space<vmem>>, vector<1x128xf32>
      %196 = vector.broadcast %195 : vector<1x128xf32> to vector<16x128xf32>
      %197 = arith.addf %194, %196 : vector<16x128xf32>
      %cst_76 = arith.constant dense<0.000000e+00> : vector<16xf32>
      %198 = vector.multi_reduction <add>, %172, %cst_76 [1] : vector<16x128xf32> to vector<16xf32>
      %199 = vector.shape_cast %198 : vector<16xf32> to vector<16x1xf32>
      %cst_77 = arith.constant dense<0.000000e+00> : vector<16xf32>
      %200 = vector.multi_reduction <add>, %197, %cst_77 [1] : vector<16x128xf32> to vector<16xf32>
      %201 = vector.shape_cast %200 : vector<16xf32> to vector<16x1xf32>
      %202 = arith.addf %199, %201 : vector<16x1xf32>
      %cst_78 = arith.constant 1.250000e-01 : f32
      %203 = vector.broadcast %cst_78 : f32 to vector<16x1xf32>
      %204 = arith.mulf %202, %203 : vector<16x1xf32>
      %205 = vector.shape_cast %204 : vector<16x1xf32> to vector<16x1xf32>
      %206 = vector.broadcast %205 : vector<16x1xf32> to vector<16x128xf32>
      %c0_79 = arith.constant 0 : index
      %c0_80 = arith.constant 0 : index
      %c0_81 = arith.constant 0 : index
      %207 = vector.load %arg22[%c0_79, %c0_80, %c0_81] : memref<1x16x128xf32, #tpu.memory_space<vmem>>, vector<1x16x128xf32>
      %208 = vector.shape_cast %207 : vector<1x16x128xf32> to vector<16x128xf32>
      %209 = vector.shape_cast %206 : vector<16x128xf32> to vector<1x16x128xf32>
      tpu.vector_store %arg22[%c0_79, %c0_80, %c0_81], %209 {strides = array<i32>} : memref<1x16x128xf32, #tpu.memory_space<vmem>>, vector<1x16x128xf32>,
    } else {
    }
    return
  }
  func.func @transform_0(%arg0: i32) -> (i32, i32) {
    %c0_i32 = arith.constant 0 : i32
    %c0_i32_0 = arith.constant 0 : i32
    %c0_i32_1 = arith.constant 0 : i32
    return %c0_i32, %c0_i32_0 : i32, i32
  }
  func.func @transform_1(%arg0: i32) -> (i32, i32, i32) {
    %c0_i32 = arith.constant 0 : i32
    %c0_i32_0 = arith.constant 0 : i32
    %c0_i32_1 = arith.constant 0 : i32
    %c0_i32_2 = arith.constant 0 : i32
    return %c0_i32, %c0_i32_0, %c0_i32_1 : i32, i32, i32
  }
  func.func @transform_2(%arg0: i32) -> (i32, i32) {
    %c0_i32 = arith.constant 0 : i32
    %c0_i32_0 = arith.constant 0 : i32
    %c0_i32_1 = arith.constant 0 : i32
    return %c0_i32, %c0_i32_0 : i32, i32
  }
  func.func @transform_3(%arg0: i32) -> (i32, i32) {
    %c0_i32 = arith.constant 0 : i32
    %c0_i32_0 = arith.constant 0 : i32
    %c0_i32_1 = arith.constant 0 : i32
    return %c0_i32, %c0_i32_0 : i32, i32
  }
  func.func @transform_4(%arg0: i32) -> (i32, i32) {
    %c0_i32 = arith.constant 0 : i32
    %c0_i32_0 = arith.constant 0 : i32
    %c0_i32_1 = arith.constant 0 : i32
    return %c0_i32, %c0_i32_0 : i32, i32
  }
  func.func @transform_5(%arg0: i32) -> (i32, i32) {
    %c0_i32 = arith.constant 0 : i32
    %c0_i32_0 = arith.constant 0 : i32
    %c0_i32_1 = arith.constant 0 : i32
    return %c0_i32, %c0_i32_0 : i32, i32
  }
  func.func @transform_6(%arg0: i32) -> (i32, i32) {
    %c0_i32 = arith.constant 0 : i32
    %c0_i32_0 = arith.constant 0 : i32
    %c0_i32_1 = arith.constant 0 : i32
    return %c0_i32, %c0_i32_0 : i32, i32
  }
  func.func @transform_7(%arg0: i32) -> (i32, i32) {
    %c0_i32 = arith.constant 0 : i32
    %c0_i32_0 = arith.constant 0 : i32
    %c0_i32_1 = arith.constant 0 : i32
    return %c0_i32, %c0_i32_0 : i32, i32
  }
  func.func @transform_8(%arg0: i32) -> (i32, i32) {
    %c0_i32 = arith.constant 0 : i32
    %c0_i32_0 = arith.constant 0 : i32
    %c0_i32_1 = arith.constant 0 : i32
    return %c0_i32, %c0_i32_0 : i32, i32
  }
  func.func @transform_9(%arg0: i32) -> (i32, i32) {
    %c0_i32 = arith.constant 0 : i32
    %c0_i32_0 = arith.constant 0 : i32
    %c0_i32_1 = arith.constant 0 : i32
    return %c0_i32, %c0_i32_0 : i32, i32
  }
  func.func @transform_10(%arg0: i32) -> (i32, i32) {
    %c0_i32 = arith.constant 0 : i32
    %c0_i32_0 = arith.constant 0 : i32
    %c0_i32_1 = arith.constant 0 : i32
    return %c0_i32, %c0_i32_0 : i32, i32
  }
  func.func @transform_11(%arg0: i32) -> (i32, i32) {
    %c0_i32 = arith.constant 0 : i32
    %c0_i32_0 = arith.constant 0 : i32
    %c0_i32_1 = arith.constant 0 : i32
    return %c0_i32, %c0_i32_0 : i32, i32
  }
  func.func @transform_12(%arg0: i32) -> (i32, i32) {
    %c0_i32 = arith.constant 0 : i32
    %c0_i32_0 = arith.constant 0 : i32
    %c0_i32_1 = arith.constant 0 : i32
    return %c0_i32, %c0_i32_0 : i32, i32
  }
  func.func @transform_13(%arg0: i32) -> (i32, i32) {
    %c0_i32 = arith.constant 0 : i32
    %c0_i32_0 = arith.constant 0 : i32
    %c0_i32_1 = arith.constant 0 : i32
    return %c0_i32, %c0_i32_0 : i32, i32
  }
  func.func @transform_14(%arg0: i32) -> (i32, i32) {
    %c0_i32 = arith.constant 0 : i32
    %c0_i32_0 = arith.constant 0 : i32
    %c0_i32_1 = arith.constant 0 : i32
    return %c0_i32, %c0_i32_0 : i32, i32
  }
  func.func @transform_15(%arg0: i32) -> (i32, i32) {
    %c0_i32 = arith.constant 0 : i32
    %c0_i32_0 = arith.constant 0 : i32
    %c0_i32_1 = arith.constant 0 : i32
    return %c0_i32, %c0_i32_0 : i32, i32
  }
  func.func @transform_16(%arg0: i32) -> (i32, i32) {
    %c0_i32 = arith.constant 0 : i32
    %c0_i32_0 = arith.constant 0 : i32
    %c0_i32_1 = arith.constant 0 : i32
    return %c0_i32, %c0_i32_0 : i32, i32
  }
  func.func @transform_17(%arg0: i32) -> (i32, i32) {
    %c0_i32 = arith.constant 0 : i32
    %c0_i32_0 = arith.constant 0 : i32
    %c0_i32_1 = arith.constant 0 : i32
    return %c0_i32, %c0_i32_0 : i32, i32
  }
  func.func @transform_18(%arg0: i32) -> (i32, i32) {
    %c0_i32 = arith.constant 0 : i32
    %c0_i32_0 = arith.constant 0 : i32
    %c0_i32_1 = arith.constant 0 : i32
    return %c0_i32, %c0_i32_0 : i32, i32
  }
  func.func @transform_19(%arg0: i32) -> (i32, i32) {
    %c0_i32 = arith.constant 0 : i32
    %c0_i32_0 = arith.constant 0 : i32
    %c0_i32_1 = arith.constant 0 : i32
    return %c0_i32, %c0_i32_0 : i32, i32
  }
  func.func @transform_20(%arg0: i32) -> (i32, i32) {
    %c0_i32 = arith.constant 0 : i32
    %c0_i32_0 = arith.constant 0 : i32
    %c0_i32_1 = arith.constant 0 : i32
    return %c0_i32, %c0_i32_0 : i32, i32
  }
  func.func @transform_21(%arg0: i32) -> (i32, i32, i32) {
    %c0_i32 = arith.constant 0 : i32
    %c0_i32_0 = arith.constant 0 : i32
    %c0_i32_1 = arith.constant 0 : i32
    return %arg0, %c0_i32, %c0_i32_0 : i32, i32, i32
  }
}

</mosaic_0001>

<bundles_post_ra>
// kernel: tpu_custom_call.1
= control target key start
LH: loop header
LB: loop body
LE: loop exit
PB: predicated region body
PF: predicated region fallthrough
CT: control target
= control target key end

     0   :  { %s6463_s0 = inlined_call_operand.hbm [shape: f32[16,128], index: 0, kind: input, shape index: {}]   ;;  %s6464_s1 = inlined_call_operand.hbm [shape: bf16[3,16,16], index: 1, kind: input, shape index: {}]   ;;  %s6465_s2 = inlined_call_operand.hbm [shape: f32[16,16], index: 2, kind: input, shape index: {}]   ;;  %s6466_s3 = inlined_call_operand.vmem [shape: bf16[128,512], index: 3, kind: input, shape index: {}]   ;;  %s6467_s4 = inlined_call_operand.hbm [shape: f32[1,128], index: 4, kind: input, shape index: {}]   ;;  %s6468_s5 = inlined_call_operand.hbm [shape: bf16[128,512], index: 5, kind: input, shape index: {}]   ;;  %s6469_s6 = inlined_call_operand.hbm [shape: f32[1,128], index: 6, kind: input, shape index: {}]   ;;  %s6470_s7 = inlined_call_operand.hbm [shape: bf16[128,512], index: 7, kind: input, shape index: {}]   ;;  %s6471_s8 = inlined_call_operand.hbm [shape: f32[1,128], index: 8, kind: input, shape index: {}]   ;;  %s6472_s9 = inlined_call_operand.vmem [shape: bf16[128,256], index: 9, kind: input, shape index: {}]   ;;  %s6473_s10 = inlined_call_operand.vmem [shape: bf16[256,2], index: 10, kind: input, shape index: {}]   ;;  %s6474_s11 = inlined_call_operand.vmem [shape: bf16[2,256], index: 11, kind: input, shape index: {}]   ;;  %s6475_s12 = inlined_call_operand.vmem [shape: f32[1,256], index: 12, kind: input, shape index: {}]   ;;  %s6476_s13 = inlined_call_operand.hbm [shape: bf16[256,256], index: 13, kind: input, shape index: {}]   ;;  %s6477_s14 = inlined_call_operand.vmem [shape: bf16[256,2], index: 14, kind: input, shape index: {}]   ;;  %s6478_s15 = inlined_call_operand.vmem [shape: bf16[2,256], index: 15, kind: input, shape index: {}]   ;;  %s6479_s16 = inlined_call_operand.vmem [shape: f32[1,256], index: 16, kind: input, shape index: {}]   ;;  %s6480_s17 = inlined_call_operand.hbm [shape: bf16[256,256], index: 17, kind: input, shape index: {}]   ;;  %s6481_s18 = inlined_call_operand.vmem [shape: bf16[256,2], index: 18, kind: input, shape index: {}]   ;;  %s6482_s19 = inlined_call_operand.vmem [shape: bf16[2,256], index: 19, kind: input, shape index: {}]   ;;  %s6483_s20 = inlined_call_operand.vmem [shape: f32[1,256], index: 20, kind: input, shape index: {}]   ;;  %s6484_s21 = inlined_call_operand.hbm [shape: f32[2,16,128], index: 21, kind: output, shape index: {}]  }
   0x1   :  { %6501 = sst [smem:[#allocation34_spill]] %s6463_s0 }
   0x2   :  { %6502 = sst [smem:[#allocation35_spill]] %s6464_s1 }
   0x3   :  { %6503 = sst [smem:[#allocation36_spill]] %s6465_s2 }
   0x4   :  { %6504 = sst [smem:[#allocation37_spill]] %s6466_s3 }
   0x5   :  { %6505 = sst [smem:[#allocation38_spill]] %s6467_s4 }
   0x6   :  { %6506 = sst [smem:[#allocation39_spill]] %s6468_s5 }
   0x7   :  { %6507 = sst [smem:[#allocation40_spill]] %s6482_s19 }
   0x8   :  { %6508 = sst [smem:[#allocation41_spill]] %s6483_s20 }
   0x9   :  { %6509 = sst [smem:[#allocation42_spill]] %s6484_s21 }
   0xa   :  { %26 = vsyncpa [#allocation3], 0 }
   0xb   :  { %27 = vsyncpa [#allocation6], 0 }
   0xc   :  { %28 = vsyncpa [#allocation9], 0 }
   0xd   :  { %29 = vsyncpa [#allocation12], 0 }
   0xe   :  { %30 = vsyncpa [#allocation15], 0 }
   0xf   :  { %31 = vsyncpa [#allocation18], 0 }
  0x10   :  { %32 = vsyncpa [#allocation4], 0 }
  0x11   :  { %34 = vsyncpa [#allocation4 + $0x1], 0  ;;  %s5736_s2 = smov 0   ;;  %s5738_s25 = smov 0  }
  0x12   :  { %s5740_s26 = smov 0   ;;  %s5742_s27 = smov 0  }
  0x13 LB: > { %6510 = sst [smem:[#allocation27_spill]] %s5585_s2  ;;  %s5757_s3 = sadd.s32 4294967295, %s5597_s27   ;;  %s5597_s27 = sphi %s5742_s27, %s6552_s27   ;;  %s5593_s26 = sphi %s5740_s26, %s6554_s26   ;;  %s5589_s25 = sphi %s5738_s25, %s6556_s25   ;;  %s5585_s2 = sphi %s5736_s2, %s6555_s2  }
  0x14   : > { %6511 = sst [smem:[#allocation28_spill]] %s5593_s26  ;;  %s4255_s28 = sadd.s32 4294967294, %s5597_s27  }
  0x15   : > { %6512 = sst [smem:[#allocation29_spill]] %s5597_s27  ;;  %s5761_s29 = sadd.s32 1, %s5597_s27  }
  0x16   : > { %6513 = sst [smem:[#allocation30_spill]] %s5761_s29  ;;  %s488_s0 = sadd.s32 1, %s5593_s26 }
  0x17   : > { %s485_s4 = ssub.s32 %s5597_s27, %s5761_s29  ;;  %p498_p0 = scmp.ne.s32.totalorder %s5593_s26, %s5589_s25 }
  0x18   : > { %p486_p1 = scmp.eq.s32.totalorder %s485_s4, 0  ;;  %p499_p2 = scmp.eq.s32.totalorder %s5757_s3, 1 }
  0x19   : > { %p504_p3 = scmp.ne.s32.totalorder %s5589_s25, %s5585_s2  ;;  %p505_p4 = scmp.eq.s32.totalorder %s4255_s28, 1 }
  0x1a   : > { %s5772_s30 = scalar_select %p486_p1, %s5593_s26, %s488_s0  }
  0x1b   : > { %p5774_p5 = por %p499_p2, %p498_p0  ;;  %p5778_p6 = por %p505_p4, %p504_p3 }
  0x1c   : > { %6514 = sst [smem:[#allocation31_spill]] %s5772_s30  ;;  %p4256_p7 = scmp.ge.s32.totalorder %s5597_s27, 1 }
  0x1d   : > { %s6515_s5 = scalar_select %p5774_p5, 1, 0 }
  0x1e   : > { %s6517_s22 = scalar_select %p5778_p6, 1, 0 }
  0x1f   : > { %6516 = sst [smem:[#allocation32_spill]] %s6515_s5  ;;  %p512_p8 = scmp.lt.s32.totalorder %s5597_s27, 3 }
  0x20   : > { %6518 = sst [smem:[#allocation33_spill]] %s6517_s22  ;;  %p6493_p10 = scmp.eq.s32.totalorder %s5757_s3, 0 }
  0x21   : > { %p5786_p11 = pnand %p4256_p7, %p512_p8  ;;  %s5599_s1 = smov [#allocation5]  }
  0x22   : > { %s537_s24 = sshll.u32 %s5599_s1, 4  ;;  %s5600_s0 = smov [#allocation8]   ;;  %s538_s24 = int_to_ptr.vmem [resolvable:$true] %s537_s24 }
  0x23   : > { %s6519_s23 = scalar_select %p5786_p11, 1, 0 }
  0x24   : > { %p4769_p12 = pneg %p5786_p11  ;;  %s567_s4 = sshll.u32 %s5600_s0, 4  ;;  %s568_s4 = int_to_ptr.vmem [resolvable:$true] %s567_s4 }
  0x25   : > { %s5601_s30 = smov [#allocation11]   ;;  %s5264_s1 = scalar_lea.vmem %s538_s24, 384 }
  0x26   : > { %p5794_p13 = pnand %p6493_p10, %p4769_p12  ;;  %s591_s26 = sshll.u32 %s5601_s30, 4  ;;  %s592_s26 = int_to_ptr.vmem [resolvable:$true] %s591_s26 }
  0x27   : > { %p5265_p1 = scmp.ne.s32.totalorder %s538_s24, %s5264_s1  ;;  %p5272_p4 = scmp.lt.s32.totalorder %s538_s24, %s538_s24 }
  0x28   : > { %p5800_p0 = pneg %p5794_p13  ;;  %p5273_p7 = scmp.lt.s32.totalorder %s5264_s1, %s5264_s1 }
  0x2a   : > { %p5267_p2 = pnand %p5265_p1, %p5800_p0  ;;  %p5274_p8 = por %p5273_p7, %p5272_p4 }
  0x2c   : > { %p5268_p3 = pneg %p5267_p2 }
  0x2e   : > { %p5275_p12 = pnand %p5274_p8, %p5268_p3 }
  0x30   : > { %5278 = shalt.err (!%p5275_p12)
}
  0x31   : > { %s5602_s0 = smov 64   ;;  %s5603_s30 = smov 4  }
  0x32   : > { %s6522_s27 = sld [smem:[#allocation35_spill]]  ;;  %s5290_s21 = scalar_lea.vmem %s568_s4, 16 }
  0x33   : > { %p5291_p9 = scmp.ne.s32.totalorder %s568_s4, %s5290_s21  ;;  %s5297_s5 = scalar_lea.vmem %s568_s4, 32 }
  0x34   : > { %p5298_p2 = scmp.lt.s32.totalorder %s568_s4, %s568_s4  ;;  %p5299_p6 = scmp.lt.s32.totalorder %s5297_s5, %s5290_s21 }
  0x35   : > { %p5293_p10 = pnand %p5291_p9, %p5800_p0 }
  0x36   : > { %p5300_p4 = por %p5299_p6, %p5298_p2 }
  0x37   : > { %p5294_p1 = pneg %p5293_p10 }
  0x38   : > { %4775 = dma.hbm_to_vmem [thread:$0]  (!%p5794_p13), %s6522_s27, 384, %s538_s24, [#allocation6], %s5602_s0, %s5602_s0, %s5603_s30  }
  0x39   : > { %p5301_p3 = pnand %p5300_p4, %p5294_p1 }
  0x3b   : > { %5304 = shalt.err (!%p5301_p3)
}
  0x3c   : > { %s6523_s19 = sld [smem:[#allocation38_spill]]  ;;  %s5316_s2 = scalar_lea.vmem %s592_s26, 16 }
  0x3d   : > { %p5317_p7 = scmp.ne.s32.totalorder %s592_s26, %s5316_s2  ;;  %s5323_s27 = scalar_lea.vmem %s592_s26, 32 }
  0x3e   : > { %p5324_p10 = scmp.lt.s32.totalorder %s592_s26, %s592_s26  ;;  %p5325_p12 = scmp.lt.s32.totalorder %s5323_s27, %s5316_s2 }
  0x3f   : > { %p5319_p8 = pnand %p5317_p7, %p5800_p0 }
  0x40   : > { %p5326_p5 = por %p5325_p12, %p5324_p10 }
  0x41   : > { %p5320_p9 = pneg %p5319_p8 }
  0x42   : > { %4781 = dma.hbm_to_vmem [thread:$0]  (!%p5794_p13), %s6523_s19, 16, %s568_s4, [#allocation9]  }
  0x43   : > { %p5327_p6 = pnand %p5326_p5, %p5320_p9 }
  0x45   : > { %5330 = shalt.err (!%p5327_p6)
}
  0x46   : > { %4787 = dma.hbm_to_vmem [thread:$0]  (!%p5794_p13), %s6469_s6, 16, %s592_s26, [#allocation12]  }
  0x47   : > { %s5604_s19 = smov [#allocation14]   ;;  %s5605_s22 = smov [#allocation2]  }
  0x48   : > { %s615_s20 = sshll.u32 %s5604_s19, 4  ;;  %s524_s24 = sshll.u32 %s5605_s22, 4  ;;  %s616_s20 = int_to_ptr.vmem [resolvable:$true] %s615_s20  ;;  %s525_s24 = int_to_ptr.vmem [resolvable:$true] %s524_s24 }
  0x49   : > { %s5342_s4 = scalar_lea.vmem %s616_s20, 16  ;;  %s5349_s0 = scalar_lea.vmem %s616_s20, 32 }
  0x4a   : > { %p5343_p1 = scmp.ne.s32.totalorder %s616_s20, %s5342_s4  ;;  %p5350_p5 = scmp.lt.s32.totalorder %s616_s20, %s616_s20 }
  0x4b   : > { %p5351_p3 = scmp.lt.s32.totalorder %s5349_s0, %s5342_s4 }
  0x4c   : > { %p5345_p2 = pnand %p5343_p1, %p5800_p0 }
  0x4d   : > { %p5352_p7 = por %p5351_p3, %p5350_p5 }
  0x4e   : > { %p5346_p4 = pneg %p5345_p2 }
  0x50   : > { %p5353_p8 = pnand %p5352_p7, %p5346_p4 }
  0x52   : > { %5356 = shalt.err (!%p5353_p8)
}
  0x53   : > { %4793 = dma.hbm_to_vmem [thread:$0]  (!%p5794_p13), %s6471_s8, 16, %s616_s20, [#allocation15]  }
  0x54   : > { %s5368_s1 = scalar_lea.vmem %s525_s24, 256  ;;  %p5376_p6 = scmp.lt.s32.totalorder %s525_s24, %s525_s24 }
  0x55   : > { %p5369_p9 = scmp.ne.s32.totalorder %s525_s24, %s5368_s1  ;;  %p5377_p1 = scmp.lt.s32.totalorder %s5368_s1, %s5368_s1 }
  0x57   : > { %p5371_p10 = pnand %p5369_p9, %p5800_p0  ;;  %p5378_p2 = por %p5377_p1, %p5376_p6 }
  0x59   : > { %p5372_p12 = pneg %p5371_p10 }
  0x5b   : > { %p5379_p11 = pnand %p5378_p2, %p5372_p12 }
  0x5d   : > { %5382 = shalt.err (!%p5379_p11)
}
  0x5e   : > { %s6499_s2 = smov 128   ;;  %s5607_s27 = smov 8  }
  0x5f   : > { %s6524_s19 = sld [smem:[#allocation34_spill]]  ;;  %s5608_s20 = smov [#allocation7]  }
  0x60   : > { %s550_s22 = sshll.u32 %s5608_s20, 4  ;;  %s5609_s4 = smov [#allocation10]   ;;  %s551_s22 = int_to_ptr.vmem [resolvable:$true] %s550_s22 }
  0x61   : > { %s577_s0 = sshll.u32 %s5609_s4, 4  ;;  %s5394_s30 = scalar_lea.vmem %s551_s22, 256  ;;  %s578_s0 = int_to_ptr.vmem [resolvable:$true] %s577_s0 }
  0x62   : > { %p5395_p4 = scmp.ne.s32.totalorder %s551_s22, %s5394_s30  ;;  %p5402_p3 = scmp.lt.s32.totalorder %s551_s22, %s551_s22 }
  0x63   : > { %p5403_p7 = scmp.lt.s32.totalorder %s5394_s30, %s5394_s30 }
  0x64   : > { %p5397_p11 = pnand %p5395_p4, %p5800_p0 }
  0x65   : > { %4772 = dma.hbm_to_vmem [thread:$0]  (!%p5794_p13), %s6524_s19, 256, %s525_s24, [#allocation3], %s6499_s2, %s6499_s2, %s5607_s27  }
  0x66   : > { %p5398_p5 = pneg %p5397_p11  ;;  %p5404_p8 = por %p5403_p7, %p5402_p3 }
  0x68   : > { %p5405_p9 = pnand %p5404_p8, %p5398_p5 }
  0x6a   : > { %5408 = shalt.err (!%p5405_p9)
}
  0x6b   : > { %s6525_s1 = sld [smem:[#allocation36_spill]]  ;;  %s5420_s21 = scalar_lea.vmem %s578_s0, 4096 }
  0x6c   : > { %p5421_p10 = scmp.ne.s32.totalorder %s578_s0, %s5420_s21  ;;  %p5428_p1 = scmp.lt.s32.totalorder %s578_s0, %s578_s0 }
  0x6d   : > { %p5429_p2 = scmp.lt.s32.totalorder %s5420_s21, %s5420_s21 }
  0x6e   : > { %p5423_p12 = pnand %p5421_p10, %p5800_p0 }
  0x6f   : > { %p5430_p4 = por %p5429_p2, %p5428_p1 }
  0x70   : > { %p5424_p6 = pneg %p5423_p12 }
  0x71   : > { %4778 = dma.hbm_to_vmem [thread:$0]  (!%p5794_p13), %s6525_s1, 256, %s551_s22, [#allocation6], %s6499_s2, %s6499_s2, %s5607_s27  }
  0x72   : > { %p5431_p11 = pnand %p5430_p4, %p5424_p6 }
  0x74   : > { %5434 = shalt.err (!%p5431_p11)
}
  0x75   : > { %s5610_s5 = smov 256   ;;  %s5611_s19 = smov 16  }
  0x76   : > { %s6526_s30 = sld [smem:[#allocation39_spill]]  ;;  %s5612_s22 = smov [#allocation13]  }
  0x77   : > { %s601_s24 = sshll.u32 %s5612_s22, 4  ;;  %s5613_s26 = smov [#allocation16]   ;;  %s602_s24 = int_to_ptr.vmem [resolvable:$true] %s601_s24 }
  0x78   : > { %s637_s1 = sshll.u32 %s5613_s26, 4  ;;  %s5446_s2 = scalar_lea.vmem %s602_s24, 4096  ;;  %s638_s1 = int_to_ptr.vmem [resolvable:$true] %s637_s1 }
  0x79   : > { %p5447_p5 = scmp.ne.s32.totalorder %s602_s24, %s5446_s2  ;;  %p5454_p8 = scmp.lt.s32.totalorder %s602_s24, %s602_s24 }
  0x7a   : > { %p5455_p9 = scmp.lt.s32.totalorder %s5446_s2, %s5446_s2 }
  0x7b   : > { %p5449_p3 = pnand %p5447_p5, %p5800_p0 }
  0x7c   : > { %4784 = dma.hbm_to_vmem [thread:$0]  (!%p5794_p13), %s6526_s30, 4096, %s578_s0, [#allocation9], %s5610_s5, %s5610_s5, %s5611_s19  }
  0x7d   : > { %p5450_p7 = pneg %p5449_p3  ;;  %p5456_p10 = por %p5455_p9, %p5454_p8 }
  0x7f   : > { %p5457_p12 = pnand %p5456_p10, %p5450_p7 }
  0x81   : > { %5460 = shalt.err (!%p5457_p12)
}
  0x82   : > { %4790 = dma.hbm_to_vmem [thread:$0]  (!%p5794_p13), %s6470_s7, 4096, %s602_s24, [#allocation12], %s5610_s5, %s5610_s5, %s5611_s19  }
  0x83   : > { %s5472_s0 = scalar_lea.vmem %s638_s1, 4096  ;;  %p5480_p4 = scmp.lt.s32.totalorder %s638_s1, %s638_s1 }
  0x84   : > { %p5473_p6 = scmp.ne.s32.totalorder %s638_s1, %s5472_s0  ;;  %p5481_p11 = scmp.lt.s32.totalorder %s5472_s0, %s5472_s0 }
  0x86   : > { %p5475_p1 = pnand %p5473_p6, %p5800_p0  ;;  %p5482_p5 = por %p5481_p11, %p5480_p4 }
  0x88   : > { %p5476_p2 = pneg %p5475_p1 }
  0x8a   : > { %p5483_p3 = pnand %p5482_p5, %p5476_p2 }
  0x8c   : > { %5486 = shalt.err (!%p5483_p3)
}
  0x8d   : > { %s6527_s2 = smov 128   ;;  %s5614_s5 = smov [#allocation17]  }
  0x8e   : > { %4796 = dma.hbm_to_vmem [thread:$0]  (!%p5794_p13), %s6476_s13, 4096, %s638_s1, [#allocation15], %s6527_s2, %s6527_s2, %s5607_s27  }
  0x8f   : > { %s659_s19 = sshll.u32 %s5614_s5, 4  ;;  %s660_s19 = int_to_ptr.vmem [resolvable:$true] %s659_s19 }
  0x90   : > { %s5498_s22 = scalar_lea.vmem %s660_s19, 4096  ;;  %p5506_p10 = scmp.lt.s32.totalorder %s660_s19, %s660_s19 }
  0x91   : > { %p5499_p7 = scmp.ne.s32.totalorder %s660_s19, %s5498_s22  ;;  %p5507_p12 = scmp.lt.s32.totalorder %s5498_s22, %s5498_s22 }
  0x93   : > { %p5501_p8 = pnand %p5499_p7, %p5800_p0  ;;  %p5508_p6 = por %p5507_p12, %p5506_p10 }
  0x95   : > { %p5502_p9 = pneg %p5501_p8 }
  0x97   : > { %p5509_p1 = pnand %p5508_p6, %p5502_p9 }
  0x99   : > { %5512 = shalt.err (!%p5509_p1)
}
  0x9a   : > { %4799 = dma.hbm_to_vmem [thread:$0]  (!%p5794_p13), %s6480_s17, 4096, %s660_s19, [#allocation18], %s6527_s2, %s6527_s2, %s5607_s27  }
  0x9b   : > { %p6528_p2 = scmp.ne.s32.totalorder %s6519_s23, 0 }
  0x9c   : > { %p6529_p0 = scmp.eq.s32.totalorder (!%p6528_p2), %s5757_s3, 0 }
  0x9d   : > { %684 = sbr.rel (%p6528_p2) target bundleno = 4848 (0x12f0), region = 104 }
  0xa2   : > { %5556 = dma.done.wait (%p6529_p0), [#allocation3], 256   ;;  %p6530_p4 = pmov %p6529_p0 }
  0xa3   : > { %p6531_p11 = pmov %p6529_p0 }
  0xa4   : > { %5558 = vsyncadd (%p6530_p4), [#allocation3], 4294967040 }
  0xa5   : > { %5560 = dma.done.wait (%p6531_p11), [#allocation6], 640   ;;  %p6532_p5 = pmov %p6529_p0 }
  0xa6   : > { %p6533_p3 = pmov %p6529_p0 }
  0xa7   : > { %5562 = vsyncadd (%p6532_p5), [#allocation6], 4294966656 }
  0xa8   : > { %5564 = dma.done.wait (%p6533_p3), [#allocation9], 4112   ;;  %p6534_p13 = pmov %p6529_p0 }
  0xa9   : > { %p6535_p7 = pmov %p6529_p0 }
  0xaa   : > { %5566 = vsyncadd (%p6534_p13), [#allocation9], 4294963184 }
  0xab   : > { %5568 = dma.done.wait (%p6535_p7), [#allocation12], 4112   ;;  %p6536_p8 = pmov %p6529_p0 }
  0xac   : > { %p6537_p9 = pmov %p6529_p0 }
  0xad   : > { %5570 = vsyncadd (%p6536_p8), [#allocation12], 4294963184 }
  0xae   : > { %5572 = dma.done.wait (%p6537_p9), [#allocation15], 4112   ;;  %p6538_p10 = pmov %p6529_p0 }
  0xaf   : > { %p6539_p12 = pmov %p6529_p0 }
  0xb0   : > { %5574 = vsyncadd (%p6538_p10), [#allocation15], 4294963184 }
  0xb1   : > { %5576 = dma.done.wait (%p6539_p12), [#allocation18], 4096   ;;  %p6540_p6 = pmov %p6529_p0 }
  0xb2   : > { %s772_s29 = sand.u32 1, %s5589_s25   ;;  %p6541_p1 = scmp.ne.s32.totalorder %s5757_s3, 0 }
  0xb3   : > { %5578 = vsyncadd (%p6540_p6), [#allocation18], 4294963200  ;;  %s4278_s23 = sshll.u32 %s772_s29, 4  ;;  %s6542_s21 = sld [smem:[#allocation37_spill]] (!%p6541_p1) }
  0xb4   : > { %s5915_s28 = scalar_lea.vmem [#allocation19], %s4278_s23  ;;  %779 = sbr.rel (%p6541_p1) target bundleno = 1461 (0x5b5), region = 148 }
  0xb9   : > { %v4883_v0 = vld [vmem:[%s6542_s21 + $0xe4] ss:$16 sps:$4 sm:$0xff]   ;;  %v4885_v1 = vld [vmem:[%s6542_s21 + $0xe0] ss:$16 sps:$4 sm:$0xff]   ;;  %v5615_v2 = vmov 0   ;;  %v781_v33 = vld [vmem:[#allocation2 + $0x8] sm:$0xff] }
  0xba   : > { %1007 = vmatprep.mubr.bf16.mxu0 %v5615_v2  ;;  %1050 = vmatprep.mubr.bf16.mxu1 %v5615_v2  ;;  %v4886_v3 = vld [vmem:[%s6542_s21 + $0xec] ss:$16 sps:$4 sm:$0xff]   ;;  %v4888_v4 = vld [vmem:[%s6542_s21 + $0xe8] ss:$16 sps:$4 sm:$0xff]   ;;  %v4889_v5 = vld [vmem:[%s6542_s21 + $0xc4] ss:$16 sps:$4 sm:$0xff]  }
  0xbb   : > { %975 = vmatprep.subr.bf16.mxu0 %v4883_v0  ;;  %v4891_v6 = vld [vmem:[%s6542_s21 + $0xc0] ss:$16 sps:$4 sm:$0xff]   ;;  %1018 = vmatprep.subr.bf16.mxu1 %v4886_v3  ;;  %v4892_v7 = vld [vmem:[%s6542_s21 + $0xcc] ss:$16 sps:$4 sm:$0xff]   ;;  %v4894_v8 = vld [vmem:[%s6542_s21 + $0xc8] ss:$16 sps:$4 sm:$0xff]  }
  0xbc   : > { %976 = vmatpush1.bf16.msra.mxu0 %v4885_v1  ;;  %1019 = vmatpush1.bf16.msra.mxu1 %v4888_v4  ;;  %v4895_v9 = vld [vmem:[%s6542_s21 + $0xa4] ss:$16 sps:$4 sm:$0xff]   ;;  %v4897_v10 = vld [vmem:[%s6542_s21 + $0xa0] ss:$16 sps:$4 sm:$0xff]   ;;  %v4898_v11 = vld [vmem:[%s6542_s21 + $0xac] ss:$16 sps:$4 sm:$0xff]  }
  0xbd   : > { %977 = vmatprep.subr.bf16.mxu0 %v4889_v5  ;;  %1020 = vmatprep.subr.bf16.mxu1 %v4892_v7  ;;  %v4901_v12 = vld [vmem:[%s6542_s21 + $0x84] ss:$16 sps:$4 sm:$0xff]   ;;  %v4900_v13 = vld [vmem:[%s6542_s21 + $0xa8] ss:$16 sps:$4 sm:$0xff]   ;;  %v4904_v14 = vld [vmem:[%s6542_s21 + $0x8c] ss:$16 sps:$4 sm:$0xff]  }
  0xbe   : > { %v4903_v15 = vld [vmem:[%s6542_s21 + $0x80] ss:$16 sps:$4 sm:$0xff]   ;;  %v4907_v16 = vld [vmem:[%s6542_s21 + $0x64] ss:$16 sps:$4 sm:$0xff]   ;;  %v4906_v17 = vld [vmem:[%s6542_s21 + $0x88] ss:$16 sps:$4 sm:$0xff]  }
  0xbf   : > { %v4910_v18 = vld [vmem:[%s6542_s21 + $0x6c] ss:$16 sps:$4 sm:$0xff]   ;;  %v4909_v19 = vld [vmem:[%s6542_s21 + $0x60] ss:$16 sps:$4 sm:$0xff]   ;;  %v4913_v20 = vld [vmem:[%s6542_s21 + $0x44] ss:$16 sps:$4 sm:$0xff]  }
  0xc0   : > { %978 = vmatpush1.bf16.msra.mxu0 %v4891_v6  ;;  %1021 = vmatpush1.bf16.msra.mxu1 %v4894_v8  ;;  %v4912_v21 = vld [vmem:[%s6542_s21 + $0x68] ss:$16 sps:$4 sm:$0xff]   ;;  %v4916_v22 = vld [vmem:[%s6542_s21 + $0x4c] ss:$16 sps:$4 sm:$0xff]   ;;  %v4915_v23 = vld [vmem:[%s6542_s21 + $0x40] ss:$16 sps:$4 sm:$0xff]  }
  0xc1   : > { %979 = vmatprep.subr.bf16.mxu0 %v4895_v9  ;;  %1022 = vmatprep.subr.bf16.mxu1 %v4898_v11  ;;  %v4919_v24 = vld [vmem:[%s6542_s21 + $0x24] ss:$16 sps:$4 sm:$0xff]   ;;  %v4918_v25 = vld [vmem:[%s6542_s21 + $0x48] ss:$16 sps:$4 sm:$0xff]   ;;  %v4921_v26 = vld [vmem:[%s6542_s21 + $0x20] ss:$16 sps:$4 sm:$0xff]  }
  0xc2   : > { %v4922_v27 = vld [vmem:[%s6542_s21 + $0x2c] ss:$16 sps:$4 sm:$0xff]   ;;  %v4925_v28 = vld [vmem:[%s6542_s21 + $0x4] ss:$16 sps:$4 sm:$0xff]   ;;  %v4924_v29 = vld [vmem:[%s6542_s21 + $0x28] ss:$16 sps:$4 sm:$0xff]  }
  0xc3   : > { %v4928_v30 = vld [vmem:[%s6542_s21 + $0xc] ss:$16 sps:$4 sm:$0xff]   ;;  %v4927_v31 = vld [vmem:[%s6542_s21] ss:$16 sps:$4 sm:$0xff]   ;;  %v4930_v34 = vld [vmem:[%s6542_s21 + $0x8] ss:$16 sps:$4 sm:$0xff]  }
  0xc4   : > { %980 = vmatpush1.bf16.msra.mxu0 %v4897_v10  ;;  %1023 = vmatpush1.bf16.msra.mxu1 %v4900_v13  ;;  %v780_v32 = vld [vmem:[#allocation2] sm:$0xff]  ;;  %v5616_v36 = vmov 0.0   ;;  %vm5617_vm0 = vmmov 0   ;;  %v6027_v48 = vld [vmem:[#allocation5] sm:$0xff]   ;;  %v6029_v49 = vld [vmem:[#allocation5 + $0x8] sm:$0xff]   ;;  %vm1080_vm1 = vcmask 130048  }
  0xc5   : > { %981 = vmatprep.subr.bf16.mxu0 %v4901_v12  ;;  %1024 = vmatprep.subr.bf16.mxu1 %v4904_v14  ;;  %v782_v35 = vpack.c.bf16 %v781_v33, %v780_v32  ;;  %v4936_v44 = vld [vmem:[#allocation10 + $0xe4] ss:$16 sps:$4 sm:$0xff]   ;;  %v4934_v50 = vld [vmem:[#allocation10 + $0xe0] ss:$16 sps:$4 sm:$0xff]   ;;  %v4939_v51 = vld [vmem:[#allocation10 + $0xec] ss:$16 sps:$4 sm:$0xff]  }
  0xc6   : > { %v4942_v53 = vld [vmem:[#allocation10 + $0xc4] ss:$16 sps:$4 sm:$0xff]   ;;  %v4940_v54 = vld [vmem:[#allocation10 + $0xc0] ss:$16 sps:$4 sm:$0xff]   ;;  %v4937_v57 = vld [vmem:[#allocation10 + $0xe8] ss:$16 sps:$4 sm:$0xff]  }
  0xc7   : > { %v4948_v55 = vld [vmem:[#allocation10 + $0xa4] ss:$16 sps:$4 sm:$0xff]   ;;  %v4945_v58 = vld [vmem:[#allocation10 + $0xcc] ss:$16 sps:$4 sm:$0xff]   ;;  %v4946_v59 = vld [vmem:[#allocation10 + $0xa0] ss:$16 sps:$4 sm:$0xff]  }
  0xc8   : > { %982 = vmatpush1.bf16.msra.mxu0 %v4903_v15  ;;  %1025 = vmatpush1.bf16.msra.mxu1 %v4906_v17  ;;  %v6039_v56 = vld [vmem:[#allocation5 + $0x10] sm:$0xff]   ;;  %v4952_v63 = vld [vmem:[#allocation10 + $0x80] ss:$16 sps:$4 sm:$0xff]  }
  0xc9   : > { %983 = vmatprep.subr.bf16.mxu0 %v4907_v16  ;;  %1026 = vmatprep.subr.bf16.mxu1 %v4910_v18  ;;  %v4954_v60 = vld [vmem:[#allocation10 + $0x84] ss:$16 sps:$4 sm:$0xff]   ;;  %v4943_v61 = vld [vmem:[#allocation10 + $0xc8] ss:$16 sps:$4 sm:$0xff]   ;;  %v4951_v62 = vld [vmem:[#allocation10 + $0xac] ss:$16 sps:$4 sm:$0xff]  }
  0xca   : > { %v4949_v0 = vld [vmem:[#allocation10 + $0xa8] ss:$16 sps:$4 sm:$0xff]   ;;  %v4957_v1 = vld [vmem:[#allocation10 + $0x8c] ss:$16 sps:$4 sm:$0xff]   ;;  %v4960_v4 = vld [vmem:[#allocation10 + $0x64] ss:$16 sps:$4 sm:$0xff]  }
  0xcb   : > { %v4955_v3 = vld [vmem:[#allocation10 + $0x88] ss:$16 sps:$4 sm:$0xff]   ;;  %v4963_v5 = vld [vmem:[#allocation10 + $0x6c] ss:$16 sps:$4 sm:$0xff]   ;;  %v4958_v6 = vld [vmem:[#allocation10 + $0x60] ss:$16 sps:$4 sm:$0xff]  }
  0xcc   : > { %984 = vmatpush1.bf16.msra.mxu0 %v4909_v19  ;;  %1027 = vmatpush1.bf16.msra.mxu1 %v4912_v21  ;;  %v4961_v7 = vld [vmem:[#allocation10 + $0x68] ss:$16 sps:$4 sm:$0xff]   ;;  %v4966_v8 = vld [vmem:[#allocation10 + $0x44] ss:$16 sps:$4 sm:$0xff]   ;;  %v4969_v9 = vld [vmem:[#allocation10 + $0x4c] ss:$16 sps:$4 sm:$0xff]  }
  0xcd   : > { %985 = vmatprep.subr.bf16.mxu0 %v4913_v20  ;;  %1028 = vmatprep.subr.bf16.mxu1 %v4916_v22  ;;  %v4964_v10 = vld [vmem:[#allocation10 + $0x40] ss:$16 sps:$4 sm:$0xff]   ;;  %v4967_v11 = vld [vmem:[#allocation10 + $0x48] ss:$16 sps:$4 sm:$0xff]   ;;  %v4972_v12 = vld [vmem:[#allocation10 + $0x24] ss:$16 sps:$4 sm:$0xff]  }
  0xce   : > { %v4975_v13 = vld [vmem:[#allocation10 + $0x2c] ss:$16 sps:$4 sm:$0xff]   ;;  %v4970_v14 = vld [vmem:[#allocation10 + $0x20] ss:$16 sps:$4 sm:$0xff]   ;;  %v4973_v15 = vld [vmem:[#allocation10 + $0x28] ss:$16 sps:$4 sm:$0xff]  }
  0xcf   : > { %v4978_v16 = vld [vmem:[#allocation10 + $0x4] ss:$16 sps:$4 sm:$0xff]   ;;  %v4981_v17 = vld [vmem:[#allocation10 + $0xc] ss:$16 sps:$4 sm:$0xff]   ;;  %v4976_v18 = vld [vmem:[#allocation10] ss:$16 sps:$4 sm:$0xff]  }
  0xd0   : > { %986 = vmatpush1.bf16.msra.mxu0 %v4915_v23  ;;  %1029 = vmatpush1.bf16.msra.mxu1 %v4918_v25  ;;  %v4979_v19 = vld [vmem:[#allocation10 + $0x8] ss:$16 sps:$4 sm:$0xff]   ;;  %v4312_v20 = vld [vmem:[#allocation8] ss:$0 sm:$0xff] }
  0xd1   : > { %987 = vmatprep.subr.bf16.mxu0 %v4919_v24  ;;  %1030 = vmatprep.subr.bf16.mxu1 %v4922_v27 }
  0xd4   : > { %988 = vmatpush1.bf16.msra.mxu0 %v4921_v26  ;;  %1031 = vmatpush1.bf16.msra.mxu1 %v4924_v29 }
  0xd5   : > { %989 = vmatprep.subr.bf16.mxu0 %v4925_v28  ;;  %1032 = vmatprep.subr.bf16.mxu1 %v4928_v30 }
  0xd8   : > { %990 = vmatpush1.bf16.msra.mxu0 %v4927_v31  ;;  %1033 = vmatpush1.bf16.msra.mxu1 %v4930_v34 }
  0xd9   : > { %4637 = vmatprep.subr.bf16.mxu0 %v5616_v36  ;;  %4643 = vmatprep.subr.bf16.mxu1 %v5616_v36 }
  0xdb   : > { %1008 = vmatmul.mubr.bf16.vlgmr.msra.gmra.mxu0 %v782_v35  ;;  %1051 = vmatmul.mubr.bf16.vlgmr.msra.gmra.mxu1 %v782_v35 }
  0xdc   : > { %4639 = vmatprep.mubr.msk.bf16.mxu0 %vm5617_vm0, %v5616_v36  ;;  %4645 = vmatprep.mubr.msk.bf16.mxu1 %vm5617_vm0, %v5616_v36 }
 0x19b   : > { %v6023_v37 = vpop.f32.mrf.mxu0  ;;  %v1052_v39 = vpop.f32.mrf.mxu1 }
 0x19c   : > { %v1068_v25 = vadd.f32 %v4312_v20, %v6023_v37 }
 0x19d   : > { %v1011_v38 = vpop.f32.mrf.mxu0  ;;  %v1054_v41 = vpop.f32.mrf.mxu1 }
 0x19f   : > { %v6025_v40 = vpop.f32.mrf.mxu0  ;;  %v1056_v43 = vpop.f32.mrf.mxu1 }
 0x1a0   : > { %v1071_v46 = vpack.c.bf16 %v1056_v43, %v1052_v39  ;;  %v1069_v28 = vadd.f32 %v4312_v20, %v6025_v40  ;;  %v5023_v20 = vld [vmem:[#allocation13 + $0x2c] ss:$16 sps:$4 sm:$0xff]  }
 0x1a1   : > { %v1015_v42 = vpop.f32.mrf.mxu0  ;;  %v1058_v47 = vpop.f32.mrf.mxu1 }
 0x1a2   : > { %v1070_v45 = vpack.c.bf16 %v1015_v42, %v1011_v38  ;;  %4644 = vmatpush3.bf16.msra.mxu1 %v1071_v46  ;;  %v1072_v52 = vpack.c.bf16 %v1058_v47, %v1054_v41 }
 0x1a3   : > { %1430 = vmatprep.subr.bf16.mxu1 %v4936_v44 }
 0x1a4   : > { %4638 = vmatpush3.bf16.msra.mxu0 %v1070_v45 }
 0x1a5   : > { %4649 = vmatprep.subr.bf16.mxu0 %v5616_v36  ;;  %4646 = vmatmul.mubr.msk.bf16.vlgmr.msra.gmra.mxu1 %vm1080_vm1, %v6029_v49 }
 0x1a6   : > { %1431 = vmatpush1.bf16.msra.mxu1 %v4934_v50  ;;  %1462 = vmatprep.mubr.bf16.mxu1 %v5615_v2 }
 0x1a7   : > { %4640 = vmatmul.mubr.msk.bf16.vlgmr.msra.gmra.mxu0 %vm1080_vm1, %v6027_v48  ;;  %1432 = vmatprep.subr.bf16.mxu1 %v4942_v53  ;;  %v4984_v53 = vld [vmem:[#allocation13 + $0xe4] ss:$16 sps:$4 sm:$0xff]  }
 0x1a8   : > { %4650 = vmatpush3.bf16.msra.mxu0 %v1072_v52  ;;  %4651 = vmatprep.mubr.msk.bf16.mxu0 %vm5617_vm0, %v5616_v36 }
 0x1a9   : > { %1473 = vmatprep.subr.bf16.mxu0 %v4939_v51 }
 0x1aa   : > { %1433 = vmatpush1.bf16.msra.mxu1 %v4940_v54 }
 0x1ab   : > { %1434 = vmatprep.subr.bf16.mxu1 %v4948_v55 }
 0x1ae   : > { %1435 = vmatpush1.bf16.msra.mxu1 %v4946_v59 }
 0x1af   : > { %4652 = vmatmul.mubr.msk.bf16.vlgmr.msra.gmra.mxu0 %vm1080_vm1, %v6039_v56  ;;  %1436 = vmatprep.subr.bf16.mxu1 %v4954_v60  ;;  %v4990_v60 = vld [vmem:[#allocation13 + $0xc4] ss:$16 sps:$4 sm:$0xff]  }
 0x1b0   : > { %1474 = vmatpush1.bf16.msra.mxu0 %v4937_v57  ;;  %1505 = vmatprep.mubr.bf16.mxu0 %v5615_v2 }
 0x1b1   : > { %1475 = vmatprep.subr.bf16.mxu0 %v4945_v58  ;;  %v4982_v58 = vld [vmem:[#allocation13 + $0xe0] ss:$16 sps:$4 sm:$0xff]  }
 0x1b2   : > { %1437 = vmatpush1.bf16.msra.mxu1 %v4952_v63  ;;  %v4988_v63 = vld [vmem:[#allocation13 + $0xc0] ss:$16 sps:$4 sm:$0xff]  }
 0x1b3   : > { %1438 = vmatprep.subr.bf16.mxu1 %v4960_v4  ;;  %v4985_v4 = vld [vmem:[#allocation13 + $0xe8] ss:$16 sps:$4 sm:$0xff]  }
 0x1b4   : > { %1476 = vmatpush1.bf16.msra.mxu0 %v4943_v61  ;;  %v4987_v61 = vld [vmem:[#allocation13 + $0xec] ss:$16 sps:$4 sm:$0xff]  }
 0x1b5   : > { %1477 = vmatprep.subr.bf16.mxu0 %v4951_v62 }
 0x1b6   : > { %1439 = vmatpush1.bf16.msra.mxu1 %v4958_v6  ;;  %v5000_v6 = vld [vmem:[#allocation13 + $0x80] ss:$16 sps:$4 sm:$0xff]  }
 0x1b7   : > { %1440 = vmatprep.subr.bf16.mxu1 %v4966_v8  ;;  %v4999_v8 = vld [vmem:[#allocation13 + $0xac] ss:$16 sps:$4 sm:$0xff]  }
 0x1b8   : > { %1478 = vmatpush1.bf16.msra.mxu0 %v4949_v0  ;;  %v4996_v0 = vld [vmem:[#allocation13 + $0xa4] ss:$16 sps:$4 sm:$0xff]  }
 0x1b9   : > { %1479 = vmatprep.subr.bf16.mxu0 %v4957_v1  ;;  %v4994_v1 = vld [vmem:[#allocation13 + $0xa0] ss:$16 sps:$4 sm:$0xff]  }
 0x1ba   : > { %1441 = vmatpush1.bf16.msra.mxu1 %v4964_v10  ;;  %v5005_v10 = vld [vmem:[#allocation13 + $0x8c] ss:$16 sps:$4 sm:$0xff]  }
 0x1bb   : > { %1442 = vmatprep.subr.bf16.mxu1 %v4972_v12  ;;  %v5008_v12 = vld [vmem:[#allocation13 + $0x64] ss:$16 sps:$4 sm:$0xff]  }
 0x1bc   : > { %1480 = vmatpush1.bf16.msra.mxu0 %v4955_v3  ;;  %v5002_v3 = vld [vmem:[#allocation13 + $0x84] ss:$16 sps:$4 sm:$0xff]  }
 0x1bd   : > { %1481 = vmatprep.subr.bf16.mxu0 %v4963_v5  ;;  %v4993_v5 = vld [vmem:[#allocation13 + $0xcc] ss:$16 sps:$4 sm:$0xff]  }
 0x1be   : > { %1443 = vmatpush1.bf16.msra.mxu1 %v4970_v14  ;;  %v5006_v14 = vld [vmem:[#allocation13 + $0x60] ss:$16 sps:$4 sm:$0xff]  }
 0x1bf   : > { %1444 = vmatprep.subr.bf16.mxu1 %v4978_v16  ;;  %v5017_v16 = vld [vmem:[#allocation13 + $0x4c] ss:$16 sps:$4 sm:$0xff]  }
 0x1c0   : > { %1482 = vmatpush1.bf16.msra.mxu0 %v4961_v7  ;;  %v4991_v7 = vld [vmem:[#allocation13 + $0xc8] ss:$16 sps:$4 sm:$0xff]  }
 0x1c1   : > { %1483 = vmatprep.subr.bf16.mxu0 %v4969_v9  ;;  %v4997_v9 = vld [vmem:[#allocation13 + $0xa8] ss:$16 sps:$4 sm:$0xff]  }
 0x1c2   : > { %1445 = vmatpush1.bf16.msra.mxu1 %v4976_v18  ;;  %v5015_v18 = vld [vmem:[#allocation13 + $0x48] ss:$16 sps:$4 sm:$0xff]  }
 0x1c3   : > { %4655 = vmatprep.subr.bf16.mxu1 %v5616_v36 }
 0x1c4   : > { %1484 = vmatpush1.bf16.msra.mxu0 %v4967_v11  ;;  %v5003_v11 = vld [vmem:[#allocation13 + $0x88] ss:$16 sps:$4 sm:$0xff]  }
 0x1c5   : > { %1485 = vmatprep.subr.bf16.mxu0 %v4975_v13  ;;  %v5011_v13 = vld [vmem:[#allocation13 + $0x6c] ss:$16 sps:$4 sm:$0xff]  }
 0x1c8   : > { %1486 = vmatpush1.bf16.msra.mxu0 %v4973_v15  ;;  %v5009_v15 = vld [vmem:[#allocation13 + $0x68] ss:$16 sps:$4 sm:$0xff]  }
 0x1c9   : > { %1487 = vmatprep.subr.bf16.mxu0 %v4981_v17  ;;  %v5012_v17 = vld [vmem:[#allocation13 + $0x40] ss:$16 sps:$4 sm:$0xff]  }
 0x1cc   : > { %1488 = vmatpush1.bf16.msra.mxu0 %v4979_v19  ;;  %v5020_v19 = vld [vmem:[#allocation13 + $0x24] ss:$16 sps:$4 sm:$0xff]  }
 0x1cd   : > { %4661 = vmatprep.subr.bf16.mxu0 %v5616_v36 }
 0x265   : > { %v1172_v22 = vpop.f32.mrf.mxu1 }
 0x267   : > { %v1118_v21 = vpop.f32.mrf.mxu0  ;;  %v4647_v24 = vpop.f32.mrf.mxu1 }
 0x268   : > { %v1125_v29 = vadd.f32 %v1118_v21, %v1068_v25  ;;  %v5018_v21 = vld [vmem:[#allocation13 + $0x20] ss:$16 sps:$4 sm:$0xff]   ;;  %v5029_v24 = vld [vmem:[#allocation13 + $0xc] ss:$16 sps:$4 sm:$0xff]  }
 0x269   : > { %v4641_v23 = vpop.f32.mrf.mxu0  ;;  %v1175_v27 = vpop.f32.mrf.mxu1  ;;  %v5024_v25 = vld [vmem:[#allocation13] ss:$16 sps:$4 sm:$0xff]  }
 0x26a   : > { %v1179_v34 = vadd.f32 %v1172_v22, %v1125_v29  ;;  %v5021_v22 = vld [vmem:[#allocation13 + $0x28] ss:$16 sps:$4 sm:$0xff]   ;;  %v5026_v23 = vld [vmem:[#allocation13 + $0x4] ss:$16 sps:$4 sm:$0xff]  }
 0x26b   : > { %v1121_v26 = vpop.f32.mrf.mxu0  ;;  %v4648_v31 = vpop.f32.mrf.mxu1 }
 0x26c   : > { %v1126_v32 = vadd.f32 %v1121_v26, %v1069_v28  ;;  %v5027_v26 = vld [vmem:[#allocation13 + $0x8] ss:$16 sps:$4 sm:$0xff]   ;;  %v4351_v28 = vld [vmem:[#allocation11] ss:$0 sm:$0xff] }
 0x26d   : > { %v4642_v30 = vpop.f32.mrf.mxu0 }
 0x26e   : > { %v1180_v38 = vadd.f32 %v1175_v27, %v1126_v32 }
 0x26f   : > { %v1226_v33 = vpop.f32.mrf.mxu0 }
 0x270   : > { %v1233_v39 = vadd.f32 %v1226_v33, %v1179_v34 }
 0x271   : > { %v4653_v35 = vpop.f32.mrf.mxu0 }
 0x272   : > { %v1235_v44 = vmax.f32 %v1233_v39, 0.0 }
 0x273   : > { %v1229_v41 = vpop.f32.mrf.mxu0 }
 0x274   : > { %v1234_v42 = vadd.f32 %v1229_v41, %v1180_v38 }
 0x275   : > { %v4654_v43 = vpop.f32.mrf.mxu0 }
 0x276   : > { %v1236_v45 = vmax.f32 %v1234_v42, 0.0 }
 0x278   : > { %v1237_v46 = vpack.c.bf16 %v1236_v45, %v1235_v44 }
 0x27a   : > { %1463 = vmatmul.mubr.bf16.vlgmr.msra.gmra.mxu1 %v1237_v46  ;;  %1506 = vmatmul.mubr.bf16.vlgmr.msra.gmra.mxu0 %v1237_v46 }
 0x27b   : > { %4657 = vmatprep.mubr.msk.bf16.mxu1 %vm5617_vm0, %v5616_v36  ;;  %4663 = vmatprep.mubr.msk.bf16.mxu0 %vm5617_vm0, %v5616_v36 }
 0x33a   : > { %v6052_v37 = vpop.f32.mrf.mxu1  ;;  %v1507_v40 = vpop.f32.mrf.mxu0 }
 0x33b   : > { %v1523_v33 = vadd.f32 %v4351_v28, %v6052_v37 }
 0x33c   : > { %v1466_v47 = vpop.f32.mrf.mxu1  ;;  %v1509_v50 = vpop.f32.mrf.mxu0 }
 0x33e   : > { %v6054_v51 = vpop.f32.mrf.mxu1  ;;  %v1511_v52 = vpop.f32.mrf.mxu0 }
 0x33f   : > { %v1526_v54 = vpack.c.bf16 %v1511_v52, %v1507_v40  ;;  %v1524_v38 = vadd.f32 %v4351_v28, %v6054_v51 }
 0x340   : > { %v1470_v55 = vpop.f32.mrf.mxu1  ;;  %v1513_v59 = vpop.f32.mrf.mxu0 }
 0x341   : > { %v1525_v57 = vpack.c.bf16 %v1470_v55, %v1466_v47  ;;  %4662 = vmatpush3.bf16.msra.mxu0 %v1526_v54  ;;  %v1527_v62 = vpack.c.bf16 %v1513_v59, %v1509_v50 }
 0x342   : > { %1852 = vmatprep.subr.bf16.mxu0 %v4984_v53 }
 0x343   : > { %4656 = vmatpush3.bf16.msra.mxu1 %v1525_v57 }
 0x344   : > { %4664 = vmatmul.mubr.msk.bf16.vlgmr.msra.gmra.mxu0 %vm1080_vm1, %v6029_v49  ;;  %4667 = vmatprep.subr.bf16.mxu1 %v5616_v36 }
 0x345   : > { %1853 = vmatpush1.bf16.msra.mxu0 %v4982_v58  ;;  %1884 = vmatprep.mubr.bf16.mxu0 %v5615_v2 }
 0x346   : > { %4658 = vmatmul.mubr.msk.bf16.vlgmr.msra.gmra.mxu1 %vm1080_vm1, %v6027_v48  ;;  %1854 = vmatprep.subr.bf16.mxu0 %v4990_v60 }
 0x347   : > { %4668 = vmatpush3.bf16.msra.mxu1 %v1527_v62  ;;  %4669 = vmatprep.mubr.msk.bf16.mxu1 %vm5617_vm0, %v5616_v36 }
 0x348   : > { %1895 = vmatprep.subr.bf16.mxu1 %v4987_v61 }
 0x349   : > { %1855 = vmatpush1.bf16.msra.mxu0 %v4988_v63 }
 0x34a   : > { %1856 = vmatprep.subr.bf16.mxu0 %v4996_v0 }
 0x34d   : > { %1857 = vmatpush1.bf16.msra.mxu0 %v4994_v1 }
 0x34e   : > { %4670 = vmatmul.mubr.msk.bf16.vlgmr.msra.gmra.mxu1 %vm1080_vm1, %v6039_v56  ;;  %1858 = vmatprep.subr.bf16.mxu0 %v5002_v3  ;;  %v4387_v3 = vld [vmem:[#allocation14] ss:$0 sm:$0xff] }
 0x34f   : > { %1896 = vmatpush1.bf16.msra.mxu1 %v4985_v4  ;;  %1927 = vmatprep.mubr.bf16.mxu1 %v5615_v2  ;;  %v5014_v2 = vld [vmem:[#allocation13 + $0x44] ss:$16 sps:$4 sm:$0xff]  }
 0x350   : > { %1897 = vmatprep.subr.bf16.mxu1 %v4993_v5 }
 0x351   : > { %1859 = vmatpush1.bf16.msra.mxu0 %v5000_v6 }
 0x352   : > { %1860 = vmatprep.subr.bf16.mxu0 %v5008_v12 }
 0x353   : > { %1898 = vmatpush1.bf16.msra.mxu1 %v4991_v7 }
 0x354   : > { %1899 = vmatprep.subr.bf16.mxu1 %v4999_v8 }
 0x355   : > { %1861 = vmatpush1.bf16.msra.mxu0 %v5006_v14 }
 0x356   : > { %1862 = vmatprep.subr.bf16.mxu0 %v5014_v2 }
 0x357   : > { %1900 = vmatpush1.bf16.msra.mxu1 %v4997_v9 }
 0x358   : > { %1901 = vmatprep.subr.bf16.mxu1 %v5005_v10 }
 0x359   : > { %1863 = vmatpush1.bf16.msra.mxu0 %v5012_v17 }
 0x35a   : > { %1864 = vmatprep.subr.bf16.mxu0 %v5020_v19 }
 0x35b   : > { %1902 = vmatpush1.bf16.msra.mxu1 %v5003_v11 }
 0x35c   : > { %1903 = vmatprep.subr.bf16.mxu1 %v5011_v13 }
 0x35d   : > { %1865 = vmatpush1.bf16.msra.mxu0 %v5018_v21 }
 0x35e   : > { %1866 = vmatprep.subr.bf16.mxu0 %v5026_v23 }
 0x35f   : > { %1904 = vmatpush1.bf16.msra.mxu1 %v5009_v15 }
 0x360   : > { %1905 = vmatprep.subr.bf16.mxu1 %v5017_v16 }
 0x361   : > { %1867 = vmatpush1.bf16.msra.mxu0 %v5024_v25 }
 0x362   : > { %4673 = vmatprep.subr.bf16.mxu0 %v5616_v36 }
 0x363   : > { %1906 = vmatpush1.bf16.msra.mxu1 %v5015_v18 }
 0x364   : > { %1907 = vmatprep.subr.bf16.mxu1 %v5023_v20 }
 0x367   : > { %1908 = vmatpush1.bf16.msra.mxu1 %v5021_v22 }
 0x368   : > { %1909 = vmatprep.subr.bf16.mxu1 %v5029_v24 }
 0x36b   : > { %1910 = vmatpush1.bf16.msra.mxu1 %v5027_v26 }
 0x36c   : > { %4679 = vmatprep.subr.bf16.mxu1 %v5616_v36 }
 0x404   : > { %v1605_v27 = vpop.f32.mrf.mxu0 }
 0x406   : > { %v1562_v29 = vpop.f32.mrf.mxu1  ;;  %v4665_v30 = vpop.f32.mrf.mxu0 }
 0x407   : > { %v1569_v39 = vadd.f32 %v1562_v29, %v1523_v33 }
 0x408   : > { %v4659_v31 = vpop.f32.mrf.mxu1  ;;  %v1608_v32 = vpop.f32.mrf.mxu0 }
 0x409   : > { %v1612_v44 = vadd.f32 %v1605_v27, %v1569_v39 }
 0x40a   : > { %v1565_v34 = vpop.f32.mrf.mxu1  ;;  %v4666_v35 = vpop.f32.mrf.mxu0 }
 0x40b   : > { %v1570_v42 = vadd.f32 %v1565_v34, %v1524_v38 }
 0x40c   : > { %v4660_v41 = vpop.f32.mrf.mxu1 }
 0x40d   : > { %v1613_v46 = vadd.f32 %v1608_v32, %v1570_v42 }
 0x40e   : > { %v1648_v43 = vpop.f32.mrf.mxu1 }
 0x40f   : > { %v1655_v40 = vadd.f32 %v1648_v43, %v1612_v44 }
 0x410   : > { %v4671_v45 = vpop.f32.mrf.mxu1 }
 0x411   : > { %v1657_v53 = vmax.f32 %v1655_v40, 0.0 }
 0x412   : > { %v1651_v47 = vpop.f32.mrf.mxu1 }
 0x413   : > { %v1656_v50 = vadd.f32 %v1651_v47, %v1613_v46 }
 0x414   : > { %v4672_v52 = vpop.f32.mrf.mxu1 }
 0x415   : > { %v1658_v54 = vmax.f32 %v1656_v50, 0.0 }
 0x417   : > { %v1659_v55 = vpack.c.bf16 %v1658_v54, %v1657_v53 }
 0x419   : > { %1885 = vmatmul.mubr.bf16.vlgmr.msra.gmra.mxu0 %v1659_v55  ;;  %1928 = vmatmul.mubr.bf16.vlgmr.msra.gmra.mxu1 %v1659_v55 }
 0x41a   : > { %4675 = vmatprep.mubr.msk.bf16.mxu0 %vm5617_vm0, %v5616_v36  ;;  %4681 = vmatprep.mubr.msk.bf16.mxu1 %vm5617_vm0, %v5616_v36 }
 0x4d9   : > { %v1886_v37 = vpop.f32.mrf.mxu0  ;;  %v1929_v51 = vpop.f32.mrf.mxu1 }
 0x4da   : > { %v1945_v7 = vadd.f32 %v4387_v3, %v1886_v37 }
 0x4db   : > { %v1888_v57 = vpop.f32.mrf.mxu0  ;;  %v1931_v58 = vpop.f32.mrf.mxu1 }
 0x4dd   : > { %v1890_v59 = vpop.f32.mrf.mxu0  ;;  %v1933_v60 = vpop.f32.mrf.mxu1 }
 0x4de   : > { %v1948_v61 = vpack.c.bf16 %v1933_v60, %v1929_v51 }
 0x4df   : > { %v1892_v62 = vpop.f32.mrf.mxu0  ;;  %v1935_v0 = vpop.f32.mrf.mxu1 }
 0x4e0   : > { %v1947_v63 = vpack.c.bf16 %v1892_v62, %v1888_v57  ;;  %4680 = vmatpush3.bf16.msra.mxu1 %v1948_v61  ;;  %v1949_v1 = vpack.c.bf16 %v1935_v0, %v1931_v58 }
 0x4e2   : > { %4674 = vmatpush3.bf16.msra.mxu0 %v1947_v63 }
 0x4e3   : > { %4685 = vmatprep.subr.bf16.mxu0 %v5616_v36  ;;  %4682 = vmatmul.mubr.msk.bf16.vlgmr.msra.gmra.mxu1 %vm1080_vm1, %v6029_v49 }
 0x4e5   : > { %4676 = vmatmul.mubr.msk.bf16.vlgmr.msra.gmra.mxu0 %vm1080_vm1, %v6027_v48  ;;  %v1946_v48 = vadd.f32 %v4387_v3, %v1890_v59 }
 0x4e6   : > { %4686 = vmatpush3.bf16.msra.mxu0 %v1949_v1  ;;  %4687 = vmatprep.mubr.msk.bf16.mxu0 %vm5617_vm0, %v5616_v36 }
 0x4ed   : > { %4688 = vmatmul.mubr.msk.bf16.vlgmr.msra.gmra.mxu0 %vm1080_vm1, %v6039_v56 }
 0x5a3   : > { %v2027_v4 = vpop.f32.mrf.mxu1 }
 0x5a5   : > { %v1984_v5 = vpop.f32.mrf.mxu0  ;;  %v4683_v6 = vpop.f32.mrf.mxu1 }
 0x5a6   : > { %v1991_v49 = vadd.f32 %v1984_v5, %v1945_v7 }
 0x5a7   : > { %v4677_v8 = vpop.f32.mrf.mxu0  ;;  %v2030_v9 = vpop.f32.mrf.mxu1 }
 0x5a8   : > { %v2034_v13 = vadd.f32 %v2027_v4, %v1991_v49 }
 0x5a9   : > { %v1987_v10 = vpop.f32.mrf.mxu0  ;;  %v4684_v11 = vpop.f32.mrf.mxu1 }
 0x5aa   : > { %v1992_v14 = vadd.f32 %v1987_v10, %v1946_v48 }
 0x5ab   : > { %v4678_v12 = vpop.f32.mrf.mxu0 }
 0x5ac   : > { %v2035_v56 = vadd.f32 %v2030_v9, %v1992_v14 }
 0x5ad   : > { %v2070_v36 = vpop.f32.mrf.mxu0 }
 0x5ae   : > { %v2077_v15 = vadd.f32 %v2070_v36, %v2034_v13 }
 0x5af   : > { %v4689_v2 = vpop.f32.mrf.mxu0 }
 0x5b0   : > { %2079 = vst [vmem:[%s5915_s28] sm:$0xff] %v2077_v15 }
 0x5b1   : > { %v2073_v16 = vpop.f32.mrf.mxu0 }
 0x5b2   : > { %v2078_v17 = vadd.f32 %v2073_v16, %v2035_v56 }
 0x5b3   : > { %v4690_v18 = vpop.f32.mrf.mxu0 }
 0x5b4   : > { %2080 = vst [vmem:[%s5915_s28 + $0x8] sm:$0xff] %v2078_v17 }
 0x5b5 PF: > { %p4391_p2 = scmp.ne.s32.totalorder %s5757_s3, 1 }
 0x5b6   : > { %s6543_s26 = sld [smem:[#allocation40_spill]] (!%p4391_p2) }
 0x5b7   : > { %2084 = sbr.rel (%p4391_p2) target bundleno = 4821 (0x12d5), region = 152  ;;  %s6544_s1 = sld [smem:[#allocation41_spill]] (!%p4391_p2) }
 0x5bc   : > { %v5037_v19 = vld [vmem:[%s6472_s9 + $0x74] ss:$8 sps:$4 sm:$0xff]   ;;  %v5039_v20 = vld [vmem:[%s6472_s9 + $0x70] ss:$8 sps:$4 sm:$0xff]   ;;  %v5618_v21 = vmov 0   ;;  %v5065_v35 = vld [vmem:[%s6473_s10 + $0x68] sm:$0xff]   ;;  %v2413_v62 = vlaneseq }
 0x5bd   : > { %2218 = vmatprep.mubr.bf16.mxu0 %v5618_v21  ;;  %5030 = vset.pattern.permute.xlu0 %v5618_v21  ;;  %v5040_v22 = vld [vmem:[%s6472_s9 + $0x64] ss:$8 sps:$4 sm:$0xff]   ;;  %v5042_v23 = vld [vmem:[%s6472_s9 + $0x60] ss:$8 sps:$4 sm:$0xff]   ;;  %v5043_v24 = vld [vmem:[%s6472_s9 + $0x54] ss:$8 sps:$4 sm:$0xff]  }
 0x5be   : > { %2186 = vmatprep.subr.bf16.mxu0 %v5037_v19  ;;  %v5045_v25 = vld [vmem:[%s6472_s9 + $0x50] ss:$8 sps:$4 sm:$0xff]   ;;  %v5046_v26 = vld [vmem:[%s6472_s9 + $0x44] ss:$8 sps:$4 sm:$0xff]   ;;  %v5048_v27 = vld [vmem:[%s6472_s9 + $0x40] ss:$8 sps:$4 sm:$0xff]  }
 0x5bf   : > { %2187 = vmatpush1.bf16.msra.mxu0 %v5039_v20  ;;  %v5049_v28 = vld [vmem:[%s6472_s9 + $0x34] ss:$8 sps:$4 sm:$0xff]   ;;  %v5051_v30 = vld [vmem:[%s6472_s9 + $0x30] ss:$8 sps:$4 sm:$0xff]   ;;  %v5052_v32 = vld [vmem:[%s6472_s9 + $0x24] ss:$8 sps:$4 sm:$0xff]  }
 0x5c0   : > { %2188 = vmatprep.subr.bf16.mxu0 %v5040_v22  ;;  %v5061_v29 = vld [vmem:[%s6473_s10 + $0x78] sm:$0xff]   ;;  %v5063_v33 = vld [vmem:[%s6473_s10 + $0x70] sm:$0xff]   ;;  %v5054_v38 = vld [vmem:[%s6472_s9 + $0x20] ss:$8 sps:$4 sm:$0xff]   ;;  %v5619_v59 = vmov 0.0   ;;  %v2414_v3 = vshrl.u32 %v2413_v62, 7 }
 0x5c1   : > { %v5062_v31 = vld [vmem:[%s6473_s10 + $0x38] sm:$0xff]   ;;  %4559 = vmatprep.subr.bf16.mxu1 %v5061_v29  ;;  %v5064_v34 = vld [vmem:[%s6473_s10 + $0x30] sm:$0xff]   ;;  %v5066_v41 = vld [vmem:[%s6473_s10 + $0x28] sm:$0xff]   ;;  %v5620_v60 = vmov 1966171168   ;;  %v5621_v48 = vmov 1  }
 0x5c2   : > { %4560 = vmatpush3.bf16.msra.mxu1 %v5062_v31  ;;  %v5055_v39 = vld [vmem:[%s6472_s9 + $0x14] ss:$8 sps:$4 sm:$0xff]   ;;  %v5067_v42 = vld [vmem:[%s6473_s10 + $0x60] sm:$0xff]   ;;  %v5057_v43 = vld [vmem:[%s6472_s9 + $0x10] ss:$8 sps:$4 sm:$0xff]   ;;  %v2411_v61 = vunpack.c.l.s4 %v5620_v60  ;;  %5031 = vset.pattern.permute.xlu1 %v5621_v48  ;;  %v6196_v19 = vsub.s32 0, %v2414_v3 }
 0x5c3   : > { %2189 = vmatpush1.bf16.msra.mxu0 %v5042_v23  ;;  %4561 = vmatprep.subr.bf16.mxu1 %v5063_v33  ;;  %v5058_v44 = vld [vmem:[%s6472_s9 + $0x4] ss:$8 sps:$4 sm:$0xff]   ;;  %v5069_v46 = vld [vmem:[%s6473_s10 + $0x58] sm:$0xff]   ;;  %v5060_v40 = vld [vmem:[%s6472_s9] ss:$8 sps:$4 sm:$0xff]   ;;  %v6198_v20 = vsub.s32 1, %v2414_v3 }
 0x5c4   : > { %2190 = vmatprep.subr.bf16.mxu0 %v5043_v24  ;;  %v5068_v45 = vld [vmem:[%s6473_s10 + $0x20] sm:$0xff]   ;;  %v2088_v50 = vld [vmem:[#allocation2 + $0x8] sm:$0xff]  ;;  %v5070_v52 = vld [vmem:[%s6473_s10 + $0x18] sm:$0xff]   ;;  %v2412_v1 = vunpack.c.0.s8 %v2411_v61  ;;  %vm2488_vm2 = vcmask 130048   ;;  %vm5622_vm3 = vmmov 0  }
 0x5c5   : > { %v2087_v47 = vld [vmem:[#allocation2] sm:$0xff]  ;;  %v5071_v53 = vld [vmem:[%s6473_s10 + $0x50] sm:$0xff]   ;;  %v5073_v37 = vld [vmem:[%s6473_s10 + $0x48] sm:$0xff]  }
 0x5c6   : > { %4562 = vmatpush3.bf16.msra.mxu1 %v5064_v34  ;;  %v5072_v54 = vld [vmem:[%s6473_s10 + $0x10] sm:$0xff]   ;;  %v2089_v55 = vpack.c.bf16 %v2088_v50, %v2087_v47  ;;  %v5074_v51 = vld [vmem:[%s6473_s10 + $0x8] sm:$0xff]   ;;  %v5075_v57 = vld [vmem:[%s6473_s10 + $0x40] sm:$0xff]   ;;  %v6189_v4 = vsub.s32 %v2412_v1, %v2414_v3 }
 0x5c7   : > { %2191 = vmatpush1.bf16.msra.mxu0 %v5045_v25  ;;  %4563 = vmatprep.subr.bf16.mxu1 %v5065_v35  ;;  %v5076_v58 = vld [vmem:[%s6473_s10] sm:$0xff]  }
 0x5c8   : > { %2192 = vmatprep.subr.bf16.mxu0 %v5046_v26  ;;  %v4424_v63 = vld.sshfl [vmem:[%s6474_s11] sm:$0x11 pattern:$0x75316420] }
 0x5c9   : > { %v2409_v0 = vcombine.high %v4424_v63, %v4424_v63  ;;  %v2416_v11 = vrot.slane %v4424_v63, %v6189_v4 }
 0x5ca   : > { %4564 = vmatpush3.bf16.msra.mxu1 %v5066_v41 }
 0x5cb   : > { %2193 = vmatpush1.bf16.msra.mxu0 %v5048_v27  ;;  %4565 = vmatprep.subr.bf16.mxu1 %v5067_v42  ;;  %v2423_v5 = vrot.slane %v2409_v0, %v6189_v4 }
 0x5cc   : > { %2194 = vmatprep.subr.bf16.mxu0 %v5049_v28 }
 0x5ce   : > { %4566 = vmatpush3.bf16.msra.mxu1 %v5068_v45 }
 0x5cf   : > { %2195 = vmatpush1.bf16.msra.mxu0 %v5051_v30  ;;  %4567 = vmatprep.subr.bf16.mxu1 %v5069_v46 }
 0x5d0   : > { %2196 = vmatprep.subr.bf16.mxu0 %v5052_v32  ;;  %v6202_v32 = vld [vmem:[#allocation7] sm:$0xff] }
 0x5d2   : > { %4568 = vmatpush3.bf16.msra.mxu1 %v5070_v52 }
 0x5d3   : > { %2197 = vmatpush1.bf16.msra.mxu0 %v5054_v38  ;;  %4569 = vmatprep.subr.bf16.mxu1 %v5071_v53 }
 0x5d4   : > { %2198 = vmatprep.subr.bf16.mxu0 %v5055_v39 }
 0x5d6   : > { %4570 = vmatpush3.bf16.msra.mxu1 %v5072_v54 }
 0x5d7   : > { %2199 = vmatpush1.bf16.msra.mxu0 %v5057_v43  ;;  %4571 = vmatprep.subr.bf16.mxu1 %v5073_v37  ;;  %v6205_v43 = vld [vmem:[#allocation7 + $0x8] sm:$0xff] }
 0x5d8   : > { %2200 = vmatprep.subr.bf16.mxu0 %v5058_v44 }
 0x5da   : > { %4572 = vmatpush3.bf16.msra.mxu1 %v5074_v51 }
 0x5db   : > { %2201 = vmatpush1.bf16.msra.mxu0 %v5060_v40  ;;  %4573 = vmatprep.subr.bf16.mxu1 %v5075_v57 }
 0x5de   : > { %2219 = vmatmul.mubr.bf16.vlgmr.msra.gmra.mxu0 %v2089_v55  ;;  %4574 = vmatpush3.bf16.msra.mxu1 %v5076_v58 }
 0x5df   : > { %4691 = vmatprep.subr.bf16.mxu1 %v5619_v59  ;;  %2458 = vmatprep.mubr.bf16.mxu0 %v2423_v5 }
 0x69e   : > { %v2220_v6 = vpop.f32.mrf.mxu0 }
 0x6a0   : > { %v2222_v7 = vpop.f32.mrf.mxu0 }
 0x6a2   : > { %v2224_v8 = vpop.f32.mrf.mxu0 }
 0x6a3   : > { %v2229_v10 = vpack.c.bf16 %v2224_v8, %v2220_v6 }
 0x6a4   : > { %v2226_v9 = vpop.f32.mrf.mxu0 }
 0x6a5   : > { %v2230_v49 = vpack.c.bf16 %v2226_v9, %v2222_v7 }
 0x6a7   : > { %2391 = vmatprep.mubr.bf16.mxu1 %v2230_v49  ;;  %2440 = vmatprep.subr.bf16.mxu0 %v2230_v49 }
 0x6a8   : > { %2392 = vmatmul.mubr.bf16.vlgmr.msra.gmra.mxu1 %v2229_v10  ;;  %2441 = vmatpush1.bf16.xpose.msra.mxu0 %v2229_v10 }
 0x6a9   : > { %4692 = vmatpush3.bf16.msra.mxu1 %v2229_v10  ;;  %4697 = vmatprep.subr.bf16.mxu0 %v5619_v59 }
 0x6aa   : > { %4693 = vmatprep.mubr.msk.bf16.mxu1 %vm5622_vm3, %v5619_v59 }
 0x6af   : > { %2459 = vmatmul.mubr.bf16.vlgmr.msra.gmra.mxu0 %v2416_v11 }
 0x6b0   : > { %4698 = vmatpush3.bf16.msra.mxu0 %v2230_v49  ;;  %4699 = vmatprep.mubr.msk.bf16.mxu0 %vm5622_vm3, %v5619_v59 }
 0x768   : > { %v4575_v12 = vpop.f32.mrf.mxu1 }
 0x76a   : > { %v4576_v13 = vpop.f32.mrf.mxu1 }
 0x76b   : > { %v4577_v14 = vadd.f32 %v4576_v13, %v4575_v12  ;;  %v5079_v12 = vld [vmem:[#allocation16 + $0x74] ss:$8 sps:$4 sm:$0xff]  }
 0x76c   : > { %v4578_v36 = vpop.f32.mrf.mxu1  ;;  %v5082_v13 = vld [vmem:[#allocation16 + $0xf4] ss:$8 sps:$4 sm:$0xff]   ;;  %2898 = vmatprep.subr.bf16.mxu0 %v5079_v12 }
 0x76d   : > { %2566 = vperm.xlu1 %5031, %v4577_v14   ;;  %2468 = vperm.xlu0 %5030, %v4577_v14  }
 0x76e   : > { %v4579_v15 = vpop.f32.mrf.mxu1  ;;  %2775 = vmatprep.subr.bf16.mxu1 %v5082_v13 }
 0x76f   : > { %v4580_v2 = vadd.f32 %v4579_v15, %v4578_v36  ;;  %v2460_v56 = vpop.f32.mrf.mxu0 }
 0x770   : > { %v2479_v22 = vrot.slane %v2460_v56, %v6196_v19  ;;  %v2576_v23 = vrot.slane %v2460_v56, %v6198_v20 }
 0x771   : > { %2570 = vperm.xlu1 %5031, %v4580_v2   ;;  %2473 = vperm.xlu0 %5030, %v4580_v2   ;;  %v2462_v16 = vpop.f32.mrf.mxu0 }
 0x773   : > { %v2463_v17 = vpop.f32.mrf.mxu0 }
 0x775   : > { %v2464_v18 = vpop.f32.mrf.mxu0  ;;  %5032 = vset.pattern.permute.xlu1 %v5618_v21 }
 0x7e8   : > { %v2567_v24 = vpop.permute.xlu1 %2566  ;;  %v2469_v25 = vpop.permute.xlu0 %2468 }
 0x7e9   : > { %v2577_v26 = vadd.f32 %v2576_v23, %v2567_v24  ;;  %v2480_v27 = vadd.f32 %v2479_v22, %v2469_v25  ;;  %v5088_v25 = vld [vmem:[#allocation16 + $0xe4] ss:$8 sps:$4 sm:$0xff]  }
 0x7eb   : > { %v2579_v28 = vmul.f32 0.2, %v2577_v26  ;;  %v2482_v29 = vmul.f32 0.2, %v2480_v27 }
 0x7ec   : > { %v2571_v30 = vpop.permute.xlu1 %2570  ;;  %v2474_v31 = vpop.permute.xlu0 %2473 }
 0x7ed   : > { %v2581_v33 = vmax.f32 %v2577_v26, %v2579_v28  ;;  %v2484_v34 = vmax.f32 %v2480_v27, %v2482_v29  ;;  %v2578_v35 = vadd.f32 %v2576_v23, %v2571_v30  ;;  %v2481_v38 = vadd.f32 %v2479_v22, %v2474_v31  ;;  %v5080_v23 = vld [vmem:[#allocation16 + $0xf0] ss:$8 sps:$4 sm:$0xff]   ;;  %v5086_v30 = vld [vmem:[#allocation16 + $0xe0] ss:$8 sps:$4 sm:$0xff]  }
 0x7ee   : > { %v5077_v29 = vld [vmem:[#allocation16 + $0x70] ss:$8 sps:$4 sm:$0xff]  }
 0x7ef   : > { %v2580_v39 = vmul.f32 0.2, %v2578_v35  ;;  %v2483_v41 = vmul.f32 0.2, %v2481_v38  ;;  %v2486_v42 = vadd.f32 %v2484_v34, %v6202_v32  ;;  %v2583_v40 = vadd.f32 %v2581_v33, %v6202_v32  ;;  %v5085_v33 = vld [vmem:[#allocation16 + $0x64] ss:$8 sps:$4 sm:$0xff]  }
 0x7f0   : > { %v5094_v34 = vld [vmem:[#allocation16 + $0xd4] ss:$8 sps:$4 sm:$0xff]  }
 0x7f1   : > { %v2582_v44 = vmax.f32 %v2578_v35, %v2580_v39  ;;  %v2485_v45 = vmax.f32 %v2481_v38, %v2483_v41  ;;  %v2489_v46 = vsel %vm2488_vm2, %v2486_v42, -inf  ;;  %v2585_v52 = vsel %vm2488_vm2, %v2583_v40, -inf  ;;  %v5083_v35 = vld [vmem:[#allocation16 + $0x60] ss:$8 sps:$4 sm:$0xff]   ;;  %v5092_v38 = vld [vmem:[#allocation16 + $0xd0] ss:$8 sps:$4 sm:$0xff]  }
 0x7f2   : > { %2490 = vmax.xlane.f32.xlu0 %v2489_v46  ;;  %v5091_v39 = vld [vmem:[#allocation16 + $0x54] ss:$8 sps:$4 sm:$0xff]   ;;  %v5100_v41 = vld [vmem:[#allocation16 + $0xc4] ss:$8 sps:$4 sm:$0xff]  }
 0x7f3   : > { %v2487_v47 = vadd.f32 %v2485_v45, %v6205_v43  ;;  %v2584_v53 = vadd.f32 %v2582_v44, %v6205_v43  ;;  %v5098_v44 = vld [vmem:[#allocation16 + $0xc0] ss:$8 sps:$4 sm:$0xff]   ;;  %v5097_v45 = vld [vmem:[#allocation16 + $0x44] ss:$8 sps:$4 sm:$0xff]   ;;  %v5106_v46 = vld [vmem:[#allocation16 + $0xb4] ss:$8 sps:$4 sm:$0xff]  }
 0x7f5   : > { %v2492_v50 = vsel %vm2488_vm2, %v2487_v47, -inf  ;;  %v2588_v54 = vsel %vm2488_vm2, %v2584_v53, -inf }
 0x7f6   : > { %2493 = vmax.xlane.f32.xlu1 %v2492_v50  ;;  %2586 = vmax.xlane.f32.xlu0 %v2585_v52  ;;  %v5103_v50 = vld [vmem:[#allocation16 + $0x34] ss:$8 sps:$4 sm:$0xff]   ;;  %v5101_v52 = vld [vmem:[#allocation16 + $0x30] ss:$8 sps:$4 sm:$0xff]  }
 0x7fa   : > { %2589 = vmax.xlane.f32.xlu0 %v2588_v54  ;;  %v5107_v54 = vld [vmem:[#allocation16 + $0x20] ss:$8 sps:$4 sm:$0xff]  }
 0x87b   : > { %v2491_v55 = vpop.xlane.xlu0 %2490 }
 0x87c   : > { %v2495_v37 = vsub.f32 %v2486_v42, %v2491_v55  ;;  %v5089_v42 = vld [vmem:[#allocation16 + $0x50] ss:$8 sps:$4 sm:$0xff]   ;;  %v5112_v55 = vld [vmem:[#allocation16 + $0xa4] ss:$8 sps:$4 sm:$0xff]  }
 0x87e   : > { %v2497_v51 = vmul.f32 1.442695, %v2495_v37  ;;  %v5115_v37 = vld [vmem:[#allocation16 + $0x14] ss:$8 sps:$4 sm:$0xff]  }
 0x87f   : > { %v2494_v57 = vpop.xlane.xlu1 %2493  ;;  %v2587_v58 = vpop.xlane.xlu0 %2586 }
 0x880   : > { %5205 = vpow2.f32 %v2497_v51  ;;  %v2496_v60 = vsub.f32 %v2487_v47, %v2494_v57  ;;  %v2591_v61 = vsub.f32 %v2583_v40, %v2587_v58  ;;  %v5095_v40 = vld [vmem:[#allocation16 + $0x40] ss:$8 sps:$4 sm:$0xff]   ;;  %v5104_v47 = vld [vmem:[#allocation16 + $0xb0] ss:$8 sps:$4 sm:$0xff]   ;;  %v5118_v58 = vld [vmem:[#allocation16 + $0x94] ss:$8 sps:$4 sm:$0xff]  }
 0x881   : > { %v5110_v51 = vld [vmem:[#allocation16 + $0xa0] ss:$8 sps:$4 sm:$0xff]   ;;  %v5113_v57 = vld [vmem:[#allocation16 + $0x10] ss:$8 sps:$4 sm:$0xff]  }
 0x882   : > { %v2499_v62 = vmul.f32 1.442695, %v2496_v60  ;;  %v2593_v63 = vmul.f32 1.442695, %v2591_v61  ;;  %v5121_v60 = vld [vmem:[#allocation16 + $0x4] ss:$8 sps:$4 sm:$0xff]  }
 0x883   : > { %v2590_v0 = vpop.xlane.xlu0 %2589  ;;  %v5116_v61 = vld [vmem:[#allocation16 + $0x90] ss:$8 sps:$4 sm:$0xff]  }
 0x884   : > { %5207 = vpow2.f32 %v2499_v62  ;;  %v2592_v1 = vsub.f32 %v2584_v53, %v2590_v0  ;;  %v5109_v53 = vld [vmem:[#allocation16 + $0x24] ss:$8 sps:$4 sm:$0xff]   ;;  %v5119_v62 = vld [vmem:[#allocation16] ss:$8 sps:$4 sm:$0xff]  }
 0x885   : > { %5209 = vpow2.f32 %v2593_v63  ;;  %v5124_v63 = vld [vmem:[#allocation16 + $0x84] ss:$8 sps:$4 sm:$0xff]   ;;  %v5122_v0 = vld [vmem:[#allocation16 + $0x80] ss:$8 sps:$4 sm:$0xff]  }
 0x886   : > { %v2595_v3 = vmul.f32 1.442695, %v2592_v1  ;;  %v5125_v1 = vld [vmem:[%s6477_s14 + $0x78] sm:$0xff]  }
 0x888   : > { %5211 = vpow2.f32 %v2595_v3  ;;  %v4425_v3 = vld [vmem:[%s6475_s12] ss:$0 sm:$0xff] }
 0x88d   : > { %v5206_v5 = vpop.eup %5205 }
 0x88e   : > { %v2501_v6 = vsel %vm2488_vm2, %v5206_v5, 0.0 }
 0x88f   : > { %2502 = vadd.xlane.f32.xlu1 %v2501_v6 }
 0x891   : > { %v5208_v7 = vpop.eup %5207 }
 0x892   : > { %v5210_v8 = vpop.eup %5209  ;;  %v2504_v9 = vsel %vm2488_vm2, %v5208_v7, 0.0 }
 0x893   : > { %2505 = vadd.xlane.f32.xlu0 %v2504_v9  ;;  %v2597_v49 = vsel %vm2488_vm2, %v5210_v8, 0.0  ;;  %v4427_v9 = vld [vmem:[%s6475_s12 + $0x1] ss:$0 sm:$0xff] }
 0x894   : > { %2598 = vadd.xlane.f32.xlu1 %v2597_v49 }
 0x895   : > { %v5212_v10 = vpop.eup %5211 }
 0x896   : > { %v2600_v11 = vsel %vm2488_vm2, %v5212_v10, 0.0 }
 0x897   : > { %2601 = vadd.xlane.f32.xlu0 %v2600_v11 }
 0x918   : > { %v2503_v14 = vpop.xlane.xlu1 %2502 }
 0x919   : > { %5213 = vrcp.f32 %v2503_v14 }
 0x91c   : > { %v2506_v36 = vpop.xlane.xlu0 %2505 }
 0x91d   : > { %v2599_v15 = vpop.xlane.xlu1 %2598  ;;  %5215 = vrcp.f32 %v2506_v36 }
 0x91e   : > { %5217 = vrcp.f32 %v2599_v15 }
 0x920   : > { %v2602_v2 = vpop.xlane.xlu0 %2601 }
 0x921   : > { %5219 = vrcp.f32 %v2602_v2 }
 0x926   : > { %v5214_v56 = vpop.eup %5213 }
 0x927   : > { %v2509_v17 = vmul.f32 %v5214_v56, %v5206_v5 }
 0x92a   : > { %v5216_v16 = vpop.eup %5215 }
 0x92b   : > { %v2510_v18 = vmul.f32 %v5216_v16, %v5208_v7  ;;  %v5218_v22 = vpop.eup %5217 }
 0x92c   : > { %v2605_v27 = vmul.f32 %v5218_v22, %v5210_v8  ;;  %v5126_v22 = vld [vmem:[%s6477_s14 + $0x38] sm:$0xff]  }
 0x92d   : > { %v2511_v24 = vpack.c.bf16 %v2510_v18, %v2509_v17 }
 0x92e   : > { %v5220_v26 = vpop.eup %5219 }
 0x92f   : > { %4694 = vmatmul.mubr.msk.bf16.vlgmr.msra.gmra.mxu1 %vm2488_vm2, %v2511_v24  ;;  %v2606_v28 = vmul.f32 %v5220_v26, %v5212_v10  ;;  %v5127_v24 = vld [vmem:[%s6477_s14 + $0x70] sm:$0xff]   ;;  %v5129_v26 = vld [vmem:[%s6477_s14 + $0x68] sm:$0xff]  }
 0x930   : > { %2776 = vmatpush1.bf16.msra.mxu1 %v5080_v23  ;;  %2807 = vmatprep.mubr.bf16.mxu1 %v5618_v21 }
 0x931   : > { %v2607_v31 = vpack.c.bf16 %v2606_v28, %v2605_v27  ;;  %2777 = vmatprep.subr.bf16.mxu1 %v5088_v25  ;;  %v5128_v25 = vld [vmem:[%s6477_s14 + $0x30] sm:$0xff]   ;;  %v5130_v27 = vld [vmem:[%s6477_s14 + $0x28] sm:$0xff]   ;;  %v5131_v28 = vld [vmem:[%s6477_s14 + $0x60] sm:$0xff]  }
 0x933   : > { %4700 = vmatmul.mubr.msk.bf16.vlgmr.msra.gmra.mxu0 %vm2488_vm2, %v2607_v31  ;;  %v5134_v31 = vld [vmem:[%s6477_s14 + $0x18] sm:$0xff]  }
 0x934   : > { %2899 = vmatpush1.bf16.msra.mxu0 %v5077_v29  ;;  %2778 = vmatpush1.bf16.msra.mxu1 %v5086_v30  ;;  %v5132_v29 = vld [vmem:[%s6477_s14 + $0x20] sm:$0xff]   ;;  %v5133_v30 = vld [vmem:[%s6477_s14 + $0x58] sm:$0xff]  }
 0x935   : > { %2900 = vmatprep.subr.bf16.mxu0 %v5085_v33  ;;  %2779 = vmatprep.subr.bf16.mxu1 %v5094_v34  ;;  %v5135_v33 = vld [vmem:[%s6477_s14 + $0x50] sm:$0xff]  }
 0x936   : > { %2930 = vmatprep.mubr.bf16.mxu0 %v5618_v21  ;;  %v5136_v34 = vld [vmem:[%s6477_s14 + $0x10] sm:$0xff]  }
 0x938   : > { %2901 = vmatpush1.bf16.msra.mxu0 %v5083_v35  ;;  %2780 = vmatpush1.bf16.msra.mxu1 %v5092_v38  ;;  %v5137_v35 = vld [vmem:[%s6477_s14 + $0x48] sm:$0xff]  }
 0x939   : > { %2902 = vmatprep.subr.bf16.mxu0 %v5091_v39  ;;  %2781 = vmatprep.subr.bf16.mxu1 %v5100_v41  ;;  %v5138_v38 = vld [vmem:[%s6477_s14 + $0x8] sm:$0xff]   ;;  %v5139_v39 = vld [vmem:[%s6477_s14 + $0x40] sm:$0xff]  }
 0x93a   : > { %v5140_v41 = vld [vmem:[%s6477_s14] sm:$0xff]  }
 0x93c   : > { %2903 = vmatpush1.bf16.msra.mxu0 %v5089_v42  ;;  %2782 = vmatpush1.bf16.msra.mxu1 %v5098_v44  ;;  %v4477_v42 = vld.sshfl [vmem:[%s6478_s15] sm:$0x11 pattern:$0x75316420] }
 0x93d   : > { %2904 = vmatprep.subr.bf16.mxu0 %v5097_v45  ;;  %2783 = vmatprep.subr.bf16.mxu1 %v5106_v46  ;;  %v3121_v44 = vcombine.high %v4477_v42, %v4477_v42 }
 0x93f   : > { %v3135_v45 = vrot.slane %v3121_v44, %v6189_v4 }
 0x940   : > { %2905 = vmatpush1.bf16.msra.mxu0 %v5095_v40  ;;  %2784 = vmatpush1.bf16.msra.mxu1 %v5104_v47 }
 0x941   : > { %2906 = vmatprep.subr.bf16.mxu0 %v5103_v50  ;;  %2785 = vmatprep.subr.bf16.mxu1 %v5112_v55 }
 0x944   : > { %2907 = vmatpush1.bf16.msra.mxu0 %v5101_v52  ;;  %2786 = vmatpush1.bf16.msra.mxu1 %v5110_v51 }
 0x945   : > { %2908 = vmatprep.subr.bf16.mxu0 %v5109_v53  ;;  %2787 = vmatprep.subr.bf16.mxu1 %v5118_v58 }
 0x948   : > { %2909 = vmatpush1.bf16.msra.mxu0 %v5107_v54  ;;  %2788 = vmatpush1.bf16.msra.mxu1 %v5116_v61 }
 0x949   : > { %2910 = vmatprep.subr.bf16.mxu0 %v5115_v37  ;;  %2789 = vmatprep.subr.bf16.mxu1 %v5124_v63 }
 0x94c   : > { %2911 = vmatpush1.bf16.msra.mxu0 %v5113_v57  ;;  %2790 = vmatpush1.bf16.msra.mxu1 %v5122_v0 }
 0x94d   : > { %2912 = vmatprep.subr.bf16.mxu0 %v5121_v60  ;;  %4585 = vmatprep.subr.bf16.mxu1 %v5125_v1 }
 0x950   : > { %2913 = vmatpush1.bf16.msra.mxu0 %v5119_v62  ;;  %v3128_v62 = vrot.slane %v4477_v42, %v6189_v4 }
 0x9ef   : > { %v2556_v5 = vpop.f32.mrf.mxu1 }
 0x9f0   : > { %v2557_v7 = vadd.f32 %v4425_v3, %v2556_v5 }
 0x9f1   : > { %v4695_v6 = vpop.f32.mrf.mxu1 }
 0x9f2   : > { %v2563_v13 = vmax.f32 %v2557_v7, 0.0 }
 0x9f3   : > { %v2559_v8 = vpop.f32.mrf.mxu1  ;;  %v2652_v49 = vpop.f32.mrf.mxu0 }
 0x9f4   : > { %v2560_v10 = vadd.f32 %v4425_v3, %v2559_v8  ;;  %v2653_v36 = vadd.f32 %v4427_v9, %v2652_v49 }
 0x9f5   : > { %v4696_v11 = vpop.f32.mrf.mxu1  ;;  %v4701_v12 = vpop.f32.mrf.mxu0 }
 0x9f6   : > { %v2564_v14 = vmax.f32 %v2560_v10, 0.0  ;;  %v2659_v17 = vmax.f32 %v2653_v36, 0.0 }
 0x9f7   : > { %v2655_v15 = vpop.f32.mrf.mxu0 }
 0x9f8   : > { %v2661_v2 = vpack.c.bf16 %v2564_v14, %v2563_v13  ;;  %v2656_v56 = vadd.f32 %v4427_v9, %v2655_v15 }
 0x9f9   : > { %v4702_v16 = vpop.f32.mrf.mxu0 }
 0x9fa   : > { %v2660_v18 = vmax.f32 %v2656_v56, 0.0  ;;  %2931 = vmatmul.mubr.bf16.vlgmr.msra.gmra.mxu0 %v2661_v2 }
 0x9fb   : > { %3170 = vmatprep.mubr.bf16.mxu0 %v3135_v45 }
 0x9fc   : > { %v2678_v23 = vpack.c.bf16 %v2660_v18, %v2659_v17 }
 0x9fe   : > { %2808 = vmatmul.mubr.bf16.vlgmr.msra.gmra.mxu1 %v2678_v23 }
 0x9ff   : > { %4586 = vmatpush3.bf16.msra.mxu1 %v5126_v22 }
 0xa00   : > { %4587 = vmatprep.subr.bf16.mxu1 %v5127_v24 }
 0xa03   : > { %4588 = vmatpush3.bf16.msra.mxu1 %v5128_v25 }
 0xa04   : > { %4589 = vmatprep.subr.bf16.mxu1 %v5129_v26 }
 0xa07   : > { %4590 = vmatpush3.bf16.msra.mxu1 %v5130_v27 }
 0xa08   : > { %4591 = vmatprep.subr.bf16.mxu1 %v5131_v28 }
 0xa0b   : > { %4592 = vmatpush3.bf16.msra.mxu1 %v5132_v29 }
 0xa0c   : > { %4593 = vmatprep.subr.bf16.mxu1 %v5133_v30 }
 0xa0f   : > { %4594 = vmatpush3.bf16.msra.mxu1 %v5134_v31 }
 0xa10   : > { %4595 = vmatprep.subr.bf16.mxu1 %v5135_v33 }
 0xa13   : > { %4596 = vmatpush3.bf16.msra.mxu1 %v5136_v34 }
 0xa14   : > { %4597 = vmatprep.subr.bf16.mxu1 %v5137_v35 }
 0xa17   : > { %4598 = vmatpush3.bf16.msra.mxu1 %v5138_v38 }
 0xa18   : > { %4599 = vmatprep.subr.bf16.mxu1 %v5139_v39 }
 0xa1b   : > { %4600 = vmatpush3.bf16.msra.mxu1 %v5140_v41 }
 0xaba   : > { %v2932_v46 = vpop.f32.mrf.mxu0 }
 0xabc   : > { %v2934_v40 = vpop.f32.mrf.mxu0 }
 0xabe   : > { %v2809_v47 = vpop.f32.mrf.mxu1  ;;  %v2936_v50 = vpop.f32.mrf.mxu0 }
 0xabf   : > { %v2933_v58 = vadd.f32 %v2932_v46, %v2809_v47 }
 0xac0   : > { %v2811_v52 = vpop.f32.mrf.mxu1  ;;  %v2938_v54 = vpop.f32.mrf.mxu0 }
 0xac1   : > { %v2935_v51 = vadd.f32 %v2934_v40, %v2811_v52 }
 0xac2   : > { %v2813_v53 = vpop.f32.mrf.mxu1 }
 0xac3   : > { %v2937_v55 = vadd.f32 %v2936_v50, %v2813_v53 }
 0xac4   : > { %v2815_v37 = vpop.f32.mrf.mxu1 }
 0xac5   : > { %v2939_v57 = vadd.f32 %v2938_v54, %v2815_v37  ;;  %v2941_v61 = vpack.c.bf16 %v2937_v55, %v2933_v58 }
 0xac7   : > { %v6284_v60 = vpack.c.bf16 %v2939_v57, %v2935_v51 }
 0xac9   : > { %3103 = vmatprep.mubr.bf16.mxu1 %v6284_v60  ;;  %3152 = vmatprep.subr.bf16.mxu0 %v6284_v60 }
 0xaca   : > { %3104 = vmatmul.mubr.bf16.vlgmr.msra.gmra.mxu1 %v2941_v61  ;;  %3153 = vmatpush1.bf16.xpose.msra.mxu0 %v2941_v61 }
 0xacb   : > { %4703 = vmatprep.subr.bf16.mxu0 %v5619_v59  ;;  %3641 = vmatprep.mubr.bf16.mxu1 %v5618_v21 }
 0xad1   : > { %3171 = vmatmul.mubr.bf16.vlgmr.msra.gmra.mxu0 %v3128_v62 }
 0xad2   : > { %4704 = vmatpush3.bf16.msra.mxu0 %v2941_v61  ;;  %4705 = vmatprep.mubr.msk.bf16.mxu0 %vm5622_vm3, %v5619_v59 }
 0xad3   : > { %4709 = vmatprep.subr.bf16.mxu0 %v5619_v59 }
 0xb8a   : > { %v4601_v63 = vpop.f32.mrf.mxu1 }
 0xb8c   : > { %v4602_v0 = vpop.f32.mrf.mxu1 }
 0xb8d   : > { %v4603_v1 = vadd.f32 %v4602_v0, %v4601_v63  ;;  %v5141_v0 = vld [vmem:[#allocation17 + $0x70] ss:$8 sps:$4 sm:$0xff]  }
 0xb8e   : > { %v4604_v3 = vpop.f32.mrf.mxu1 }
 0xb8f   : > { %3180 = vperm.xlu1 %5032, %v4603_v1  }
 0xb90   : > { %v4605_v5 = vpop.f32.mrf.mxu1 }
 0xb91   : > { %v4606_v6 = vadd.f32 %v4605_v5, %v4604_v3  ;;  %v3172_v7 = vpop.f32.mrf.mxu0  ;;  %v5146_v3 = vld [vmem:[#allocation17 + $0x64] ss:$8 sps:$4 sm:$0xff]   ;;  %v5144_v5 = vld [vmem:[#allocation17 + $0x60] ss:$8 sps:$4 sm:$0xff]  }
 0xb92   : > { %v3191_v10 = vrot.slane %v3172_v7, %v6196_v19  ;;  %v3287_v13 = vrot.slane %v3172_v7, %v6198_v20  ;;  %v5150_v7 = vld [vmem:[#allocation17 + $0x50] ss:$8 sps:$4 sm:$0xff]  }
 0xb93   : > { %3185 = vperm.xlu0 %5030, %v4606_v6   ;;  %5033 = vset.pattern.permute.xlu1 %v5621_v48  ;;  %v3174_v8 = vpop.f32.mrf.mxu0 }
 0xb94   : > { %3277 = vperm.xlu1 %5033, %v4603_v1   ;;  %v5143_v1 = vld [vmem:[#allocation17 + $0x74] ss:$8 sps:$4 sm:$0xff]   ;;  %v5158_v8 = vld [vmem:[#allocation17 + $0x44] ss:$8 sps:$4 sm:$0xff]  }
 0xb95   : > { %v3175_v9 = vpop.f32.mrf.mxu0  ;;  %3609 = vmatprep.subr.bf16.mxu1 %v5143_v1 }
 0xb96   : > { %3610 = vmatpush1.bf16.msra.mxu1 %v5141_v0  ;;  %v5156_v9 = vld [vmem:[#allocation17 + $0x40] ss:$8 sps:$4 sm:$0xff]  }
 0xb97   : > { %v3176_v49 = vpop.f32.mrf.mxu0  ;;  %3611 = vmatprep.subr.bf16.mxu1 %v5146_v3 }
 0xb98   : > { %3281 = vperm.xlu1 %5033, %v4606_v6   ;;  %v5152_v6 = vld [vmem:[#allocation17 + $0x54] ss:$8 sps:$4 sm:$0xff]  }
 0xb99   : > { %v5164_v49 = vld [vmem:[#allocation17 + $0x34] ss:$8 sps:$4 sm:$0xff]  }
 0xb9a   : > { %3612 = vmatpush1.bf16.msra.mxu1 %v5144_v5 }
 0xb9b   : > { %3613 = vmatprep.subr.bf16.mxu1 %v5152_v6 }
 0xb9c   : > { %5034 = vset.pattern.permute.xlu1 %v5618_v21 }
 0xb9e   : > { %3614 = vmatpush1.bf16.msra.mxu1 %v5150_v7 }
 0xb9f   : > { %3615 = vmatprep.subr.bf16.mxu1 %v5158_v8 }
 0xba2   : > { %3616 = vmatpush1.bf16.msra.mxu1 %v5156_v9 }
 0xba3   : > { %3617 = vmatprep.subr.bf16.mxu1 %v5164_v49 }
 0xc0a   : > { %v3181_v11 = vpop.permute.xlu1 %3180 }
 0xc0b   : > { %v3192_v12 = vadd.f32 %v3191_v10, %v3181_v11  ;;  %v5170_v11 = vld [vmem:[#allocation17 + $0x24] ss:$8 sps:$4 sm:$0xff]  }
 0xc0d   : > { %v3194_v14 = vmul.f32 0.2, %v3192_v12 }
 0xc0e   : > { %v3186_v36 = vpop.permute.xlu0 %3185 }
 0xc0f   : > { %v3196_v15 = vmax.f32 %v3192_v12, %v3194_v14  ;;  %v3193_v2 = vadd.f32 %v3191_v10, %v3186_v36  ;;  %v3278_v56 = vpop.permute.xlu1 %3277  ;;  %v5162_v10 = vld [vmem:[#allocation17 + $0x30] ss:$8 sps:$4 sm:$0xff]   ;;  %v5168_v12 = vld [vmem:[#allocation17 + $0x20] ss:$8 sps:$4 sm:$0xff]  }
 0xc10   : > { %v3288_v16 = vadd.f32 %v3287_v13, %v3278_v56  ;;  %3618 = vmatpush1.bf16.msra.mxu1 %v5162_v10  ;;  %v5190_v10 = vld [vmem:[%s6481_s18 + $0x38] sm:$0xff]  }
 0xc11   : > { %v3195_v17 = vmul.f32 0.2, %v3193_v2  ;;  %v3198_v18 = vadd.f32 %v3196_v15, %v6202_v32  ;;  %3619 = vmatprep.subr.bf16.mxu1 %v5170_v11 }
 0xc12   : > { %v3290_v22 = vmul.f32 0.2, %v3288_v16 }
 0xc13   : > { %v3197_v23 = vmax.f32 %v3193_v2, %v3195_v17  ;;  %v3282_v24 = vpop.permute.xlu1 %3281  ;;  %v3200_v25 = vsel %vm2488_vm2, %v3198_v18, -inf }
 0xc14   : > { %v3292_v26 = vmax.f32 %v3288_v16, %v3290_v22  ;;  %v3289_v27 = vadd.f32 %v3287_v13, %v3282_v24  ;;  %3201 = vmax.xlane.f32.xlu0 %v3200_v25  ;;  %3620 = vmatpush1.bf16.msra.mxu1 %v5168_v12  ;;  %v5149_v22 = vld [vmem:[#allocation17 + $0xf4] ss:$8 sps:$4 sm:$0xff]  }
 0xc15   : > { %v3199_v28 = vadd.f32 %v3197_v23, %v6205_v43  ;;  %v5191_v12 = vld [vmem:[%s6481_s18 + $0x70] sm:$0xff]  }
 0xc16   : > { %v3291_v29 = vmul.f32 0.2, %v3289_v27  ;;  %v3294_v30 = vadd.f32 %v3292_v26, %v6202_v32 }
 0xc17   : > { %v3203_v31 = vsel %vm2488_vm2, %v3199_v28, -inf }
 0xc18   : > { %v3293_v33 = vmax.f32 %v3289_v27, %v3291_v29  ;;  %3204 = vmax.xlane.f32.xlu1 %v3203_v31  ;;  %v3296_v34 = vsel %vm2488_vm2, %v3294_v30, -inf  ;;  %v5147_v27 = vld [vmem:[#allocation17 + $0xf0] ss:$8 sps:$4 sm:$0xff]   ;;  %v5155_v29 = vld [vmem:[#allocation17 + $0xe4] ss:$8 sps:$4 sm:$0xff]  }
 0xc19   : > { %3297 = vmax.xlane.f32.xlu0 %v3296_v34  ;;  %v5161_v31 = vld [vmem:[#allocation17 + $0xd4] ss:$8 sps:$4 sm:$0xff]   ;;  %v5165_v34 = vld [vmem:[#allocation17 + $0xc0] ss:$8 sps:$4 sm:$0xff]  }
 0xc1a   : > { %v3295_v35 = vadd.f32 %v3293_v33, %v6205_v43  ;;  %v5159_v33 = vld [vmem:[#allocation17 + $0xd0] ss:$8 sps:$4 sm:$0xff]  }
 0xc1c   : > { %v3299_v38 = vsel %vm2488_vm2, %v3295_v35, -inf }
 0xc1d   : > { %3300 = vmax.xlane.f32.xlu0 %v3299_v38  ;;  %v5176_v38 = vld [vmem:[#allocation17 + $0x14] ss:$8 sps:$4 sm:$0xff]  }
 0xc1e   : > { %3621 = vmatprep.subr.bf16.mxu1 %v5176_v38 }
 0xc9d   : > { %v3202_v39 = vpop.xlane.xlu0 %3201 }
 0xc9e   : > { %v3206_v41 = vsub.f32 %v3198_v18, %v3202_v39  ;;  %v5171_v39 = vld [vmem:[#allocation17 + $0xb0] ss:$8 sps:$4 sm:$0xff]  }
 0xca0   : > { %v3208_v42 = vmul.f32 1.442695, %v3206_v41  ;;  %v5174_v41 = vld [vmem:[#allocation17 + $0x10] ss:$8 sps:$4 sm:$0xff]  }
 0xca1   : > { %v3205_v44 = vpop.xlane.xlu1 %3204  ;;  %3622 = vmatpush1.bf16.msra.mxu1 %v5174_v41 }
 0xca2   : > { %5221 = vpow2.f32 %v3208_v42  ;;  %v3207_v45 = vsub.f32 %v3199_v28, %v3205_v44  ;;  %v3298_v46 = vpop.xlane.xlu0 %3297  ;;  %v5179_v42 = vld [vmem:[#allocation17 + $0xa4] ss:$8 sps:$4 sm:$0xff]   ;;  %v5177_v44 = vld [vmem:[#allocation17 + $0xa0] ss:$8 sps:$4 sm:$0xff]  }
 0xca3   : > { %v3302_v40 = vsub.f32 %v3294_v30, %v3298_v46  ;;  %v5153_v30 = vld [vmem:[#allocation17 + $0xe0] ss:$8 sps:$4 sm:$0xff]   ;;  %v5185_v46 = vld [vmem:[#allocation17 + $0x94] ss:$8 sps:$4 sm:$0xff]  }
 0xca4   : > { %v3210_v47 = vmul.f32 1.442695, %v3207_v45  ;;  %v5180_v45 = vld [vmem:[#allocation17] ss:$8 sps:$4 sm:$0xff]  }
 0xca5   : > { %v3304_v50 = vmul.f32 1.442695, %v3302_v40  ;;  %v5183_v40 = vld [vmem:[#allocation17 + $0x90] ss:$8 sps:$4 sm:$0xff]  }
 0xca6   : > { %5223 = vpow2.f32 %v3210_v47  ;;  %v3301_v52 = vpop.xlane.xlu0 %3300  ;;  %v5188_v47 = vld [vmem:[#allocation17 + $0x84] ss:$8 sps:$4 sm:$0xff]  }
 0xca7   : > { %5225 = vpow2.f32 %v3304_v50  ;;  %v3303_v53 = vsub.f32 %v3295_v35, %v3301_v52  ;;  %v5173_v35 = vld [vmem:[#allocation17 + $0xb4] ss:$8 sps:$4 sm:$0xff]   ;;  %v5186_v50 = vld [vmem:[#allocation17 + $0x80] ss:$8 sps:$4 sm:$0xff]  }
 0xca8   : > { %v5189_v52 = vld [vmem:[%s6481_s18 + $0x78] sm:$0xff]  }
 0xca9   : > { %v3306_v54 = vmul.f32 1.442695, %v3303_v53  ;;  %v4478_v53 = vld [vmem:[%s6479_s16] ss:$0 sm:$0xff] }
 0xcab   : > { %5227 = vpow2.f32 %v3306_v54 }
 0xcaf   : > { %v5222_v55 = vpop.eup %5221 }
 0xcb0   : > { %v3212_v37 = vsel %vm2488_vm2, %v5222_v55, 0.0 }
 0xcb1   : > { %3213 = vadd.xlane.f32.xlu1 %v3212_v37 }
 0xcb3   : > { %v5224_v51 = vpop.eup %5223 }
 0xcb4   : > { %v5226_v57 = vpop.eup %5225  ;;  %v3215_v58 = vsel %vm2488_vm2, %v5224_v51, 0.0 }
 0xcb5   : > { %3216 = vadd.xlane.f32.xlu0 %v3215_v58  ;;  %v3308_v61 = vsel %vm2488_vm2, %v5226_v57, 0.0 }
 0xcb6   : > { %3309 = vadd.xlane.f32.xlu1 %v3308_v61 }
 0xcb8   : > { %v5228_v62 = vpop.eup %5227 }
 0xcb9   : > { %v3311_v63 = vsel %vm2488_vm2, %v5228_v62, 0.0 }
 0xcba   : > { %3312 = vadd.xlane.f32.xlu0 %v3311_v63  ;;  %v4480_v63 = vld [vmem:[%s6479_s16 + $0x1] ss:$0 sm:$0xff] }
 0xd3a   : > { %v3214_v13 = vpop.xlane.xlu1 %3213 }
 0xd3b   : > { %5229 = vrcp.f32 %v3214_v13  ;;  %v5192_v13 = vld [vmem:[%s6481_s18 + $0x30] sm:$0xff]  }
 0xd3e   : > { %v3217_v14 = vpop.xlane.xlu0 %3216 }
 0xd3f   : > { %5231 = vrcp.f32 %v3217_v14  ;;  %v3310_v36 = vpop.xlane.xlu1 %3309  ;;  %v5193_v14 = vld [vmem:[%s6481_s18 + $0x68] sm:$0xff]  }
 0xd43   : > { %v3313_v15 = vpop.xlane.xlu0 %3312 }
 0xd44   : > { %5233 = vrcp.f32 %v3313_v15  ;;  %v5195_v15 = vld [vmem:[%s6481_s18 + $0x60] sm:$0xff]  }
 0xd45   : > { %5235 = vrcp.f32 %v3310_v36  ;;  %v5194_v36 = vld [vmem:[%s6481_s18 + $0x28] sm:$0xff]  }
 0xd48   : > { %v5230_v2 = vpop.eup %5229 }
 0xd49   : > { %v3220_v16 = vmul.f32 %v5230_v2, %v5222_v55  ;;  %v5196_v2 = vld [vmem:[%s6481_s18 + $0x20] sm:$0xff]  }
 0xd4c   : > { %v5232_v56 = vpop.eup %5231 }
 0xd4d   : > { %v3221_v17 = vmul.f32 %v5232_v56, %v5224_v51  ;;  %v5197_v56 = vld [vmem:[%s6481_s18 + $0x58] sm:$0xff]  }
 0xd4f   : > { %v3222_v18 = vpack.c.bf16 %v3221_v17, %v3220_v16  ;;  %v5198_v16 = vld [vmem:[%s6481_s18 + $0x18] sm:$0xff]   ;;  %v5199_v17 = vld [vmem:[%s6481_s18 + $0x50] sm:$0xff]  }
 0xd51   : > { %v5234_v23 = vpop.eup %5233  ;;  %4706 = vmatmul.mubr.msk.bf16.vlgmr.msra.gmra.mxu0 %vm2488_vm2, %v3222_v18  ;;  %v5200_v18 = vld [vmem:[%s6481_s18 + $0x10] sm:$0xff]  }
 0xd52   : > { %v5236_v24 = vpop.eup %5235  ;;  %4710 = vmatpush3.bf16.msra.mxu0 %v6284_v60  ;;  %4711 = vmatprep.mubr.msk.bf16.mxu0 %vm5622_vm3, %v5619_v59  ;;  %v3317_v25 = vmul.f32 %v5234_v23, %v5228_v62  ;;  %v5167_v60 = vld [vmem:[#allocation17 + $0xc4] ss:$8 sps:$4 sm:$0xff]  }
 0xd53   : > { %3486 = vmatprep.subr.bf16.mxu0 %v5149_v22  ;;  %v3316_v26 = vmul.f32 %v5236_v24, %v5226_v57  ;;  %v5201_v22 = vld [vmem:[%s6481_s18 + $0x48] sm:$0xff]   ;;  %v5203_v24 = vld [vmem:[%s6481_s18 + $0x40] sm:$0xff]  }
 0xd54   : > { %v5202_v23 = vld [vmem:[%s6481_s18 + $0x8] sm:$0xff]  }
 0xd55   : > { %v3318_v28 = vpack.c.bf16 %v3317_v25, %v3316_v26  ;;  %v5204_v25 = vld [vmem:[%s6481_s18] sm:$0xff]  }
 0xd56   : > { %v4530_v26 = vld.sshfl [vmem:[%s6543_s26] sm:$0x11 pattern:$0x75316420] }
 0xd59   : > { %4712 = vmatmul.mubr.msk.bf16.vlgmr.msra.gmra.mxu0 %vm2488_vm2, %v3318_v28 }
 0xd5a   : > { %3487 = vmatpush1.bf16.msra.mxu0 %v5147_v27  ;;  %3518 = vmatprep.mubr.bf16.mxu0 %v5618_v21  ;;  %v5182_v21 = vld [vmem:[#allocation17 + $0x4] ss:$8 sps:$4 sm:$0xff]   ;;  %v3832_v27 = vcombine.high %v4530_v26, %v4530_v26 }
 0xd5b   : > { %3488 = vmatprep.subr.bf16.mxu0 %v5155_v29  ;;  %3623 = vmatprep.subr.bf16.mxu1 %v5182_v21 }
 0xd5c   : > { %3624 = vmatpush1.bf16.msra.mxu1 %v5180_v45  ;;  %v3846_v28 = vrot.slane %v3832_v27, %v6189_v4 }
 0xd5e   : > { %3489 = vmatpush1.bf16.msra.mxu0 %v5153_v30 }
 0xd5f   : > { %3490 = vmatprep.subr.bf16.mxu0 %v5161_v31 }
 0xd62   : > { %3491 = vmatpush1.bf16.msra.mxu0 %v5159_v33 }
 0xd63   : > { %3492 = vmatprep.subr.bf16.mxu0 %v5167_v60 }
 0xd66   : > { %3493 = vmatpush1.bf16.msra.mxu0 %v5165_v34 }
 0xd67   : > { %3494 = vmatprep.subr.bf16.mxu0 %v5173_v35 }
 0xd6a   : > { %3495 = vmatpush1.bf16.msra.mxu0 %v5171_v39 }
 0xd6b   : > { %3496 = vmatprep.subr.bf16.mxu0 %v5179_v42 }
 0xd6e   : > { %3497 = vmatpush1.bf16.msra.mxu0 %v5177_v44 }
 0xd6f   : > { %3498 = vmatprep.subr.bf16.mxu0 %v5185_v46  ;;  %v3839_v46 = vrot.slane %v4530_v26, %v6189_v4 }
 0xd72   : > { %3499 = vmatpush1.bf16.msra.mxu0 %v5183_v40 }
 0xd73   : > { %3500 = vmatprep.subr.bf16.mxu0 %v5188_v47 }
 0xd76   : > { %3501 = vmatpush1.bf16.msra.mxu0 %v5186_v50 }
 0xd77   : > { %4611 = vmatprep.subr.bf16.mxu0 %v5189_v52 }
 0xe11   : > { %v3267_v54 = vpop.f32.mrf.mxu0 }
 0xe12   : > { %v3268_v37 = vadd.f32 %v4478_v53, %v3267_v54 }
 0xe13   : > { %v4707_v55 = vpop.f32.mrf.mxu0 }
 0xe14   : > { %v3274_v61 = vmax.f32 %v3268_v37, 0.0 }
 0xe15   : > { %v3270_v51 = vpop.f32.mrf.mxu0 }
 0xe16   : > { %v3271_v57 = vadd.f32 %v4478_v53, %v3270_v51 }
 0xe17   : > { %v4708_v58 = vpop.f32.mrf.mxu0 }
 0xe18   : > { %v3275_v62 = vmax.f32 %v3271_v57, 0.0 }
 0xe19   : > { %v3363_v0 = vpop.f32.mrf.mxu0 }
 0xe1a   : > { %v3372_v1 = vpack.c.bf16 %v3275_v62, %v3274_v61  ;;  %v3364_v5 = vadd.f32 %v4480_v63, %v3363_v0 }
 0xe1b   : > { %v4713_v3 = vpop.f32.mrf.mxu0 }
 0xe1c   : > { %3642 = vmatmul.mubr.bf16.vlgmr.msra.gmra.mxu1 %v3372_v1  ;;  %v3370_v9 = vmax.f32 %v3364_v5, 0.0 }
 0xe1d   : > { %v3366_v6 = vpop.f32.mrf.mxu0  ;;  %3881 = vmatprep.mubr.bf16.mxu1 %v3846_v28 }
 0xe1e   : > { %v3367_v7 = vadd.f32 %v4480_v63, %v3366_v6 }
 0xe1f   : > { %v4714_v8 = vpop.f32.mrf.mxu0 }
 0xe20   : > { %v3371_v49 = vmax.f32 %v3367_v7, 0.0 }
 0xe22   : > { %v3389_v11 = vpack.c.bf16 %v3371_v49, %v3370_v9 }
 0xe24   : > { %3519 = vmatmul.mubr.bf16.vlgmr.msra.gmra.mxu0 %v3389_v11 }
 0xe25   : > { %4612 = vmatpush3.bf16.msra.mxu0 %v5190_v10 }
 0xe26   : > { %4613 = vmatprep.subr.bf16.mxu0 %v5191_v12 }
 0xe29   : > { %4614 = vmatpush3.bf16.msra.mxu0 %v5192_v13 }
 0xe2a   : > { %4615 = vmatprep.subr.bf16.mxu0 %v5193_v14 }
 0xe2d   : > { %4616 = vmatpush3.bf16.msra.mxu0 %v5194_v36 }
 0xe2e   : > { %4617 = vmatprep.subr.bf16.mxu0 %v5195_v15 }
 0xe31   : > { %4618 = vmatpush3.bf16.msra.mxu0 %v5196_v2 }
 0xe32   : > { %4619 = vmatprep.subr.bf16.mxu0 %v5197_v56 }
 0xe35   : > { %4620 = vmatpush3.bf16.msra.mxu0 %v5198_v16 }
 0xe36   : > { %4621 = vmatprep.subr.bf16.mxu0 %v5199_v17 }
 0xe39   : > { %4622 = vmatpush3.bf16.msra.mxu0 %v5200_v18 }
 0xe3a   : > { %4623 = vmatprep.subr.bf16.mxu0 %v5201_v22 }
 0xe3d   : > { %4624 = vmatpush3.bf16.msra.mxu0 %v5202_v23 }
 0xe3e   : > { %4625 = vmatprep.subr.bf16.mxu0 %v5203_v24 }
 0xe41   : > { %4626 = vmatpush3.bf16.msra.mxu0 %v5204_v25 }
 0xedc   : > { %v3643_v29 = vpop.f32.mrf.mxu1 }
 0xede   : > { %v3645_v30 = vpop.f32.mrf.mxu1 }
 0xee0   : > { %v3647_v33 = vpop.f32.mrf.mxu1 }
 0xee2   : > { %v3649_v35 = vpop.f32.mrf.mxu1 }
 0xee4   : > { %v3520_v31 = vpop.f32.mrf.mxu0 }
 0xee5   : > { %v3644_v21 = vadd.f32 %v3643_v29, %v3520_v31 }
 0xee6   : > { %v3522_v60 = vpop.f32.mrf.mxu0 }
 0xee7   : > { %v3646_v41 = vadd.f32 %v3645_v30, %v3522_v60 }
 0xee8   : > { %v3524_v34 = vpop.f32.mrf.mxu0 }
 0xee9   : > { %v3648_v38 = vadd.f32 %v3647_v33, %v3524_v34 }
 0xeea   : > { %v3526_v39 = vpop.f32.mrf.mxu0 }
 0xeeb   : > { %v3650_v42 = vadd.f32 %v3649_v35, %v3526_v39  ;;  %v3652_v45 = vpack.c.bf16 %v3648_v38, %v3644_v21 }
 0xeed   : > { %v6374_v44 = vpack.c.bf16 %v3650_v42, %v3646_v41 }
 0xeef   : > { %3814 = vmatprep.mubr.bf16.mxu0 %v6374_v44  ;;  %3863 = vmatprep.subr.bf16.mxu1 %v6374_v44 }
 0xef0   : > { %3815 = vmatmul.mubr.bf16.vlgmr.msra.gmra.mxu0 %v3652_v45  ;;  %3864 = vmatpush1.bf16.xpose.msra.mxu1 %v3652_v45 }
 0xef1   : > { %4715 = vmatprep.subr.bf16.mxu1 %v5619_v59 }
 0xef7   : > { %3882 = vmatmul.mubr.bf16.vlgmr.msra.gmra.mxu1 %v3839_v46 }
 0xef8   : > { %4716 = vmatpush3.bf16.msra.mxu1 %v3652_v45  ;;  %4717 = vmatprep.mubr.msk.bf16.mxu1 %vm5622_vm3, %v5619_v59 }
 0xef9   : > { %4721 = vmatprep.subr.bf16.mxu1 %v5619_v59 }
 0xfb0   : > { %v4627_v40 = vpop.f32.mrf.mxu0 }
 0xfb2   : > { %v4628_v47 = vpop.f32.mrf.mxu0 }
 0xfb3   : > { %v4629_v50 = vadd.f32 %v4628_v47, %v4627_v40 }
 0xfb4   : > { %v4630_v52 = vpop.f32.mrf.mxu0 }
 0xfb5   : > { %3891 = vperm.xlu1 %5034, %v4629_v50  }
 0xfb6   : > { %v4631_v53 = vpop.f32.mrf.mxu0 }
 0xfb7   : > { %v4632_v54 = vadd.f32 %v4631_v53, %v4630_v52  ;;  %v3883_v55 = vpop.f32.mrf.mxu1 }
 0xfb8   : > { %v3902_v57 = vrot.slane %v3883_v55, %v6196_v19  ;;  %v3996_v62 = vrot.slane %v3883_v55, %v6198_v20 }
 0xfb9   : > { %3896 = vperm.xlu0 %5030, %v4632_v54   ;;  %5035 = vset.pattern.permute.xlu1 %v5621_v48  ;;  %v3885_v37 = vpop.f32.mrf.mxu1 }
 0xfba   : > { %3986 = vperm.xlu1 %5035, %v4629_v50  }
 0xfbb   : > { %v3886_v4 = vpop.f32.mrf.mxu1 }
 0xfbc   : > { %v4531_v4 = vld [vmem:[%s6544_s1] ss:$0 sm:$0xff] }
 0xfbd   : > { %v3887_v51 = vpop.f32.mrf.mxu1  ;;  %5036 = vset.pattern.permute.xlu0 %v5621_v48 }
 0xfbe   : > { %3990 = vperm.xlu1 %5035, %v4632_v54  }
0x1030   : > { %v3892_v58 = vpop.permute.xlu1 %3891 }
0x1031   : > { %v3903_v61 = vadd.f32 %v3902_v57, %v3892_v58 }
0x1033   : > { %v3905_v63 = vmul.f32 0.2, %v3903_v61 }
0x1034   : > { %v3897_v0 = vpop.permute.xlu0 %3896 }
0x1035   : > { %v3907_v1 = vmax.f32 %v3903_v61, %v3905_v63  ;;  %v3904_v3 = vadd.f32 %v3902_v57, %v3897_v0  ;;  %v3987_v5 = vpop.permute.xlu1 %3986 }
0x1036   : > { %v3997_v6 = vadd.f32 %v3996_v62, %v3987_v5 }
0x1037   : > { %v3906_v7 = vmul.f32 0.2, %v3904_v3  ;;  %v3909_v8 = vadd.f32 %v3907_v1, %v6202_v32 }
0x1038   : > { %v3999_v9 = vmul.f32 0.2, %v3997_v6 }
0x1039   : > { %v3908_v49 = vmax.f32 %v3904_v3, %v3906_v7  ;;  %v3991_v10 = vpop.permute.xlu1 %3990  ;;  %v3911_v48 = vsel %vm2488_vm2, %v3909_v8, -inf }
0x103a   : > { %v4001_v11 = vmax.f32 %v3997_v6, %v3999_v9  ;;  %v3998_v19 = vadd.f32 %v3996_v62, %v3991_v10  ;;  %3912 = vmax.xlane.f32.xlu0 %v3911_v48 }
0x103b   : > { %v3910_v12 = vadd.f32 %v3908_v49, %v6205_v43 }
0x103c   : > { %v4000_v20 = vmul.f32 0.2, %v3998_v19  ;;  %v4003_v13 = vadd.f32 %v4001_v11, %v6202_v32 }
0x103d   : > { %v3914_v14 = vsel %vm2488_vm2, %v3910_v12, -inf }
0x103e   : > { %v4002_v36 = vmax.f32 %v3998_v19, %v4000_v20  ;;  %3915 = vmax.xlane.f32.xlu1 %v3914_v14  ;;  %v4005_v15 = vsel %vm2488_vm2, %v4003_v13, -inf }
0x103f   : > { %4006 = vmax.xlane.f32.xlu0 %v4005_v15 }
0x1040   : > { %v4004_v2 = vadd.f32 %v4002_v36, %v6205_v43 }
0x1042   : > { %v4008_v56 = vsel %vm2488_vm2, %v4004_v2, -inf }
0x1043   : > { %4009 = vmax.xlane.f32.xlu0 %v4008_v56 }
0x10c3   : > { %v3913_v16 = vpop.xlane.xlu0 %3912 }
0x10c4   : > { %v3917_v17 = vsub.f32 %v3909_v8, %v3913_v16 }
0x10c6   : > { %v3919_v18 = vmul.f32 1.442695, %v3917_v17 }
0x10c7   : > { %v3916_v22 = vpop.xlane.xlu1 %3915 }
0x10c8   : > { %5237 = vpow2.f32 %v3919_v18  ;;  %v3918_v23 = vsub.f32 %v3910_v12, %v3916_v22  ;;  %v4007_v24 = vpop.xlane.xlu0 %4006 }
0x10c9   : > { %v4011_v32 = vsub.f32 %v4003_v13, %v4007_v24 }
0x10ca   : > { %v3921_v25 = vmul.f32 1.442695, %v3918_v23 }
0x10cb   : > { %v4013_v26 = vmul.f32 1.442695, %v4011_v32 }
0x10cc   : > { %5239 = vpow2.f32 %v3921_v25  ;;  %v4010_v27 = vpop.xlane.xlu0 %4009 }
0x10cd   : > { %5241 = vpow2.f32 %v4013_v26  ;;  %v4012_v28 = vsub.f32 %v4004_v2, %v4010_v27 }
0x10cf   : > { %v4015_v29 = vmul.f32 1.442695, %v4012_v28 }
0x10d1   : > { %5243 = vpow2.f32 %v4015_v29 }
0x10d5   : > { %v5238_v43 = vpop.eup %5237 }
0x10d6   : > { %v3923_v30 = vsel %vm2488_vm2, %v5238_v43, 0.0 }
0x10d7   : > { %3924 = vadd.xlane.f32.xlu1 %v3923_v30 }
0x10d9   : > { %v5240_v31 = vpop.eup %5239 }
0x10da   : > { %v5242_v33 = vpop.eup %5241  ;;  %v3926_v60 = vsel %vm2488_vm2, %v5240_v31, 0.0 }
0x10db   : > { %3927 = vadd.xlane.f32.xlu0 %v3926_v60  ;;  %v4017_v34 = vsel %vm2488_vm2, %v5242_v33, 0.0 }
0x10dc   : > { %4018 = vadd.xlane.f32.xlu1 %v4017_v34 }
0x10de   : > { %v5244_v35 = vpop.eup %5243 }
0x10df   : > { %v4020_v38 = vsel %vm2488_vm2, %v5244_v35, 0.0 }
0x10e0   : > { %4021 = vadd.xlane.f32.xlu0 %v4020_v38 }
0x1160   : > { %v3925_v39 = vpop.xlane.xlu1 %3924 }
0x1161   : > { %5245 = vrcp.f32 %v3925_v39 }
0x1164   : > { %v3928_v41 = vpop.xlane.xlu0 %3927 }
0x1165   : > { %5247 = vrcp.f32 %v3928_v41  ;;  %v4019_v42 = vpop.xlane.xlu1 %4018 }
0x1169   : > { %v4022_v21 = vpop.xlane.xlu0 %4021 }
0x116a   : > { %5249 = vrcp.f32 %v4022_v21 }
0x116b   : > { %5251 = vrcp.f32 %v4019_v42 }
0x116e   : > { %v5246_v45 = vpop.eup %5245 }
0x116f   : > { %v3931_v40 = vmul.f32 %v5246_v45, %v5238_v43 }
0x1172   : > { %v5248_v46 = vpop.eup %5247 }
0x1173   : > { %v3932_v47 = vmul.f32 %v5248_v46, %v5240_v31 }
0x1175   : > { %v3933_v50 = vpack.c.bf16 %v3932_v47, %v3931_v40 }
0x1177   : > { %v5250_v52 = vpop.eup %5249  ;;  %4718 = vmatmul.mubr.msk.bf16.vlgmr.msra.gmra.mxu1 %vm2488_vm2, %v3933_v50 }
0x1178   : > { %v5252_v53 = vpop.eup %5251  ;;  %4722 = vmatpush3.bf16.msra.mxu1 %v6374_v44  ;;  %4723 = vmatprep.mubr.msk.bf16.mxu1 %vm5622_vm3, %v5619_v59  ;;  %v4026_v54 = vmul.f32 %v5250_v52, %v5244_v35  ;;  %v4533_v59 = vld [vmem:[%s6544_s1 + $0x1] ss:$0 sm:$0xff] }
0x1179   : > { %v4025_v55 = vmul.f32 %v5252_v53, %v5242_v33 }
0x117b   : > { %v4027_v37 = vpack.c.bf16 %v4026_v54, %v4025_v55 }
0x117f   : > { %4724 = vmatmul.mubr.msk.bf16.vlgmr.msra.gmra.mxu1 %vm2488_vm2, %v4027_v37 }
0x1237   : > { %v3978_v51 = vpop.f32.mrf.mxu1 }
0x1238   : > { %v3979_v57 = vadd.f32 %v4531_v4, %v3978_v51 }
0x1239   : > { %v4719_v58 = vpop.f32.mrf.mxu1 }
0x123a   : > { %4079 = vadd.xlane.f32.xlu1 %v3979_v57 }
0x123b   : > { %v3981_v61 = vpop.f32.mrf.mxu1 }
0x123c   : > { %v3982_v62 = vadd.f32 %v4531_v4, %v3981_v61 }
0x123d   : > { %v4720_v63 = vpop.f32.mrf.mxu1 }
0x123e   : > { %4081 = vadd.xlane.f32.xlu0 %v3982_v62 }
0x123f   : > { %v4072_v44 = vpop.f32.mrf.mxu1 }
0x1240   : > { %v4073_v0 = vadd.f32 %v4533_v59, %v4072_v44 }
0x1241   : > { %v4725_v1 = vpop.f32.mrf.mxu1 }
0x1242   : > { %4083 = vadd.xlane.f32.xlu1 %v4073_v0 }
0x1243   : > { %v4075_v3 = vpop.f32.mrf.mxu1 }
0x1244   : > { %v4076_v5 = vadd.f32 %v4533_v59, %v4075_v3 }
0x1245   : > { %v4726_v6 = vpop.f32.mrf.mxu1 }
0x1246   : > { %4085 = vadd.xlane.f32.xlu0 %v4076_v5 }
0x12c3   : > { %v4080_v7 = vpop.xlane.xlu1 %4079 }
0x12c7   : > { %v4082_v8 = vpop.xlane.xlu0 %4081 }
0x12cb   : > { %v4084_v9 = vpop.xlane.xlu1 %4083 }
0x12cc   : > { %v4087_v49 = vadd.f32 %v4084_v9, %v4080_v7 }
0x12ce   : > { %v4089_v10 = vmul.f32 0.125, %v4087_v49 }
0x12cf   : > { %v4086_v48 = vpop.xlane.xlu0 %4085 }
0x12d0   : > { %4091 = vst [vmem:[%s5915_s28] sm:$0xff] %v4089_v10  ;;  %v4088_v11 = vadd.f32 %v4086_v48, %v4082_v8 }
0x12d2   : > { %v4090_v19 = vmul.f32 0.125, %v4088_v11 }
0x12d4   : > { %4092 = vst [vmem:[%s5915_s28 + $0x8] sm:$0xff] %v4090_v19 }
0x12d5 PF: > { %s6545_s2 = sld [smem:[#allocation32_spill]]  ;;  %s4540_s4 = sshll.u32 %s5757_s3, 8 }
0x12d6   : > { %s6546_s19 = sld [smem:[#allocation42_spill]]  ;;  %s4107_s24 = sshll.u32 %s5915_s28, 4  ;;  %s6419_s24 = int_to_ptr.vmem [resolvable:$true] %s4107_s24 }
0x12d7   : > { %s6423_s26 = scalar_lea.sflag [#allocation4], %s772_s29  ;;  %s5513_s23 = scalar_lea.vmem %s6419_s24, 256 }
0x12d8   : > { %p5514_p0 = scmp.ne.s32.totalorder %s6419_s24, %s5513_s23  ;;  %s5623_s3 = smov [#allocation19]  }
0x12d9   : > { %s5517_s27 = sshll.u32 %s5623_s3, 4  ;;  %s5518_s27 = int_to_ptr.vmem [resolvable:$false] %s5517_s27 }
0x12da   : > { %s5519_s20 = scalar_lea.vmem %s5518_s27, 512  ;;  %p5520_p3 = scmp.lt.s32.totalorder %s6419_s24, %s5518_s27 }
0x12db   : > { %p6547_p4 = scmp.ne.s32.totalorder %s6545_s2, 0  ;;  %p5521_p13 = scmp.lt.s32.totalorder %s5519_s20, %s5513_s23 }
0x12dc   : > { %s6416_s22 = scalar_lea.hbm %s6546_s19, %s4540_s4 }
0x12dd   : > { %p5515_p11 = pnand %p5514_p0, %p6547_p4  ;;  %p5522_p7 = por %p5521_p13, %p5520_p3 }
0x12df   : > { %p5516_p5 = pneg %p5515_p11 }
0x12e1   : > { %p5523_p8 = pnand %p5522_p7, %p5516_p5 }
0x12e3   : > { %5526 = shalt.err (!%p5523_p8)
}
0x12e4   : > { %s5527_s29 = scalar_lea.hbm %s6416_s22, 256  ;;  %s5531_s4 = scalar_lea.hbm %s6546_s19, 512 }
0x12e5   : > { %p5528_p9 = scmp.ne.s32.totalorder %s6416_s22, %s5527_s29  ;;  %p5532_p6 = scmp.lt.s32.totalorder %s6416_s22, %s6546_s19 }
0x12e6   : > { %p5533_p1 = scmp.lt.s32.totalorder %s5531_s4, %s5527_s29 }
0x12e7   : > { %p5529_p10 = pnand %p5528_p9, %p6547_p4 }
0x12e8   : > { %p5534_p2 = por %p5533_p1, %p5532_p6 }
0x12e9   : > { %p5530_p12 = pneg %p5529_p10 }
0x12eb   : > { %p5535_p0 = pnand %p5534_p2, %p5530_p12 }
0x12ed   : > { %5538 = shalt.err (!%p5535_p0)
}
0x12ee   : > { %s5624_s23 = smov 128   ;;  %s5625_s3 = smov 8  }
0x12ef   : > { %4767 = dma.vmem_to_hbm [thread:$0]  (%p6547_p4), %s6419_s24, 256, %s6416_s22, %s6423_s26, %s5624_s23, %s5624_s23, %s5625_s3  }
0x12f0 PF: > { %s6548_s27 = sld [smem:[#allocation29_spill]] }
0x12f1   : > { %s6549_s20 = sld [smem:[#allocation27_spill]] }
0x12f2   : > { %s6550_s28 = sld [smem:[#allocation33_spill]] }
0x12f6   : > { %p4824_p11 = scmp.ge.s32.totalorder %s6548_s27, 2 }
0x12f7   : > { %s4122_s0 = sand.u32 1, %s6549_s20  }
0x12f8   : > { %p6551_p5 = scmp.ne.s32.totalorder %s6550_s28, 0  ;;  %s4123_s29 = scalar_lea.sflag [#allocation4], %s4122_s0 }
0x12fa   : > { %p4801_p3 = pnand %p4824_p11, %p6551_p5 }
0x12fc   : > { %p4802_p13 = pneg %p4801_p3 }
0x12fe   : > { %5580 = dma.done.wait (%p4802_p13), %s4123_s29, 256  }
0x12ff   : > { %5582 = vsyncadd (%p4802_p13), %s4123_s29, 4294967040  ;;  %s6552_s27 = sld [smem:[#allocation30_spill]]  ;;  %s6555_s2 = smov %s5589_s25 }
0x1300   : > { %s6553_s4 = sld [smem:[#allocation28_spill]] }
0x1301   : > { %s6554_s26 = sld [smem:[#allocation31_spill]] }
0x1305   : > { %p37_p7 = scmp.ge.s32.totalorder %s6552_s27, 4  }
0x1306   : > { %s6556_s25 = smov %s6553_s4 }
0x1307   :  { %39 = sbr.rel (!%p37_p7) target bundleno = 19 (0x13), region = 187 }
0x130c   :  { %4128 = vsyncpa [#allocation3], 1 }
0x130d   :  { %4130 = vsyncpa [#allocation3 + $0x1], 1 }
0x130e   :  { %4131 = vsyncpa [#allocation6], 1 }
0x130f   :  { %4132 = vsyncpa [#allocation9], 1 }
0x1310   :  { %4133 = vsyncpa [#allocation12], 1 }
0x1311   :  { %4134 = vsyncpa [#allocation15], 1 }
0x1312   :  { %4135 = vsyncpa [#allocation18], 1 }
0x1313   :  { %4136 = vsyncpa [#allocation4], 1 }
0x1314   :  { %4138 = vsyncpa [#allocation4 + $0x1], 1 }

</bundles_post_ra>
